<compile_context>
chip_gen: v5e
topology: v5e:2x2
jax: 0.10.0
libtpu: 0.0.40
codegen_flags: <defaults>
</compile_context>

<pallas_src>
import jax
import jax.numpy as jnp
from jax import lax
from jax.experimental import pallas as pl
from jax.experimental.pallas import tpu as pltpu

HIDDEN = 64
LANES = 128
SUBLANES = 8


def _round_up(x, m):
    return ((x + m - 1) // m) * m


def _fusion_kernel(mf_ref, ncf_ref, w1_ref, negb1_ref, w2_ref, c0_ref, o_ref):
    # mf/ncf/o: [tm, 128] f32 tiles, batch on the lane axis (lane-dense).
    # w1: [2, 64], negb1: [64] (= -b1), w2: [64], c0: [1] -- SMEM-resident.
    #
    # Hoist every SMEM scalar read above the strip loop; they become traced
    # scalars reused by all strips of this grid step.
    w1a = [w1_ref[0, j] for j in range(HIDDEN)]
    w1b = [w1_ref[1, j] for j in range(HIDDEN)]
    nb1 = [negb1_ref[j] for j in range(HIDDEN)]
    w2s = [w2_ref[j] for j in range(HIDDEN)]
    c0 = c0_ref[0]

    tm = mf_ref.shape[0]
    n_strips = tm // SUBLANES

    def strip_body(s, carry):
        # One (8,128) strip: load mf/ncf once, run the fully-unrolled 64-unit
        # chain with acc as a vreg carry, store once.
        r = pl.multiple_of(s * SUBLANES, SUBLANES)
        mf = mf_ref[pl.ds(r, SUBLANES), :]
        ncf = ncf_ref[pl.ds(r, SUBLANES), :]

        # Hidden unit 0 folds the broadcast of C0 (no separate zero/bias pass).
        t = mf * w1a[0] + ncf * w1b[0]
        acc = jnp.maximum(t, nb1[0]) * w2s[0] + c0
        for j in range(1, HIDDEN):
            t = mf * w1a[j] + ncf * w1b[j]
            acc = acc + jnp.maximum(t, nb1[j]) * w2s[j]

        o_ref[pl.ds(r, SUBLANES), :] = acc
        return carry

    lax.fori_loop(0, n_strips, strip_body, 0, unroll=min(8, n_strips))


def fusion_model(mf_score, ncf_score, params, block_rows=512):
    """Pallas implementation of FusionModel.forward.

    mf_score, ncf_score: [B] arrays. Returns [B] float32.
    """
    w1, b1, w2, b2 = params
    B = mf_score.shape[0]
    if B == 0:  # guard the degenerate empty batch
        return jnp.zeros((0,), jnp.float32)

    # Tile-count-first sizing: an even grid >= 2 (both v7x TensorCores get
    # work) and padding bounded by < one 8-row strip per tile.
    rows = pl.cdiv(B, LANES)
    n_tiles = max(2, pl.cdiv(rows, block_rows))
    if n_tiles % 2:
        n_tiles += 1
    tm = _round_up(pl.cdiv(rows, n_tiles), SUBLANES)
    rows_pad = n_tiles * tm
    n_pad = rows_pad * LANES

    def to_tiles(v):
        v = v.astype(jnp.float32).reshape(-1)
        v = jnp.pad(v, (0, n_pad - B))
        return v.reshape(rows_pad, LANES)

    mf2d = to_tiles(mf_score)
    ncf2d = to_tiles(ncf_score)

    # Parameter prep: bias-through-relu refold.
    w1f = w1.astype(jnp.float32).reshape(2, HIDDEN)
    b1f = b1.astype(jnp.float32).reshape(HIDDEN)
    w2f = w2.astype(jnp.float32).reshape(HIDDEN)
    b2f = b2.astype(jnp.float32).reshape(())
    c0 = (b2f + jnp.sum(b1f * w2f)).reshape(1)   # b2 + sum_j b1[j]*w2[j]
    neg_b1 = -b1f

    tile_spec = pl.BlockSpec((tm, LANES), lambda i: (i, 0))
    smem = pl.BlockSpec(memory_space=pltpu.MemorySpace.SMEM)

    out = pl.pallas_call(
        _fusion_kernel,
        out_shape=jax.ShapeDtypeStruct((rows_pad, LANES), jnp.float32),
        grid=(n_tiles,),
        in_specs=[
            tile_spec,   # mf  (pipelined HBM<->VMEM tiles)
            tile_spec,   # ncf
            smem,        # w1 [2, 64]
            smem,        # -b1 [64]
            smem,        # w2 [64]
            smem,        # c0 [1]
        ],
        out_specs=pl.BlockSpec((tm, LANES), lambda i: (i, 0)),
        compiler_params=pltpu.CompilerParams(
            dimension_semantics=("parallel",)),
    )(mf2d, ncf2d, w1f, neg_b1, w2f, c0)

    # Back to the original [B] layout (padded tail dropped).
    return out.reshape(-1)[:B]


def init_params(key):
    """Deterministic init matching nn.Linear shapes (uniform, Kaiming-like bounds)."""
    k1, k2, k3, k4 = jax.random.split(key, 4)
    bound1 = 1.0 / jnp.sqrt(2.0)    # fan_in = 2
    bound2 = 1.0 / jnp.sqrt(64.0)   # fan_in = 64
    w1 = jax.random.uniform(k1, (2, HIDDEN), jnp.float32, -bound1, bound1)
    b1 = jax.random.uniform(k2, (HIDDEN,), jnp.float32, -bound1, bound1)
    w2 = jax.random.uniform(k3, (HIDDEN, 1), jnp.float32, -bound2, bound2)
    b2 = jax.random.uniform(k4, (1,), jnp.float32, -bound2, bound2)
    return w1, b1, w2, b2


if __name__ == "__main__":
    key = jax.random.PRNGKey(0)
    kp, km, kn = jax.random.split(key, 3)

    B = 8
    params = init_params(kp)
    mf_score = jax.random.uniform(km, (B,), jnp.float32)
    ncf_score = jax.random.uniform(kn, (B,), jnp.float32)

    out = fusion_model(mf_score, ncf_score, params)
    out = jax.block_until_ready(out)

    # Pure-JAX reference check.
    w1, b1, w2, b2 = params
    x = jnp.stack([mf_score, ncf_score], axis=1)
    ref = jnp.squeeze(jnp.maximum(x @ w1 + b1, 0.0) @ w2 + b2)
    assert out.shape == (B,)
    assert jnp.allclose(out, ref, atol=1e-5, rtol=1e-5), (out, ref)

    print("KERNEL_OK")
</pallas_src>

<mosaic_0001>
module attributes {stable_mosaic.version = 11 : i64} {
  func.func @_fusion_kernel(%arg0: i32, %arg1: memref<8x128xf32, #tpu.memory_space<vmem>>, %arg2: memref<8x128xf32, #tpu.memory_space<vmem>>, %arg3: memref<2x64xf32, #tpu.memory_space<smem>>, %arg4: memref<64xf32, #tpu.memory_space<smem>>, %arg5: memref<64xf32, #tpu.memory_space<smem>>, %arg6: memref<1xf32, #tpu.memory_space<smem>>, %arg7: memref<8x128xf32, #tpu.memory_space<vmem>>) attributes {dimension_semantics = [#tpu.dimension_semantics<parallel>], iteration_bounds = array<i64: 2>, scalar_prefetch = 0 : i64, scratch_operands = 0 : i64, tpu.core_type = #tpu.core_type<tc>, window_params = [{transform_indices = @transform_0, window_bounds = array<i64: 8, 128>}, {transform_indices = @transform_1, window_bounds = array<i64: 8, 128>}, {transform_indices = @transform_2, window_bounds = array<i64: 2, 64>}, {transform_indices = @transform_3, window_bounds = array<i64: 64>}, {transform_indices = @transform_4, window_bounds = array<i64: 64>}, {transform_indices = @transform_5, window_bounds = array<i64: 1>}, {transform_indices = @transform_6, window_bounds = array<i64: 8, 128>}]} {
    %c0 = arith.constant 0 : index
    %c0_0 = arith.constant 0 : index
    %0 = memref.load %arg3[%c0, %c0_0] : memref<2x64xf32, #tpu.memory_space<smem>>
    %c0_1 = arith.constant 0 : index
    %c1 = arith.constant 1 : index
    %1 = memref.load %arg3[%c0_1, %c1] : memref<2x64xf32, #tpu.memory_space<smem>>
    %c0_2 = arith.constant 0 : index
    %c2 = arith.constant 2 : index
    %2 = memref.load %arg3[%c0_2, %c2] : memref<2x64xf32, #tpu.memory_space<smem>>
    %c0_3 = arith.constant 0 : index
    %c3 = arith.constant 3 : index
    %3 = memref.load %arg3[%c0_3, %c3] : memref<2x64xf32, #tpu.memory_space<smem>>
    %c0_4 = arith.constant 0 : index
    %c4 = arith.constant 4 : index
    %4 = memref.load %arg3[%c0_4, %c4] : memref<2x64xf32, #tpu.memory_space<smem>>
    %c0_5 = arith.constant 0 : index
    %c5 = arith.constant 5 : index
    %5 = memref.load %arg3[%c0_5, %c5] : memref<2x64xf32, #tpu.memory_space<smem>>
    %c0_6 = arith.constant 0 : index
    %c6 = arith.constant 6 : index
    %6 = memref.load %arg3[%c0_6, %c6] : memref<2x64xf32, #tpu.memory_space<smem>>
    %c0_7 = arith.constant 0 : index
    %c7 = arith.constant 7 : index
    %7 = memref.load %arg3[%c0_7, %c7] : memref<2x64xf32, #tpu.memory_space<smem>>
    %c0_8 = arith.constant 0 : index
    %c8 = arith.constant 8 : index
    %8 = memref.load %arg3[%c0_8, %c8] : memref<2x64xf32, #tpu.memory_space<smem>>
    %c0_9 = arith.constant 0 : index
    %c9 = arith.constant 9 : index
    %9 = memref.load %arg3[%c0_9, %c9] : memref<2x64xf32, #tpu.memory_space<smem>>
    %c0_10 = arith.constant 0 : index
    %c10 = arith.constant 10 : index
    %10 = memref.load %arg3[%c0_10, %c10] : memref<2x64xf32, #tpu.memory_space<smem>>
    %c0_11 = arith.constant 0 : index
    %c11 = arith.constant 11 : index
    %11 = memref.load %arg3[%c0_11, %c11] : memref<2x64xf32, #tpu.memory_space<smem>>
    %c0_12 = arith.constant 0 : index
    %c12 = arith.constant 12 : index
    %12 = memref.load %arg3[%c0_12, %c12] : memref<2x64xf32, #tpu.memory_space<smem>>
    %c0_13 = arith.constant 0 : index
    %c13 = arith.constant 13 : index
    %13 = memref.load %arg3[%c0_13, %c13] : memref<2x64xf32, #tpu.memory_space<smem>>
    %c0_14 = arith.constant 0 : index
    %c14 = arith.constant 14 : index
    %14 = memref.load %arg3[%c0_14, %c14] : memref<2x64xf32, #tpu.memory_space<smem>>
    %c0_15 = arith.constant 0 : index
    %c15 = arith.constant 15 : index
    %15 = memref.load %arg3[%c0_15, %c15] : memref<2x64xf32, #tpu.memory_space<smem>>
    %c0_16 = arith.constant 0 : index
    %c16 = arith.constant 16 : index
    %16 = memref.load %arg3[%c0_16, %c16] : memref<2x64xf32, #tpu.memory_space<smem>>
    %c0_17 = arith.constant 0 : index
    %c17 = arith.constant 17 : index
    %17 = memref.load %arg3[%c0_17, %c17] : memref<2x64xf32, #tpu.memory_space<smem>>
    %c0_18 = arith.constant 0 : index
    %c18 = arith.constant 18 : index
    %18 = memref.load %arg3[%c0_18, %c18] : memref<2x64xf32, #tpu.memory_space<smem>>
    %c0_19 = arith.constant 0 : index
    %c19 = arith.constant 19 : index
    %19 = memref.load %arg3[%c0_19, %c19] : memref<2x64xf32, #tpu.memory_space<smem>>
    %c0_20 = arith.constant 0 : index
    %c20 = arith.constant 20 : index
    %20 = memref.load %arg3[%c0_20, %c20] : memref<2x64xf32, #tpu.memory_space<smem>>
    %c0_21 = arith.constant 0 : index
    %c21 = arith.constant 21 : index
    %21 = memref.load %arg3[%c0_21, %c21] : memref<2x64xf32, #tpu.memory_space<smem>>
    %c0_22 = arith.constant 0 : index
    %c22 = arith.constant 22 : index
    %22 = memref.load %arg3[%c0_22, %c22] : memref<2x64xf32, #tpu.memory_space<smem>>
    %c0_23 = arith.constant 0 : index
    %c23 = arith.constant 23 : index
    %23 = memref.load %arg3[%c0_23, %c23] : memref<2x64xf32, #tpu.memory_space<smem>>
    %c0_24 = arith.constant 0 : index
    %c24 = arith.constant 24 : index
    %24 = memref.load %arg3[%c0_24, %c24] : memref<2x64xf32, #tpu.memory_space<smem>>
    %c0_25 = arith.constant 0 : index
    %c25 = arith.constant 25 : index
    %25 = memref.load %arg3[%c0_25, %c25] : memref<2x64xf32, #tpu.memory_space<smem>>
    %c0_26 = arith.constant 0 : index
    %c26 = arith.constant 26 : index
    %26 = memref.load %arg3[%c0_26, %c26] : memref<2x64xf32, #tpu.memory_space<smem>>
    %c0_27 = arith.constant 0 : index
    %c27 = arith.constant 27 : index
    %27 = memref.load %arg3[%c0_27, %c27] : memref<2x64xf32, #tpu.memory_space<smem>>
    %c0_28 = arith.constant 0 : index
    %c28 = arith.constant 28 : index
    %28 = memref.load %arg3[%c0_28, %c28] : memref<2x64xf32, #tpu.memory_space<smem>>
    %c0_29 = arith.constant 0 : index
    %c29 = arith.constant 29 : index
    %29 = memref.load %arg3[%c0_29, %c29] : memref<2x64xf32, #tpu.memory_space<smem>>
    %c0_30 = arith.constant 0 : index
    %c30 = arith.constant 30 : index
    %30 = memref.load %arg3[%c0_30, %c30] : memref<2x64xf32, #tpu.memory_space<smem>>
    %c0_31 = arith.constant 0 : index
    %c31 = arith.constant 31 : index
    %31 = memref.load %arg3[%c0_31, %c31] : memref<2x64xf32, #tpu.memory_space<smem>>
    %c0_32 = arith.constant 0 : index
    %c32 = arith.constant 32 : index
    %32 = memref.load %arg3[%c0_32, %c32] : memref<2x64xf32, #tpu.memory_space<smem>>
    %c0_33 = arith.constant 0 : index
    %c33 = arith.constant 33 : index
    %33 = memref.load %arg3[%c0_33, %c33] : memref<2x64xf32, #tpu.memory_space<smem>>
    %c0_34 = arith.constant 0 : index
    %c34 = arith.constant 34 : index
    %34 = memref.load %arg3[%c0_34, %c34] : memref<2x64xf32, #tpu.memory_space<smem>>
    %c0_35 = arith.constant 0 : index
    %c35 = arith.constant 35 : index
    %35 = memref.load %arg3[%c0_35, %c35] : memref<2x64xf32, #tpu.memory_space<smem>>
    %c0_36 = arith.constant 0 : index
    %c36 = arith.constant 36 : index
    %36 = memref.load %arg3[%c0_36, %c36] : memref<2x64xf32, #tpu.memory_space<smem>>
    %c0_37 = arith.constant 0 : index
    %c37 = arith.constant 37 : index
    %37 = memref.load %arg3[%c0_37, %c37] : memref<2x64xf32, #tpu.memory_space<smem>>
    %c0_38 = arith.constant 0 : index
    %c38 = arith.constant 38 : index
    %38 = memref.load %arg3[%c0_38, %c38] : memref<2x64xf32, #tpu.memory_space<smem>>
    %c0_39 = arith.constant 0 : index
    %c39 = arith.constant 39 : index
    %39 = memref.load %arg3[%c0_39, %c39] : memref<2x64xf32, #tpu.memory_space<smem>>
    %c0_40 = arith.constant 0 : index
    %c40 = arith.constant 40 : index
    %40 = memref.load %arg3[%c0_40, %c40] : memref<2x64xf32, #tpu.memory_space<smem>>
    %c0_41 = arith.constant 0 : index
    %c41 = arith.constant 41 : index
    %41 = memref.load %arg3[%c0_41, %c41] : memref<2x64xf32, #tpu.memory_space<smem>>
    %c0_42 = arith.constant 0 : index
    %c42 = arith.constant 42 : index
    %42 = memref.load %arg3[%c0_42, %c42] : memref<2x64xf32, #tpu.memory_space<smem>>
    %c0_43 = arith.constant 0 : index
    %c43 = arith.constant 43 : index
    %43 = memref.load %arg3[%c0_43, %c43] : memref<2x64xf32, #tpu.memory_space<smem>>
    %c0_44 = arith.constant 0 : index
    %c44 = arith.constant 44 : index
    %44 = memref.load %arg3[%c0_44, %c44] : memref<2x64xf32, #tpu.memory_space<smem>>
    %c0_45 = arith.constant 0 : index
    %c45 = arith.constant 45 : index
    %45 = memref.load %arg3[%c0_45, %c45] : memref<2x64xf32, #tpu.memory_space<smem>>
    %c0_46 = arith.constant 0 : index
    %c46 = arith.constant 46 : index
    %46 = memref.load %arg3[%c0_46, %c46] : memref<2x64xf32, #tpu.memory_space<smem>>
    %c0_47 = arith.constant 0 : index
    %c47 = arith.constant 47 : index
    %47 = memref.load %arg3[%c0_47, %c47] : memref<2x64xf32, #tpu.memory_space<smem>>
    %c0_48 = arith.constant 0 : index
    %c48 = arith.constant 48 : index
    %48 = memref.load %arg3[%c0_48, %c48] : memref<2x64xf32, #tpu.memory_space<smem>>
    %c0_49 = arith.constant 0 : index
    %c49 = arith.constant 49 : index
    %49 = memref.load %arg3[%c0_49, %c49] : memref<2x64xf32, #tpu.memory_space<smem>>
    %c0_50 = arith.constant 0 : index
    %c50 = arith.constant 50 : index
    %50 = memref.load %arg3[%c0_50, %c50] : memref<2x64xf32, #tpu.memory_space<smem>>
    %c0_51 = arith.constant 0 : index
    %c51 = arith.constant 51 : index
    %51 = memref.load %arg3[%c0_51, %c51] : memref<2x64xf32, #tpu.memory_space<smem>>
    %c0_52 = arith.constant 0 : index
    %c52 = arith.constant 52 : index
    %52 = memref.load %arg3[%c0_52, %c52] : memref<2x64xf32, #tpu.memory_space<smem>>
    %c0_53 = arith.constant 0 : index
    %c53 = arith.constant 53 : index
    %53 = memref.load %arg3[%c0_53, %c53] : memref<2x64xf32, #tpu.memory_space<smem>>
    %c0_54 = arith.constant 0 : index
    %c54 = arith.constant 54 : index
    %54 = memref.load %arg3[%c0_54, %c54] : memref<2x64xf32, #tpu.memory_space<smem>>
    %c0_55 = arith.constant 0 : index
    %c55 = arith.constant 55 : index
    %55 = memref.load %arg3[%c0_55, %c55] : memref<2x64xf32, #tpu.memory_space<smem>>
    %c0_56 = arith.constant 0 : index
    %c56 = arith.constant 56 : index
    %56 = memref.load %arg3[%c0_56, %c56] : memref<2x64xf32, #tpu.memory_space<smem>>
    %c0_57 = arith.constant 0 : index
    %c57 = arith.constant 57 : index
    %57 = memref.load %arg3[%c0_57, %c57] : memref<2x64xf32, #tpu.memory_space<smem>>
    %c0_58 = arith.constant 0 : index
    %c58 = arith.constant 58 : index
    %58 = memref.load %arg3[%c0_58, %c58] : memref<2x64xf32, #tpu.memory_space<smem>>
    %c0_59 = arith.constant 0 : index
    %c59 = arith.constant 59 : index
    %59 = memref.load %arg3[%c0_59, %c59] : memref<2x64xf32, #tpu.memory_space<smem>>
    %c0_60 = arith.constant 0 : index
    %c60 = arith.constant 60 : index
    %60 = memref.load %arg3[%c0_60, %c60] : memref<2x64xf32, #tpu.memory_space<smem>>
    %c0_61 = arith.constant 0 : index
    %c61 = arith.constant 61 : index
    %61 = memref.load %arg3[%c0_61, %c61] : memref<2x64xf32, #tpu.memory_space<smem>>
    %c0_62 = arith.constant 0 : index
    %c62 = arith.constant 62 : index
    %62 = memref.load %arg3[%c0_62, %c62] : memref<2x64xf32, #tpu.memory_space<smem>>
    %c0_63 = arith.constant 0 : index
    %c63 = arith.constant 63 : index
    %63 = memref.load %arg3[%c0_63, %c63] : memref<2x64xf32, #tpu.memory_space<smem>>
    %c1_64 = arith.constant 1 : index
    %c0_65 = arith.constant 0 : index
    %64 = memref.load %arg3[%c1_64, %c0_65] : memref<2x64xf32, #tpu.memory_space<smem>>
    %c1_66 = arith.constant 1 : index
    %c1_67 = arith.constant 1 : index
    %65 = memref.load %arg3[%c1_66, %c1_67] : memref<2x64xf32, #tpu.memory_space<smem>>
    %c1_68 = arith.constant 1 : index
    %c2_69 = arith.constant 2 : index
    %66 = memref.load %arg3[%c1_68, %c2_69] : memref<2x64xf32, #tpu.memory_space<smem>>
    %c1_70 = arith.constant 1 : index
    %c3_71 = arith.constant 3 : index
    %67 = memref.load %arg3[%c1_70, %c3_71] : memref<2x64xf32, #tpu.memory_space<smem>>
    %c1_72 = arith.constant 1 : index
    %c4_73 = arith.constant 4 : index
    %68 = memref.load %arg3[%c1_72, %c4_73] : memref<2x64xf32, #tpu.memory_space<smem>>
    %c1_74 = arith.constant 1 : index
    %c5_75 = arith.constant 5 : index
    %69 = memref.load %arg3[%c1_74, %c5_75] : memref<2x64xf32, #tpu.memory_space<smem>>
    %c1_76 = arith.constant 1 : index
    %c6_77 = arith.constant 6 : index
    %70 = memref.load %arg3[%c1_76, %c6_77] : memref<2x64xf32, #tpu.memory_space<smem>>
    %c1_78 = arith.constant 1 : index
    %c7_79 = arith.constant 7 : index
    %71 = memref.load %arg3[%c1_78, %c7_79] : memref<2x64xf32, #tpu.memory_space<smem>>
    %c1_80 = arith.constant 1 : index
    %c8_81 = arith.constant 8 : index
    %72 = memref.load %arg3[%c1_80, %c8_81] : memref<2x64xf32, #tpu.memory_space<smem>>
    %c1_82 = arith.constant 1 : index
    %c9_83 = arith.constant 9 : index
    %73 = memref.load %arg3[%c1_82, %c9_83] : memref<2x64xf32, #tpu.memory_space<smem>>
    %c1_84 = arith.constant 1 : index
    %c10_85 = arith.constant 10 : index
    %74 = memref.load %arg3[%c1_84, %c10_85] : memref<2x64xf32, #tpu.memory_space<smem>>
    %c1_86 = arith.constant 1 : index
    %c11_87 = arith.constant 11 : index
    %75 = memref.load %arg3[%c1_86, %c11_87] : memref<2x64xf32, #tpu.memory_space<smem>>
    %c1_88 = arith.constant 1 : index
    %c12_89 = arith.constant 12 : index
    %76 = memref.load %arg3[%c1_88, %c12_89] : memref<2x64xf32, #tpu.memory_space<smem>>
    %c1_90 = arith.constant 1 : index
    %c13_91 = arith.constant 13 : index
    %77 = memref.load %arg3[%c1_90, %c13_91] : memref<2x64xf32, #tpu.memory_space<smem>>
    %c1_92 = arith.constant 1 : index
    %c14_93 = arith.constant 14 : index
    %78 = memref.load %arg3[%c1_92, %c14_93] : memref<2x64xf32, #tpu.memory_space<smem>>
    %c1_94 = arith.constant 1 : index
    %c15_95 = arith.constant 15 : index
    %79 = memref.load %arg3[%c1_94, %c15_95] : memref<2x64xf32, #tpu.memory_space<smem>>
    %c1_96 = arith.constant 1 : index
    %c16_97 = arith.constant 16 : index
    %80 = memref.load %arg3[%c1_96, %c16_97] : memref<2x64xf32, #tpu.memory_space<smem>>
    %c1_98 = arith.constant 1 : index
    %c17_99 = arith.constant 17 : index
    %81 = memref.load %arg3[%c1_98, %c17_99] : memref<2x64xf32, #tpu.memory_space<smem>>
    %c1_100 = arith.constant 1 : index
    %c18_101 = arith.constant 18 : index
    %82 = memref.load %arg3[%c1_100, %c18_101] : memref<2x64xf32, #tpu.memory_space<smem>>
    %c1_102 = arith.constant 1 : index
    %c19_103 = arith.constant 19 : index
    %83 = memref.load %arg3[%c1_102, %c19_103] : memref<2x64xf32, #tpu.memory_space<smem>>
    %c1_104 = arith.constant 1 : index
    %c20_105 = arith.constant 20 : index
    %84 = memref.load %arg3[%c1_104, %c20_105] : memref<2x64xf32, #tpu.memory_space<smem>>
    %c1_106 = arith.constant 1 : index
    %c21_107 = arith.constant 21 : index
    %85 = memref.load %arg3[%c1_106, %c21_107] : memref<2x64xf32, #tpu.memory_space<smem>>
    %c1_108 = arith.constant 1 : index
    %c22_109 = arith.constant 22 : index
    %86 = memref.load %arg3[%c1_108, %c22_109] : memref<2x64xf32, #tpu.memory_space<smem>>
    %c1_110 = arith.constant 1 : index
    %c23_111 = arith.constant 23 : index
    %87 = memref.load %arg3[%c1_110, %c23_111] : memref<2x64xf32, #tpu.memory_space<smem>>
    %c1_112 = arith.constant 1 : index
    %c24_113 = arith.constant 24 : index
    %88 = memref.load %arg3[%c1_112, %c24_113] : memref<2x64xf32, #tpu.memory_space<smem>>
    %c1_114 = arith.constant 1 : index
    %c25_115 = arith.constant 25 : index
    %89 = memref.load %arg3[%c1_114, %c25_115] : memref<2x64xf32, #tpu.memory_space<smem>>
    %c1_116 = arith.constant 1 : index
    %c26_117 = arith.constant 26 : index
    %90 = memref.load %arg3[%c1_116, %c26_117] : memref<2x64xf32, #tpu.memory_space<smem>>
    %c1_118 = arith.constant 1 : index
    %c27_119 = arith.constant 27 : index
    %91 = memref.load %arg3[%c1_118, %c27_119] : memref<2x64xf32, #tpu.memory_space<smem>>
    %c1_120 = arith.constant 1 : index
    %c28_121 = arith.constant 28 : index
    %92 = memref.load %arg3[%c1_120, %c28_121] : memref<2x64xf32, #tpu.memory_space<smem>>
    %c1_122 = arith.constant 1 : index
    %c29_123 = arith.constant 29 : index
    %93 = memref.load %arg3[%c1_122, %c29_123] : memref<2x64xf32, #tpu.memory_space<smem>>
    %c1_124 = arith.constant 1 : index
    %c30_125 = arith.constant 30 : index
    %94 = memref.load %arg3[%c1_124, %c30_125] : memref<2x64xf32, #tpu.memory_space<smem>>
    %c1_126 = arith.constant 1 : index
    %c31_127 = arith.constant 31 : index
    %95 = memref.load %arg3[%c1_126, %c31_127] : memref<2x64xf32, #tpu.memory_space<smem>>
    %c1_128 = arith.constant 1 : index
    %c32_129 = arith.constant 32 : index
    %96 = memref.load %arg3[%c1_128, %c32_129] : memref<2x64xf32, #tpu.memory_space<smem>>
    %c1_130 = arith.constant 1 : index
    %c33_131 = arith.constant 33 : index
    %97 = memref.load %arg3[%c1_130, %c33_131] : memref<2x64xf32, #tpu.memory_space<smem>>
    %c1_132 = arith.constant 1 : index
    %c34_133 = arith.constant 34 : index
    %98 = memref.load %arg3[%c1_132, %c34_133] : memref<2x64xf32, #tpu.memory_space<smem>>
    %c1_134 = arith.constant 1 : index
    %c35_135 = arith.constant 35 : index
    %99 = memref.load %arg3[%c1_134, %c35_135] : memref<2x64xf32, #tpu.memory_space<smem>>
    %c1_136 = arith.constant 1 : index
    %c36_137 = arith.constant 36 : index
    %100 = memref.load %arg3[%c1_136, %c36_137] : memref<2x64xf32, #tpu.memory_space<smem>>
    %c1_138 = arith.constant 1 : index
    %c37_139 = arith.constant 37 : index
    %101 = memref.load %arg3[%c1_138, %c37_139] : memref<2x64xf32, #tpu.memory_space<smem>>
    %c1_140 = arith.constant 1 : index
    %c38_141 = arith.constant 38 : index
    %102 = memref.load %arg3[%c1_140, %c38_141] : memref<2x64xf32, #tpu.memory_space<smem>>
    %c1_142 = arith.constant 1 : index
    %c39_143 = arith.constant 39 : index
    %103 = memref.load %arg3[%c1_142, %c39_143] : memref<2x64xf32, #tpu.memory_space<smem>>
    %c1_144 = arith.constant 1 : index
    %c40_145 = arith.constant 40 : index
    %104 = memref.load %arg3[%c1_144, %c40_145] : memref<2x64xf32, #tpu.memory_space<smem>>
    %c1_146 = arith.constant 1 : index
    %c41_147 = arith.constant 41 : index
    %105 = memref.load %arg3[%c1_146, %c41_147] : memref<2x64xf32, #tpu.memory_space<smem>>
    %c1_148 = arith.constant 1 : index
    %c42_149 = arith.constant 42 : index
    %106 = memref.load %arg3[%c1_148, %c42_149] : memref<2x64xf32, #tpu.memory_space<smem>>
    %c1_150 = arith.constant 1 : index
    %c43_151 = arith.constant 43 : index
    %107 = memref.load %arg3[%c1_150, %c43_151] : memref<2x64xf32, #tpu.memory_space<smem>>
    %c1_152 = arith.constant 1 : index
    %c44_153 = arith.constant 44 : index
    %108 = memref.load %arg3[%c1_152, %c44_153] : memref<2x64xf32, #tpu.memory_space<smem>>
    %c1_154 = arith.constant 1 : index
    %c45_155 = arith.constant 45 : index
    %109 = memref.load %arg3[%c1_154, %c45_155] : memref<2x64xf32, #tpu.memory_space<smem>>
    %c1_156 = arith.constant 1 : index
    %c46_157 = arith.constant 46 : index
    %110 = memref.load %arg3[%c1_156, %c46_157] : memref<2x64xf32, #tpu.memory_space<smem>>
    %c1_158 = arith.constant 1 : index
    %c47_159 = arith.constant 47 : index
    %111 = memref.load %arg3[%c1_158, %c47_159] : memref<2x64xf32, #tpu.memory_space<smem>>
    %c1_160 = arith.constant 1 : index
    %c48_161 = arith.constant 48 : index
    %112 = memref.load %arg3[%c1_160, %c48_161] : memref<2x64xf32, #tpu.memory_space<smem>>
    %c1_162 = arith.constant 1 : index
    %c49_163 = arith.constant 49 : index
    %113 = memref.load %arg3[%c1_162, %c49_163] : memref<2x64xf32, #tpu.memory_space<smem>>
    %c1_164 = arith.constant 1 : index
    %c50_165 = arith.constant 50 : index
    %114 = memref.load %arg3[%c1_164, %c50_165] : memref<2x64xf32, #tpu.memory_space<smem>>
    %c1_166 = arith.constant 1 : index
    %c51_167 = arith.constant 51 : index
    %115 = memref.load %arg3[%c1_166, %c51_167] : memref<2x64xf32, #tpu.memory_space<smem>>
    %c1_168 = arith.constant 1 : index
    %c52_169 = arith.constant 52 : index
    %116 = memref.load %arg3[%c1_168, %c52_169] : memref<2x64xf32, #tpu.memory_space<smem>>
    %c1_170 = arith.constant 1 : index
    %c53_171 = arith.constant 53 : index
    %117 = memref.load %arg3[%c1_170, %c53_171] : memref<2x64xf32, #tpu.memory_space<smem>>
    %c1_172 = arith.constant 1 : index
    %c54_173 = arith.constant 54 : index
    %118 = memref.load %arg3[%c1_172, %c54_173] : memref<2x64xf32, #tpu.memory_space<smem>>
    %c1_174 = arith.constant 1 : index
    %c55_175 = arith.constant 55 : index
    %119 = memref.load %arg3[%c1_174, %c55_175] : memref<2x64xf32, #tpu.memory_space<smem>>
    %c1_176 = arith.constant 1 : index
    %c56_177 = arith.constant 56 : index
    %120 = memref.load %arg3[%c1_176, %c56_177] : memref<2x64xf32, #tpu.memory_space<smem>>
    %c1_178 = arith.constant 1 : index
    %c57_179 = arith.constant 57 : index
    %121 = memref.load %arg3[%c1_178, %c57_179] : memref<2x64xf32, #tpu.memory_space<smem>>
    %c1_180 = arith.constant 1 : index
    %c58_181 = arith.constant 58 : index
    %122 = memref.load %arg3[%c1_180, %c58_181] : memref<2x64xf32, #tpu.memory_space<smem>>
    %c1_182 = arith.constant 1 : index
    %c59_183 = arith.constant 59 : index
    %123 = memref.load %arg3[%c1_182, %c59_183] : memref<2x64xf32, #tpu.memory_space<smem>>
    %c1_184 = arith.constant 1 : index
    %c60_185 = arith.constant 60 : index
    %124 = memref.load %arg3[%c1_184, %c60_185] : memref<2x64xf32, #tpu.memory_space<smem>>
    %c1_186 = arith.constant 1 : index
    %c61_187 = arith.constant 61 : index
    %125 = memref.load %arg3[%c1_186, %c61_187] : memref<2x64xf32, #tpu.memory_space<smem>>
    %c1_188 = arith.constant 1 : index
    %c62_189 = arith.constant 62 : index
    %126 = memref.load %arg3[%c1_188, %c62_189] : memref<2x64xf32, #tpu.memory_space<smem>>
    %c1_190 = arith.constant 1 : index
    %c63_191 = arith.constant 63 : index
    %127 = memref.load %arg3[%c1_190, %c63_191] : memref<2x64xf32, #tpu.memory_space<smem>>
    %c0_192 = arith.constant 0 : index
    %128 = memref.load %arg4[%c0_192] : memref<64xf32, #tpu.memory_space<smem>>
    %c1_193 = arith.constant 1 : index
    %129 = memref.load %arg4[%c1_193] : memref<64xf32, #tpu.memory_space<smem>>
    %c2_194 = arith.constant 2 : index
    %130 = memref.load %arg4[%c2_194] : memref<64xf32, #tpu.memory_space<smem>>
    %c3_195 = arith.constant 3 : index
    %131 = memref.load %arg4[%c3_195] : memref<64xf32, #tpu.memory_space<smem>>
    %c4_196 = arith.constant 4 : index
    %132 = memref.load %arg4[%c4_196] : memref<64xf32, #tpu.memory_space<smem>>
    %c5_197 = arith.constant 5 : index
    %133 = memref.load %arg4[%c5_197] : memref<64xf32, #tpu.memory_space<smem>>
    %c6_198 = arith.constant 6 : index
    %134 = memref.load %arg4[%c6_198] : memref<64xf32, #tpu.memory_space<smem>>
    %c7_199 = arith.constant 7 : index
    %135 = memref.load %arg4[%c7_199] : memref<64xf32, #tpu.memory_space<smem>>
    %c8_200 = arith.constant 8 : index
    %136 = memref.load %arg4[%c8_200] : memref<64xf32, #tpu.memory_space<smem>>
    %c9_201 = arith.constant 9 : index
    %137 = memref.load %arg4[%c9_201] : memref<64xf32, #tpu.memory_space<smem>>
    %c10_202 = arith.constant 10 : index
    %138 = memref.load %arg4[%c10_202] : memref<64xf32, #tpu.memory_space<smem>>
    %c11_203 = arith.constant 11 : index
    %139 = memref.load %arg4[%c11_203] : memref<64xf32, #tpu.memory_space<smem>>
    %c12_204 = arith.constant 12 : index
    %140 = memref.load %arg4[%c12_204] : memref<64xf32, #tpu.memory_space<smem>>
    %c13_205 = arith.constant 13 : index
    %141 = memref.load %arg4[%c13_205] : memref<64xf32, #tpu.memory_space<smem>>
    %c14_206 = arith.constant 14 : index
    %142 = memref.load %arg4[%c14_206] : memref<64xf32, #tpu.memory_space<smem>>
    %c15_207 = arith.constant 15 : index
    %143 = memref.load %arg4[%c15_207] : memref<64xf32, #tpu.memory_space<smem>>
    %c16_208 = arith.constant 16 : index
    %144 = memref.load %arg4[%c16_208] : memref<64xf32, #tpu.memory_space<smem>>
    %c17_209 = arith.constant 17 : index
    %145 = memref.load %arg4[%c17_209] : memref<64xf32, #tpu.memory_space<smem>>
    %c18_210 = arith.constant 18 : index
    %146 = memref.load %arg4[%c18_210] : memref<64xf32, #tpu.memory_space<smem>>
    %c19_211 = arith.constant 19 : index
    %147 = memref.load %arg4[%c19_211] : memref<64xf32, #tpu.memory_space<smem>>
    %c20_212 = arith.constant 20 : index
    %148 = memref.load %arg4[%c20_212] : memref<64xf32, #tpu.memory_space<smem>>
    %c21_213 = arith.constant 21 : index
    %149 = memref.load %arg4[%c21_213] : memref<64xf32, #tpu.memory_space<smem>>
    %c22_214 = arith.constant 22 : index
    %150 = memref.load %arg4[%c22_214] : memref<64xf32, #tpu.memory_space<smem>>
    %c23_215 = arith.constant 23 : index
    %151 = memref.load %arg4[%c23_215] : memref<64xf32, #tpu.memory_space<smem>>
    %c24_216 = arith.constant 24 : index
    %152 = memref.load %arg4[%c24_216] : memref<64xf32, #tpu.memory_space<smem>>
    %c25_217 = arith.constant 25 : index
    %153 = memref.load %arg4[%c25_217] : memref<64xf32, #tpu.memory_space<smem>>
    %c26_218 = arith.constant 26 : index
    %154 = memref.load %arg4[%c26_218] : memref<64xf32, #tpu.memory_space<smem>>
    %c27_219 = arith.constant 27 : index
    %155 = memref.load %arg4[%c27_219] : memref<64xf32, #tpu.memory_space<smem>>
    %c28_220 = arith.constant 28 : index
    %156 = memref.load %arg4[%c28_220] : memref<64xf32, #tpu.memory_space<smem>>
    %c29_221 = arith.constant 29 : index
    %157 = memref.load %arg4[%c29_221] : memref<64xf32, #tpu.memory_space<smem>>
    %c30_222 = arith.constant 30 : index
    %158 = memref.load %arg4[%c30_222] : memref<64xf32, #tpu.memory_space<smem>>
    %c31_223 = arith.constant 31 : index
    %159 = memref.load %arg4[%c31_223] : memref<64xf32, #tpu.memory_space<smem>>
    %c32_224 = arith.constant 32 : index
    %160 = memref.load %arg4[%c32_224] : memref<64xf32, #tpu.memory_space<smem>>
    %c33_225 = arith.constant 33 : index
    %161 = memref.load %arg4[%c33_225] : memref<64xf32, #tpu.memory_space<smem>>
    %c34_226 = arith.constant 34 : index
    %162 = memref.load %arg4[%c34_226] : memref<64xf32, #tpu.memory_space<smem>>
    %c35_227 = arith.constant 35 : index
    %163 = memref.load %arg4[%c35_227] : memref<64xf32, #tpu.memory_space<smem>>
    %c36_228 = arith.constant 36 : index
    %164 = memref.load %arg4[%c36_228] : memref<64xf32, #tpu.memory_space<smem>>
    %c37_229 = arith.constant 37 : index
    %165 = memref.load %arg4[%c37_229] : memref<64xf32, #tpu.memory_space<smem>>
    %c38_230 = arith.constant 38 : index
    %166 = memref.load %arg4[%c38_230] : memref<64xf32, #tpu.memory_space<smem>>
    %c39_231 = arith.constant 39 : index
    %167 = memref.load %arg4[%c39_231] : memref<64xf32, #tpu.memory_space<smem>>
    %c40_232 = arith.constant 40 : index
    %168 = memref.load %arg4[%c40_232] : memref<64xf32, #tpu.memory_space<smem>>
    %c41_233 = arith.constant 41 : index
    %169 = memref.load %arg4[%c41_233] : memref<64xf32, #tpu.memory_space<smem>>
    %c42_234 = arith.constant 42 : index
    %170 = memref.load %arg4[%c42_234] : memref<64xf32, #tpu.memory_space<smem>>
    %c43_235 = arith.constant 43 : index
    %171 = memref.load %arg4[%c43_235] : memref<64xf32, #tpu.memory_space<smem>>
    %c44_236 = arith.constant 44 : index
    %172 = memref.load %arg4[%c44_236] : memref<64xf32, #tpu.memory_space<smem>>
    %c45_237 = arith.constant 45 : index
    %173 = memref.load %arg4[%c45_237] : memref<64xf32, #tpu.memory_space<smem>>
    %c46_238 = arith.constant 46 : index
    %174 = memref.load %arg4[%c46_238] : memref<64xf32, #tpu.memory_space<smem>>
    %c47_239 = arith.constant 47 : index
    %175 = memref.load %arg4[%c47_239] : memref<64xf32, #tpu.memory_space<smem>>
    %c48_240 = arith.constant 48 : index
    %176 = memref.load %arg4[%c48_240] : memref<64xf32, #tpu.memory_space<smem>>
    %c49_241 = arith.constant 49 : index
    %177 = memref.load %arg4[%c49_241] : memref<64xf32, #tpu.memory_space<smem>>
    %c50_242 = arith.constant 50 : index
    %178 = memref.load %arg4[%c50_242] : memref<64xf32, #tpu.memory_space<smem>>
    %c51_243 = arith.constant 51 : index
    %179 = memref.load %arg4[%c51_243] : memref<64xf32, #tpu.memory_space<smem>>
    %c52_244 = arith.constant 52 : index
    %180 = memref.load %arg4[%c52_244] : memref<64xf32, #tpu.memory_space<smem>>
    %c53_245 = arith.constant 53 : index
    %181 = memref.load %arg4[%c53_245] : memref<64xf32, #tpu.memory_space<smem>>
    %c54_246 = arith.constant 54 : index
    %182 = memref.load %arg4[%c54_246] : memref<64xf32, #tpu.memory_space<smem>>
    %c55_247 = arith.constant 55 : index
    %183 = memref.load %arg4[%c55_247] : memref<64xf32, #tpu.memory_space<smem>>
    %c56_248 = arith.constant 56 : index
    %184 = memref.load %arg4[%c56_248] : memref<64xf32, #tpu.memory_space<smem>>
    %c57_249 = arith.constant 57 : index
    %185 = memref.load %arg4[%c57_249] : memref<64xf32, #tpu.memory_space<smem>>
    %c58_250 = arith.constant 58 : index
    %186 = memref.load %arg4[%c58_250] : memref<64xf32, #tpu.memory_space<smem>>
    %c59_251 = arith.constant 59 : index
    %187 = memref.load %arg4[%c59_251] : memref<64xf32, #tpu.memory_space<smem>>
    %c60_252 = arith.constant 60 : index
    %188 = memref.load %arg4[%c60_252] : memref<64xf32, #tpu.memory_space<smem>>
    %c61_253 = arith.constant 61 : index
    %189 = memref.load %arg4[%c61_253] : memref<64xf32, #tpu.memory_space<smem>>
    %c62_254 = arith.constant 62 : index
    %190 = memref.load %arg4[%c62_254] : memref<64xf32, #tpu.memory_space<smem>>
    %c63_255 = arith.constant 63 : index
    %191 = memref.load %arg4[%c63_255] : memref<64xf32, #tpu.memory_space<smem>>
    %c0_256 = arith.constant 0 : index
    %192 = memref.load %arg5[%c0_256] : memref<64xf32, #tpu.memory_space<smem>>
    %c1_257 = arith.constant 1 : index
    %193 = memref.load %arg5[%c1_257] : memref<64xf32, #tpu.memory_space<smem>>
    %c2_258 = arith.constant 2 : index
    %194 = memref.load %arg5[%c2_258] : memref<64xf32, #tpu.memory_space<smem>>
    %c3_259 = arith.constant 3 : index
    %195 = memref.load %arg5[%c3_259] : memref<64xf32, #tpu.memory_space<smem>>
    %c4_260 = arith.constant 4 : index
    %196 = memref.load %arg5[%c4_260] : memref<64xf32, #tpu.memory_space<smem>>
    %c5_261 = arith.constant 5 : index
    %197 = memref.load %arg5[%c5_261] : memref<64xf32, #tpu.memory_space<smem>>
    %c6_262 = arith.constant 6 : index
    %198 = memref.load %arg5[%c6_262] : memref<64xf32, #tpu.memory_space<smem>>
    %c7_263 = arith.constant 7 : index
    %199 = memref.load %arg5[%c7_263] : memref<64xf32, #tpu.memory_space<smem>>
    %c8_264 = arith.constant 8 : index
    %200 = memref.load %arg5[%c8_264] : memref<64xf32, #tpu.memory_space<smem>>
    %c9_265 = arith.constant 9 : index
    %201 = memref.load %arg5[%c9_265] : memref<64xf32, #tpu.memory_space<smem>>
    %c10_266 = arith.constant 10 : index
    %202 = memref.load %arg5[%c10_266] : memref<64xf32, #tpu.memory_space<smem>>
    %c11_267 = arith.constant 11 : index
    %203 = memref.load %arg5[%c11_267] : memref<64xf32, #tpu.memory_space<smem>>
    %c12_268 = arith.constant 12 : index
    %204 = memref.load %arg5[%c12_268] : memref<64xf32, #tpu.memory_space<smem>>
    %c13_269 = arith.constant 13 : index
    %205 = memref.load %arg5[%c13_269] : memref<64xf32, #tpu.memory_space<smem>>
    %c14_270 = arith.constant 14 : index
    %206 = memref.load %arg5[%c14_270] : memref<64xf32, #tpu.memory_space<smem>>
    %c15_271 = arith.constant 15 : index
    %207 = memref.load %arg5[%c15_271] : memref<64xf32, #tpu.memory_space<smem>>
    %c16_272 = arith.constant 16 : index
    %208 = memref.load %arg5[%c16_272] : memref<64xf32, #tpu.memory_space<smem>>
    %c17_273 = arith.constant 17 : index
    %209 = memref.load %arg5[%c17_273] : memref<64xf32, #tpu.memory_space<smem>>
    %c18_274 = arith.constant 18 : index
    %210 = memref.load %arg5[%c18_274] : memref<64xf32, #tpu.memory_space<smem>>
    %c19_275 = arith.constant 19 : index
    %211 = memref.load %arg5[%c19_275] : memref<64xf32, #tpu.memory_space<smem>>
    %c20_276 = arith.constant 20 : index
    %212 = memref.load %arg5[%c20_276] : memref<64xf32, #tpu.memory_space<smem>>
    %c21_277 = arith.constant 21 : index
    %213 = memref.load %arg5[%c21_277] : memref<64xf32, #tpu.memory_space<smem>>
    %c22_278 = arith.constant 22 : index
    %214 = memref.load %arg5[%c22_278] : memref<64xf32, #tpu.memory_space<smem>>
    %c23_279 = arith.constant 23 : index
    %215 = memref.load %arg5[%c23_279] : memref<64xf32, #tpu.memory_space<smem>>
    %c24_280 = arith.constant 24 : index
    %216 = memref.load %arg5[%c24_280] : memref<64xf32, #tpu.memory_space<smem>>
    %c25_281 = arith.constant 25 : index
    %217 = memref.load %arg5[%c25_281] : memref<64xf32, #tpu.memory_space<smem>>
    %c26_282 = arith.constant 26 : index
    %218 = memref.load %arg5[%c26_282] : memref<64xf32, #tpu.memory_space<smem>>
    %c27_283 = arith.constant 27 : index
    %219 = memref.load %arg5[%c27_283] : memref<64xf32, #tpu.memory_space<smem>>
    %c28_284 = arith.constant 28 : index
    %220 = memref.load %arg5[%c28_284] : memref<64xf32, #tpu.memory_space<smem>>
    %c29_285 = arith.constant 29 : index
    %221 = memref.load %arg5[%c29_285] : memref<64xf32, #tpu.memory_space<smem>>
    %c30_286 = arith.constant 30 : index
    %222 = memref.load %arg5[%c30_286] : memref<64xf32, #tpu.memory_space<smem>>
    %c31_287 = arith.constant 31 : index
    %223 = memref.load %arg5[%c31_287] : memref<64xf32, #tpu.memory_space<smem>>
    %c32_288 = arith.constant 32 : index
    %224 = memref.load %arg5[%c32_288] : memref<64xf32, #tpu.memory_space<smem>>
    %c33_289 = arith.constant 33 : index
    %225 = memref.load %arg5[%c33_289] : memref<64xf32, #tpu.memory_space<smem>>
    %c34_290 = arith.constant 34 : index
    %226 = memref.load %arg5[%c34_290] : memref<64xf32, #tpu.memory_space<smem>>
    %c35_291 = arith.constant 35 : index
    %227 = memref.load %arg5[%c35_291] : memref<64xf32, #tpu.memory_space<smem>>
    %c36_292 = arith.constant 36 : index
    %228 = memref.load %arg5[%c36_292] : memref<64xf32, #tpu.memory_space<smem>>
    %c37_293 = arith.constant 37 : index
    %229 = memref.load %arg5[%c37_293] : memref<64xf32, #tpu.memory_space<smem>>
    %c38_294 = arith.constant 38 : index
    %230 = memref.load %arg5[%c38_294] : memref<64xf32, #tpu.memory_space<smem>>
    %c39_295 = arith.constant 39 : index
    %231 = memref.load %arg5[%c39_295] : memref<64xf32, #tpu.memory_space<smem>>
    %c40_296 = arith.constant 40 : index
    %232 = memref.load %arg5[%c40_296] : memref<64xf32, #tpu.memory_space<smem>>
    %c41_297 = arith.constant 41 : index
    %233 = memref.load %arg5[%c41_297] : memref<64xf32, #tpu.memory_space<smem>>
    %c42_298 = arith.constant 42 : index
    %234 = memref.load %arg5[%c42_298] : memref<64xf32, #tpu.memory_space<smem>>
    %c43_299 = arith.constant 43 : index
    %235 = memref.load %arg5[%c43_299] : memref<64xf32, #tpu.memory_space<smem>>
    %c44_300 = arith.constant 44 : index
    %236 = memref.load %arg5[%c44_300] : memref<64xf32, #tpu.memory_space<smem>>
    %c45_301 = arith.constant 45 : index
    %237 = memref.load %arg5[%c45_301] : memref<64xf32, #tpu.memory_space<smem>>
    %c46_302 = arith.constant 46 : index
    %238 = memref.load %arg5[%c46_302] : memref<64xf32, #tpu.memory_space<smem>>
    %c47_303 = arith.constant 47 : index
    %239 = memref.load %arg5[%c47_303] : memref<64xf32, #tpu.memory_space<smem>>
    %c48_304 = arith.constant 48 : index
    %240 = memref.load %arg5[%c48_304] : memref<64xf32, #tpu.memory_space<smem>>
    %c49_305 = arith.constant 49 : index
    %241 = memref.load %arg5[%c49_305] : memref<64xf32, #tpu.memory_space<smem>>
    %c50_306 = arith.constant 50 : index
    %242 = memref.load %arg5[%c50_306] : memref<64xf32, #tpu.memory_space<smem>>
    %c51_307 = arith.constant 51 : index
    %243 = memref.load %arg5[%c51_307] : memref<64xf32, #tpu.memory_space<smem>>
    %c52_308 = arith.constant 52 : index
    %244 = memref.load %arg5[%c52_308] : memref<64xf32, #tpu.memory_space<smem>>
    %c53_309 = arith.constant 53 : index
    %245 = memref.load %arg5[%c53_309] : memref<64xf32, #tpu.memory_space<smem>>
    %c54_310 = arith.constant 54 : index
    %246 = memref.load %arg5[%c54_310] : memref<64xf32, #tpu.memory_space<smem>>
    %c55_311 = arith.constant 55 : index
    %247 = memref.load %arg5[%c55_311] : memref<64xf32, #tpu.memory_space<smem>>
    %c56_312 = arith.constant 56 : index
    %248 = memref.load %arg5[%c56_312] : memref<64xf32, #tpu.memory_space<smem>>
    %c57_313 = arith.constant 57 : index
    %249 = memref.load %arg5[%c57_313] : memref<64xf32, #tpu.memory_space<smem>>
    %c58_314 = arith.constant 58 : index
    %250 = memref.load %arg5[%c58_314] : memref<64xf32, #tpu.memory_space<smem>>
    %c59_315 = arith.constant 59 : index
    %251 = memref.load %arg5[%c59_315] : memref<64xf32, #tpu.memory_space<smem>>
    %c60_316 = arith.constant 60 : index
    %252 = memref.load %arg5[%c60_316] : memref<64xf32, #tpu.memory_space<smem>>
    %c61_317 = arith.constant 61 : index
    %253 = memref.load %arg5[%c61_317] : memref<64xf32, #tpu.memory_space<smem>>
    %c62_318 = arith.constant 62 : index
    %254 = memref.load %arg5[%c62_318] : memref<64xf32, #tpu.memory_space<smem>>
    %c63_319 = arith.constant 63 : index
    %255 = memref.load %arg5[%c63_319] : memref<64xf32, #tpu.memory_space<smem>>
    %c0_320 = arith.constant 0 : index
    %256 = memref.load %arg6[%c0_320] : memref<1xf32, #tpu.memory_space<smem>>
    %c0_i32 = arith.constant 0 : i32
    %c8_i32 = arith.constant 8 : i32
    %257 = arith.muli %c0_i32, %c8_i32 : i32
    %258 = tpu.assume_multiple %257, 8 : i32
    %259 = arith.index_cast %258 : i32 to index
    %c0_321 = arith.constant 0 : index
    %260 = vector.load %arg1[%259, %c0_321] : memref<8x128xf32, #tpu.memory_space<vmem>>, vector<8x128xf32>
    %261 = arith.index_cast %258 : i32 to index
    %c0_322 = arith.constant 0 : index
    %262 = vector.load %arg2[%261, %c0_322] : memref<8x128xf32, #tpu.memory_space<vmem>>, vector<8x128xf32>
    %263 = vector.broadcast %0 : f32 to vector<8x128xf32>
    %264 = arith.mulf %260, %263 : vector<8x128xf32>
    %265 = vector.broadcast %64 : f32 to vector<8x128xf32>
    %266 = arith.mulf %262, %265 : vector<8x128xf32>
    %267 = arith.addf %264, %266 : vector<8x128xf32>
    %268 = vector.broadcast %128 : f32 to vector<8x128xf32>
    %269 = arith.maximumf %267, %268 : vector<8x128xf32>
    %270 = vector.broadcast %192 : f32 to vector<8x128xf32>
    %271 = arith.mulf %269, %270 : vector<8x128xf32>
    %272 = vector.broadcast %256 : f32 to vector<8x128xf32>
    %273 = arith.addf %271, %272 : vector<8x128xf32>
    %274 = vector.broadcast %1 : f32 to vector<8x128xf32>
    %275 = arith.mulf %260, %274 : vector<8x128xf32>
    %276 = vector.broadcast %65 : f32 to vector<8x128xf32>
    %277 = arith.mulf %262, %276 : vector<8x128xf32>
    %278 = arith.addf %275, %277 : vector<8x128xf32>
    %279 = vector.broadcast %129 : f32 to vector<8x128xf32>
    %280 = arith.maximumf %278, %279 : vector<8x128xf32>
    %281 = vector.broadcast %193 : f32 to vector<8x128xf32>
    %282 = arith.mulf %280, %281 : vector<8x128xf32>
    %283 = arith.addf %273, %282 : vector<8x128xf32>
    %284 = vector.broadcast %2 : f32 to vector<8x128xf32>
    %285 = arith.mulf %260, %284 : vector<8x128xf32>
    %286 = vector.broadcast %66 : f32 to vector<8x128xf32>
    %287 = arith.mulf %262, %286 : vector<8x128xf32>
    %288 = arith.addf %285, %287 : vector<8x128xf32>
    %289 = vector.broadcast %130 : f32 to vector<8x128xf32>
    %290 = arith.maximumf %288, %289 : vector<8x128xf32>
    %291 = vector.broadcast %194 : f32 to vector<8x128xf32>
    %292 = arith.mulf %290, %291 : vector<8x128xf32>
    %293 = arith.addf %283, %292 : vector<8x128xf32>
    %294 = vector.broadcast %3 : f32 to vector<8x128xf32>
    %295 = arith.mulf %260, %294 : vector<8x128xf32>
    %296 = vector.broadcast %67 : f32 to vector<8x128xf32>
    %297 = arith.mulf %262, %296 : vector<8x128xf32>
    %298 = arith.addf %295, %297 : vector<8x128xf32>
    %299 = vector.broadcast %131 : f32 to vector<8x128xf32>
    %300 = arith.maximumf %298, %299 : vector<8x128xf32>
    %301 = vector.broadcast %195 : f32 to vector<8x128xf32>
    %302 = arith.mulf %300, %301 : vector<8x128xf32>
    %303 = arith.addf %293, %302 : vector<8x128xf32>
    %304 = vector.broadcast %4 : f32 to vector<8x128xf32>
    %305 = arith.mulf %260, %304 : vector<8x128xf32>
    %306 = vector.broadcast %68 : f32 to vector<8x128xf32>
    %307 = arith.mulf %262, %306 : vector<8x128xf32>
    %308 = arith.addf %305, %307 : vector<8x128xf32>
    %309 = vector.broadcast %132 : f32 to vector<8x128xf32>
    %310 = arith.maximumf %308, %309 : vector<8x128xf32>
    %311 = vector.broadcast %196 : f32 to vector<8x128xf32>
    %312 = arith.mulf %310, %311 : vector<8x128xf32>
    %313 = arith.addf %303, %312 : vector<8x128xf32>
    %314 = vector.broadcast %5 : f32 to vector<8x128xf32>
    %315 = arith.mulf %260, %314 : vector<8x128xf32>
    %316 = vector.broadcast %69 : f32 to vector<8x128xf32>
    %317 = arith.mulf %262, %316 : vector<8x128xf32>
    %318 = arith.addf %315, %317 : vector<8x128xf32>
    %319 = vector.broadcast %133 : f32 to vector<8x128xf32>
    %320 = arith.maximumf %318, %319 : vector<8x128xf32>
    %321 = vector.broadcast %197 : f32 to vector<8x128xf32>
    %322 = arith.mulf %320, %321 : vector<8x128xf32>
    %323 = arith.addf %313, %322 : vector<8x128xf32>
    %324 = vector.broadcast %6 : f32 to vector<8x128xf32>
    %325 = arith.mulf %260, %324 : vector<8x128xf32>
    %326 = vector.broadcast %70 : f32 to vector<8x128xf32>
    %327 = arith.mulf %262, %326 : vector<8x128xf32>
    %328 = arith.addf %325, %327 : vector<8x128xf32>
    %329 = vector.broadcast %134 : f32 to vector<8x128xf32>
    %330 = arith.maximumf %328, %329 : vector<8x128xf32>
    %331 = vector.broadcast %198 : f32 to vector<8x128xf32>
    %332 = arith.mulf %330, %331 : vector<8x128xf32>
    %333 = arith.addf %323, %332 : vector<8x128xf32>
    %334 = vector.broadcast %7 : f32 to vector<8x128xf32>
    %335 = arith.mulf %260, %334 : vector<8x128xf32>
    %336 = vector.broadcast %71 : f32 to vector<8x128xf32>
    %337 = arith.mulf %262, %336 : vector<8x128xf32>
    %338 = arith.addf %335, %337 : vector<8x128xf32>
    %339 = vector.broadcast %135 : f32 to vector<8x128xf32>
    %340 = arith.maximumf %338, %339 : vector<8x128xf32>
    %341 = vector.broadcast %199 : f32 to vector<8x128xf32>
    %342 = arith.mulf %340, %341 : vector<8x128xf32>
    %343 = arith.addf %333, %342 : vector<8x128xf32>
    %344 = vector.broadcast %8 : f32 to vector<8x128xf32>
    %345 = arith.mulf %260, %344 : vector<8x128xf32>
    %346 = vector.broadcast %72 : f32 to vector<8x128xf32>
    %347 = arith.mulf %262, %346 : vector<8x128xf32>
    %348 = arith.addf %345, %347 : vector<8x128xf32>
    %349 = vector.broadcast %136 : f32 to vector<8x128xf32>
    %350 = arith.maximumf %348, %349 : vector<8x128xf32>
    %351 = vector.broadcast %200 : f32 to vector<8x128xf32>
    %352 = arith.mulf %350, %351 : vector<8x128xf32>
    %353 = arith.addf %343, %352 : vector<8x128xf32>
    %354 = vector.broadcast %9 : f32 to vector<8x128xf32>
    %355 = arith.mulf %260, %354 : vector<8x128xf32>
    %356 = vector.broadcast %73 : f32 to vector<8x128xf32>
    %357 = arith.mulf %262, %356 : vector<8x128xf32>
    %358 = arith.addf %355, %357 : vector<8x128xf32>
    %359 = vector.broadcast %137 : f32 to vector<8x128xf32>
    %360 = arith.maximumf %358, %359 : vector<8x128xf32>
    %361 = vector.broadcast %201 : f32 to vector<8x128xf32>
    %362 = arith.mulf %360, %361 : vector<8x128xf32>
    %363 = arith.addf %353, %362 : vector<8x128xf32>
    %364 = vector.broadcast %10 : f32 to vector<8x128xf32>
    %365 = arith.mulf %260, %364 : vector<8x128xf32>
    %366 = vector.broadcast %74 : f32 to vector<8x128xf32>
    %367 = arith.mulf %262, %366 : vector<8x128xf32>
    %368 = arith.addf %365, %367 : vector<8x128xf32>
    %369 = vector.broadcast %138 : f32 to vector<8x128xf32>
    %370 = arith.maximumf %368, %369 : vector<8x128xf32>
    %371 = vector.broadcast %202 : f32 to vector<8x128xf32>
    %372 = arith.mulf %370, %371 : vector<8x128xf32>
    %373 = arith.addf %363, %372 : vector<8x128xf32>
    %374 = vector.broadcast %11 : f32 to vector<8x128xf32>
    %375 = arith.mulf %260, %374 : vector<8x128xf32>
    %376 = vector.broadcast %75 : f32 to vector<8x128xf32>
    %377 = arith.mulf %262, %376 : vector<8x128xf32>
    %378 = arith.addf %375, %377 : vector<8x128xf32>
    %379 = vector.broadcast %139 : f32 to vector<8x128xf32>
    %380 = arith.maximumf %378, %379 : vector<8x128xf32>
    %381 = vector.broadcast %203 : f32 to vector<8x128xf32>
    %382 = arith.mulf %380, %381 : vector<8x128xf32>
    %383 = arith.addf %373, %382 : vector<8x128xf32>
    %384 = vector.broadcast %12 : f32 to vector<8x128xf32>
    %385 = arith.mulf %260, %384 : vector<8x128xf32>
    %386 = vector.broadcast %76 : f32 to vector<8x128xf32>
    %387 = arith.mulf %262, %386 : vector<8x128xf32>
    %388 = arith.addf %385, %387 : vector<8x128xf32>
    %389 = vector.broadcast %140 : f32 to vector<8x128xf32>
    %390 = arith.maximumf %388, %389 : vector<8x128xf32>
    %391 = vector.broadcast %204 : f32 to vector<8x128xf32>
    %392 = arith.mulf %390, %391 : vector<8x128xf32>
    %393 = arith.addf %383, %392 : vector<8x128xf32>
    %394 = vector.broadcast %13 : f32 to vector<8x128xf32>
    %395 = arith.mulf %260, %394 : vector<8x128xf32>
    %396 = vector.broadcast %77 : f32 to vector<8x128xf32>
    %397 = arith.mulf %262, %396 : vector<8x128xf32>
    %398 = arith.addf %395, %397 : vector<8x128xf32>
    %399 = vector.broadcast %141 : f32 to vector<8x128xf32>
    %400 = arith.maximumf %398, %399 : vector<8x128xf32>
    %401 = vector.broadcast %205 : f32 to vector<8x128xf32>
    %402 = arith.mulf %400, %401 : vector<8x128xf32>
    %403 = arith.addf %393, %402 : vector<8x128xf32>
    %404 = vector.broadcast %14 : f32 to vector<8x128xf32>
    %405 = arith.mulf %260, %404 : vector<8x128xf32>
    %406 = vector.broadcast %78 : f32 to vector<8x128xf32>
    %407 = arith.mulf %262, %406 : vector<8x128xf32>
    %408 = arith.addf %405, %407 : vector<8x128xf32>
    %409 = vector.broadcast %142 : f32 to vector<8x128xf32>
    %410 = arith.maximumf %408, %409 : vector<8x128xf32>
    %411 = vector.broadcast %206 : f32 to vector<8x128xf32>
    %412 = arith.mulf %410, %411 : vector<8x128xf32>
    %413 = arith.addf %403, %412 : vector<8x128xf32>
    %414 = vector.broadcast %15 : f32 to vector<8x128xf32>
    %415 = arith.mulf %260, %414 : vector<8x128xf32>
    %416 = vector.broadcast %79 : f32 to vector<8x128xf32>
    %417 = arith.mulf %262, %416 : vector<8x128xf32>
    %418 = arith.addf %415, %417 : vector<8x128xf32>
    %419 = vector.broadcast %143 : f32 to vector<8x128xf32>
    %420 = arith.maximumf %418, %419 : vector<8x128xf32>
    %421 = vector.broadcast %207 : f32 to vector<8x128xf32>
    %422 = arith.mulf %420, %421 : vector<8x128xf32>
    %423 = arith.addf %413, %422 : vector<8x128xf32>
    %424 = vector.broadcast %16 : f32 to vector<8x128xf32>
    %425 = arith.mulf %260, %424 : vector<8x128xf32>
    %426 = vector.broadcast %80 : f32 to vector<8x128xf32>
    %427 = arith.mulf %262, %426 : vector<8x128xf32>
    %428 = arith.addf %425, %427 : vector<8x128xf32>
    %429 = vector.broadcast %144 : f32 to vector<8x128xf32>
    %430 = arith.maximumf %428, %429 : vector<8x128xf32>
    %431 = vector.broadcast %208 : f32 to vector<8x128xf32>
    %432 = arith.mulf %430, %431 : vector<8x128xf32>
    %433 = arith.addf %423, %432 : vector<8x128xf32>
    %434 = vector.broadcast %17 : f32 to vector<8x128xf32>
    %435 = arith.mulf %260, %434 : vector<8x128xf32>
    %436 = vector.broadcast %81 : f32 to vector<8x128xf32>
    %437 = arith.mulf %262, %436 : vector<8x128xf32>
    %438 = arith.addf %435, %437 : vector<8x128xf32>
    %439 = vector.broadcast %145 : f32 to vector<8x128xf32>
    %440 = arith.maximumf %438, %439 : vector<8x128xf32>
    %441 = vector.broadcast %209 : f32 to vector<8x128xf32>
    %442 = arith.mulf %440, %441 : vector<8x128xf32>
    %443 = arith.addf %433, %442 : vector<8x128xf32>
    %444 = vector.broadcast %18 : f32 to vector<8x128xf32>
    %445 = arith.mulf %260, %444 : vector<8x128xf32>
    %446 = vector.broadcast %82 : f32 to vector<8x128xf32>
    %447 = arith.mulf %262, %446 : vector<8x128xf32>
    %448 = arith.addf %445, %447 : vector<8x128xf32>
    %449 = vector.broadcast %146 : f32 to vector<8x128xf32>
    %450 = arith.maximumf %448, %449 : vector<8x128xf32>
    %451 = vector.broadcast %210 : f32 to vector<8x128xf32>
    %452 = arith.mulf %450, %451 : vector<8x128xf32>
    %453 = arith.addf %443, %452 : vector<8x128xf32>
    %454 = vector.broadcast %19 : f32 to vector<8x128xf32>
    %455 = arith.mulf %260, %454 : vector<8x128xf32>
    %456 = vector.broadcast %83 : f32 to vector<8x128xf32>
    %457 = arith.mulf %262, %456 : vector<8x128xf32>
    %458 = arith.addf %455, %457 : vector<8x128xf32>
    %459 = vector.broadcast %147 : f32 to vector<8x128xf32>
    %460 = arith.maximumf %458, %459 : vector<8x128xf32>
    %461 = vector.broadcast %211 : f32 to vector<8x128xf32>
    %462 = arith.mulf %460, %461 : vector<8x128xf32>
    %463 = arith.addf %453, %462 : vector<8x128xf32>
    %464 = vector.broadcast %20 : f32 to vector<8x128xf32>
    %465 = arith.mulf %260, %464 : vector<8x128xf32>
    %466 = vector.broadcast %84 : f32 to vector<8x128xf32>
    %467 = arith.mulf %262, %466 : vector<8x128xf32>
    %468 = arith.addf %465, %467 : vector<8x128xf32>
    %469 = vector.broadcast %148 : f32 to vector<8x128xf32>
    %470 = arith.maximumf %468, %469 : vector<8x128xf32>
    %471 = vector.broadcast %212 : f32 to vector<8x128xf32>
    %472 = arith.mulf %470, %471 : vector<8x128xf32>
    %473 = arith.addf %463, %472 : vector<8x128xf32>
    %474 = vector.broadcast %21 : f32 to vector<8x128xf32>
    %475 = arith.mulf %260, %474 : vector<8x128xf32>
    %476 = vector.broadcast %85 : f32 to vector<8x128xf32>
    %477 = arith.mulf %262, %476 : vector<8x128xf32>
    %478 = arith.addf %475, %477 : vector<8x128xf32>
    %479 = vector.broadcast %149 : f32 to vector<8x128xf32>
    %480 = arith.maximumf %478, %479 : vector<8x128xf32>
    %481 = vector.broadcast %213 : f32 to vector<8x128xf32>
    %482 = arith.mulf %480, %481 : vector<8x128xf32>
    %483 = arith.addf %473, %482 : vector<8x128xf32>
    %484 = vector.broadcast %22 : f32 to vector<8x128xf32>
    %485 = arith.mulf %260, %484 : vector<8x128xf32>
    %486 = vector.broadcast %86 : f32 to vector<8x128xf32>
    %487 = arith.mulf %262, %486 : vector<8x128xf32>
    %488 = arith.addf %485, %487 : vector<8x128xf32>
    %489 = vector.broadcast %150 : f32 to vector<8x128xf32>
    %490 = arith.maximumf %488, %489 : vector<8x128xf32>
    %491 = vector.broadcast %214 : f32 to vector<8x128xf32>
    %492 = arith.mulf %490, %491 : vector<8x128xf32>
    %493 = arith.addf %483, %492 : vector<8x128xf32>
    %494 = vector.broadcast %23 : f32 to vector<8x128xf32>
    %495 = arith.mulf %260, %494 : vector<8x128xf32>
    %496 = vector.broadcast %87 : f32 to vector<8x128xf32>
    %497 = arith.mulf %262, %496 : vector<8x128xf32>
    %498 = arith.addf %495, %497 : vector<8x128xf32>
    %499 = vector.broadcast %151 : f32 to vector<8x128xf32>
    %500 = arith.maximumf %498, %499 : vector<8x128xf32>
    %501 = vector.broadcast %215 : f32 to vector<8x128xf32>
    %502 = arith.mulf %500, %501 : vector<8x128xf32>
    %503 = arith.addf %493, %502 : vector<8x128xf32>
    %504 = vector.broadcast %24 : f32 to vector<8x128xf32>
    %505 = arith.mulf %260, %504 : vector<8x128xf32>
    %506 = vector.broadcast %88 : f32 to vector<8x128xf32>
    %507 = arith.mulf %262, %506 : vector<8x128xf32>
    %508 = arith.addf %505, %507 : vector<8x128xf32>
    %509 = vector.broadcast %152 : f32 to vector<8x128xf32>
    %510 = arith.maximumf %508, %509 : vector<8x128xf32>
    %511 = vector.broadcast %216 : f32 to vector<8x128xf32>
    %512 = arith.mulf %510, %511 : vector<8x128xf32>
    %513 = arith.addf %503, %512 : vector<8x128xf32>
    %514 = vector.broadcast %25 : f32 to vector<8x128xf32>
    %515 = arith.mulf %260, %514 : vector<8x128xf32>
    %516 = vector.broadcast %89 : f32 to vector<8x128xf32>
    %517 = arith.mulf %262, %516 : vector<8x128xf32>
    %518 = arith.addf %515, %517 : vector<8x128xf32>
    %519 = vector.broadcast %153 : f32 to vector<8x128xf32>
    %520 = arith.maximumf %518, %519 : vector<8x128xf32>
    %521 = vector.broadcast %217 : f32 to vector<8x128xf32>
    %522 = arith.mulf %520, %521 : vector<8x128xf32>
    %523 = arith.addf %513, %522 : vector<8x128xf32>
    %524 = vector.broadcast %26 : f32 to vector<8x128xf32>
    %525 = arith.mulf %260, %524 : vector<8x128xf32>
    %526 = vector.broadcast %90 : f32 to vector<8x128xf32>
    %527 = arith.mulf %262, %526 : vector<8x128xf32>
    %528 = arith.addf %525, %527 : vector<8x128xf32>
    %529 = vector.broadcast %154 : f32 to vector<8x128xf32>
    %530 = arith.maximumf %528, %529 : vector<8x128xf32>
    %531 = vector.broadcast %218 : f32 to vector<8x128xf32>
    %532 = arith.mulf %530, %531 : vector<8x128xf32>
    %533 = arith.addf %523, %532 : vector<8x128xf32>
    %534 = vector.broadcast %27 : f32 to vector<8x128xf32>
    %535 = arith.mulf %260, %534 : vector<8x128xf32>
    %536 = vector.broadcast %91 : f32 to vector<8x128xf32>
    %537 = arith.mulf %262, %536 : vector<8x128xf32>
    %538 = arith.addf %535, %537 : vector<8x128xf32>
    %539 = vector.broadcast %155 : f32 to vector<8x128xf32>
    %540 = arith.maximumf %538, %539 : vector<8x128xf32>
    %541 = vector.broadcast %219 : f32 to vector<8x128xf32>
    %542 = arith.mulf %540, %541 : vector<8x128xf32>
    %543 = arith.addf %533, %542 : vector<8x128xf32>
    %544 = vector.broadcast %28 : f32 to vector<8x128xf32>
    %545 = arith.mulf %260, %544 : vector<8x128xf32>
    %546 = vector.broadcast %92 : f32 to vector<8x128xf32>
    %547 = arith.mulf %262, %546 : vector<8x128xf32>
    %548 = arith.addf %545, %547 : vector<8x128xf32>
    %549 = vector.broadcast %156 : f32 to vector<8x128xf32>
    %550 = arith.maximumf %548, %549 : vector<8x128xf32>
    %551 = vector.broadcast %220 : f32 to vector<8x128xf32>
    %552 = arith.mulf %550, %551 : vector<8x128xf32>
    %553 = arith.addf %543, %552 : vector<8x128xf32>
    %554 = vector.broadcast %29 : f32 to vector<8x128xf32>
    %555 = arith.mulf %260, %554 : vector<8x128xf32>
    %556 = vector.broadcast %93 : f32 to vector<8x128xf32>
    %557 = arith.mulf %262, %556 : vector<8x128xf32>
    %558 = arith.addf %555, %557 : vector<8x128xf32>
    %559 = vector.broadcast %157 : f32 to vector<8x128xf32>
    %560 = arith.maximumf %558, %559 : vector<8x128xf32>
    %561 = vector.broadcast %221 : f32 to vector<8x128xf32>
    %562 = arith.mulf %560, %561 : vector<8x128xf32>
    %563 = arith.addf %553, %562 : vector<8x128xf32>
    %564 = vector.broadcast %30 : f32 to vector<8x128xf32>
    %565 = arith.mulf %260, %564 : vector<8x128xf32>
    %566 = vector.broadcast %94 : f32 to vector<8x128xf32>
    %567 = arith.mulf %262, %566 : vector<8x128xf32>
    %568 = arith.addf %565, %567 : vector<8x128xf32>
    %569 = vector.broadcast %158 : f32 to vector<8x128xf32>
    %570 = arith.maximumf %568, %569 : vector<8x128xf32>
    %571 = vector.broadcast %222 : f32 to vector<8x128xf32>
    %572 = arith.mulf %570, %571 : vector<8x128xf32>
    %573 = arith.addf %563, %572 : vector<8x128xf32>
    %574 = vector.broadcast %31 : f32 to vector<8x128xf32>
    %575 = arith.mulf %260, %574 : vector<8x128xf32>
    %576 = vector.broadcast %95 : f32 to vector<8x128xf32>
    %577 = arith.mulf %262, %576 : vector<8x128xf32>
    %578 = arith.addf %575, %577 : vector<8x128xf32>
    %579 = vector.broadcast %159 : f32 to vector<8x128xf32>
    %580 = arith.maximumf %578, %579 : vector<8x128xf32>
    %581 = vector.broadcast %223 : f32 to vector<8x128xf32>
    %582 = arith.mulf %580, %581 : vector<8x128xf32>
    %583 = arith.addf %573, %582 : vector<8x128xf32>
    %584 = vector.broadcast %32 : f32 to vector<8x128xf32>
    %585 = arith.mulf %260, %584 : vector<8x128xf32>
    %586 = vector.broadcast %96 : f32 to vector<8x128xf32>
    %587 = arith.mulf %262, %586 : vector<8x128xf32>
    %588 = arith.addf %585, %587 : vector<8x128xf32>
    %589 = vector.broadcast %160 : f32 to vector<8x128xf32>
    %590 = arith.maximumf %588, %589 : vector<8x128xf32>
    %591 = vector.broadcast %224 : f32 to vector<8x128xf32>
    %592 = arith.mulf %590, %591 : vector<8x128xf32>
    %593 = arith.addf %583, %592 : vector<8x128xf32>
    %594 = vector.broadcast %33 : f32 to vector<8x128xf32>
    %595 = arith.mulf %260, %594 : vector<8x128xf32>
    %596 = vector.broadcast %97 : f32 to vector<8x128xf32>
    %597 = arith.mulf %262, %596 : vector<8x128xf32>
    %598 = arith.addf %595, %597 : vector<8x128xf32>
    %599 = vector.broadcast %161 : f32 to vector<8x128xf32>
    %600 = arith.maximumf %598, %599 : vector<8x128xf32>
    %601 = vector.broadcast %225 : f32 to vector<8x128xf32>
    %602 = arith.mulf %600, %601 : vector<8x128xf32>
    %603 = arith.addf %593, %602 : vector<8x128xf32>
    %604 = vector.broadcast %34 : f32 to vector<8x128xf32>
    %605 = arith.mulf %260, %604 : vector<8x128xf32>
    %606 = vector.broadcast %98 : f32 to vector<8x128xf32>
    %607 = arith.mulf %262, %606 : vector<8x128xf32>
    %608 = arith.addf %605, %607 : vector<8x128xf32>
    %609 = vector.broadcast %162 : f32 to vector<8x128xf32>
    %610 = arith.maximumf %608, %609 : vector<8x128xf32>
    %611 = vector.broadcast %226 : f32 to vector<8x128xf32>
    %612 = arith.mulf %610, %611 : vector<8x128xf32>
    %613 = arith.addf %603, %612 : vector<8x128xf32>
    %614 = vector.broadcast %35 : f32 to vector<8x128xf32>
    %615 = arith.mulf %260, %614 : vector<8x128xf32>
    %616 = vector.broadcast %99 : f32 to vector<8x128xf32>
    %617 = arith.mulf %262, %616 : vector<8x128xf32>
    %618 = arith.addf %615, %617 : vector<8x128xf32>
    %619 = vector.broadcast %163 : f32 to vector<8x128xf32>
    %620 = arith.maximumf %618, %619 : vector<8x128xf32>
    %621 = vector.broadcast %227 : f32 to vector<8x128xf32>
    %622 = arith.mulf %620, %621 : vector<8x128xf32>
    %623 = arith.addf %613, %622 : vector<8x128xf32>
    %624 = vector.broadcast %36 : f32 to vector<8x128xf32>
    %625 = arith.mulf %260, %624 : vector<8x128xf32>
    %626 = vector.broadcast %100 : f32 to vector<8x128xf32>
    %627 = arith.mulf %262, %626 : vector<8x128xf32>
    %628 = arith.addf %625, %627 : vector<8x128xf32>
    %629 = vector.broadcast %164 : f32 to vector<8x128xf32>
    %630 = arith.maximumf %628, %629 : vector<8x128xf32>
    %631 = vector.broadcast %228 : f32 to vector<8x128xf32>
    %632 = arith.mulf %630, %631 : vector<8x128xf32>
    %633 = arith.addf %623, %632 : vector<8x128xf32>
    %634 = vector.broadcast %37 : f32 to vector<8x128xf32>
    %635 = arith.mulf %260, %634 : vector<8x128xf32>
    %636 = vector.broadcast %101 : f32 to vector<8x128xf32>
    %637 = arith.mulf %262, %636 : vector<8x128xf32>
    %638 = arith.addf %635, %637 : vector<8x128xf32>
    %639 = vector.broadcast %165 : f32 to vector<8x128xf32>
    %640 = arith.maximumf %638, %639 : vector<8x128xf32>
    %641 = vector.broadcast %229 : f32 to vector<8x128xf32>
    %642 = arith.mulf %640, %641 : vector<8x128xf32>
    %643 = arith.addf %633, %642 : vector<8x128xf32>
    %644 = vector.broadcast %38 : f32 to vector<8x128xf32>
    %645 = arith.mulf %260, %644 : vector<8x128xf32>
    %646 = vector.broadcast %102 : f32 to vector<8x128xf32>
    %647 = arith.mulf %262, %646 : vector<8x128xf32>
    %648 = arith.addf %645, %647 : vector<8x128xf32>
    %649 = vector.broadcast %166 : f32 to vector<8x128xf32>
    %650 = arith.maximumf %648, %649 : vector<8x128xf32>
    %651 = vector.broadcast %230 : f32 to vector<8x128xf32>
    %652 = arith.mulf %650, %651 : vector<8x128xf32>
    %653 = arith.addf %643, %652 : vector<8x128xf32>
    %654 = vector.broadcast %39 : f32 to vector<8x128xf32>
    %655 = arith.mulf %260, %654 : vector<8x128xf32>
    %656 = vector.broadcast %103 : f32 to vector<8x128xf32>
    %657 = arith.mulf %262, %656 : vector<8x128xf32>
    %658 = arith.addf %655, %657 : vector<8x128xf32>
    %659 = vector.broadcast %167 : f32 to vector<8x128xf32>
    %660 = arith.maximumf %658, %659 : vector<8x128xf32>
    %661 = vector.broadcast %231 : f32 to vector<8x128xf32>
    %662 = arith.mulf %660, %661 : vector<8x128xf32>
    %663 = arith.addf %653, %662 : vector<8x128xf32>
    %664 = vector.broadcast %40 : f32 to vector<8x128xf32>
    %665 = arith.mulf %260, %664 : vector<8x128xf32>
    %666 = vector.broadcast %104 : f32 to vector<8x128xf32>
    %667 = arith.mulf %262, %666 : vector<8x128xf32>
    %668 = arith.addf %665, %667 : vector<8x128xf32>
    %669 = vector.broadcast %168 : f32 to vector<8x128xf32>
    %670 = arith.maximumf %668, %669 : vector<8x128xf32>
    %671 = vector.broadcast %232 : f32 to vector<8x128xf32>
    %672 = arith.mulf %670, %671 : vector<8x128xf32>
    %673 = arith.addf %663, %672 : vector<8x128xf32>
    %674 = vector.broadcast %41 : f32 to vector<8x128xf32>
    %675 = arith.mulf %260, %674 : vector<8x128xf32>
    %676 = vector.broadcast %105 : f32 to vector<8x128xf32>
    %677 = arith.mulf %262, %676 : vector<8x128xf32>
    %678 = arith.addf %675, %677 : vector<8x128xf32>
    %679 = vector.broadcast %169 : f32 to vector<8x128xf32>
    %680 = arith.maximumf %678, %679 : vector<8x128xf32>
    %681 = vector.broadcast %233 : f32 to vector<8x128xf32>
    %682 = arith.mulf %680, %681 : vector<8x128xf32>
    %683 = arith.addf %673, %682 : vector<8x128xf32>
    %684 = vector.broadcast %42 : f32 to vector<8x128xf32>
    %685 = arith.mulf %260, %684 : vector<8x128xf32>
    %686 = vector.broadcast %106 : f32 to vector<8x128xf32>
    %687 = arith.mulf %262, %686 : vector<8x128xf32>
    %688 = arith.addf %685, %687 : vector<8x128xf32>
    %689 = vector.broadcast %170 : f32 to vector<8x128xf32>
    %690 = arith.maximumf %688, %689 : vector<8x128xf32>
    %691 = vector.broadcast %234 : f32 to vector<8x128xf32>
    %692 = arith.mulf %690, %691 : vector<8x128xf32>
    %693 = arith.addf %683, %692 : vector<8x128xf32>
    %694 = vector.broadcast %43 : f32 to vector<8x128xf32>
    %695 = arith.mulf %260, %694 : vector<8x128xf32>
    %696 = vector.broadcast %107 : f32 to vector<8x128xf32>
    %697 = arith.mulf %262, %696 : vector<8x128xf32>
    %698 = arith.addf %695, %697 : vector<8x128xf32>
    %699 = vector.broadcast %171 : f32 to vector<8x128xf32>
    %700 = arith.maximumf %698, %699 : vector<8x128xf32>
    %701 = vector.broadcast %235 : f32 to vector<8x128xf32>
    %702 = arith.mulf %700, %701 : vector<8x128xf32>
    %703 = arith.addf %693, %702 : vector<8x128xf32>
    %704 = vector.broadcast %44 : f32 to vector<8x128xf32>
    %705 = arith.mulf %260, %704 : vector<8x128xf32>
    %706 = vector.broadcast %108 : f32 to vector<8x128xf32>
    %707 = arith.mulf %262, %706 : vector<8x128xf32>
    %708 = arith.addf %705, %707 : vector<8x128xf32>
    %709 = vector.broadcast %172 : f32 to vector<8x128xf32>
    %710 = arith.maximumf %708, %709 : vector<8x128xf32>
    %711 = vector.broadcast %236 : f32 to vector<8x128xf32>
    %712 = arith.mulf %710, %711 : vector<8x128xf32>
    %713 = arith.addf %703, %712 : vector<8x128xf32>
    %714 = vector.broadcast %45 : f32 to vector<8x128xf32>
    %715 = arith.mulf %260, %714 : vector<8x128xf32>
    %716 = vector.broadcast %109 : f32 to vector<8x128xf32>
    %717 = arith.mulf %262, %716 : vector<8x128xf32>
    %718 = arith.addf %715, %717 : vector<8x128xf32>
    %719 = vector.broadcast %173 : f32 to vector<8x128xf32>
    %720 = arith.maximumf %718, %719 : vector<8x128xf32>
    %721 = vector.broadcast %237 : f32 to vector<8x128xf32>
    %722 = arith.mulf %720, %721 : vector<8x128xf32>
    %723 = arith.addf %713, %722 : vector<8x128xf32>
    %724 = vector.broadcast %46 : f32 to vector<8x128xf32>
    %725 = arith.mulf %260, %724 : vector<8x128xf32>
    %726 = vector.broadcast %110 : f32 to vector<8x128xf32>
    %727 = arith.mulf %262, %726 : vector<8x128xf32>
    %728 = arith.addf %725, %727 : vector<8x128xf32>
    %729 = vector.broadcast %174 : f32 to vector<8x128xf32>
    %730 = arith.maximumf %728, %729 : vector<8x128xf32>
    %731 = vector.broadcast %238 : f32 to vector<8x128xf32>
    %732 = arith.mulf %730, %731 : vector<8x128xf32>
    %733 = arith.addf %723, %732 : vector<8x128xf32>
    %734 = vector.broadcast %47 : f32 to vector<8x128xf32>
    %735 = arith.mulf %260, %734 : vector<8x128xf32>
    %736 = vector.broadcast %111 : f32 to vector<8x128xf32>
    %737 = arith.mulf %262, %736 : vector<8x128xf32>
    %738 = arith.addf %735, %737 : vector<8x128xf32>
    %739 = vector.broadcast %175 : f32 to vector<8x128xf32>
    %740 = arith.maximumf %738, %739 : vector<8x128xf32>
    %741 = vector.broadcast %239 : f32 to vector<8x128xf32>
    %742 = arith.mulf %740, %741 : vector<8x128xf32>
    %743 = arith.addf %733, %742 : vector<8x128xf32>
    %744 = vector.broadcast %48 : f32 to vector<8x128xf32>
    %745 = arith.mulf %260, %744 : vector<8x128xf32>
    %746 = vector.broadcast %112 : f32 to vector<8x128xf32>
    %747 = arith.mulf %262, %746 : vector<8x128xf32>
    %748 = arith.addf %745, %747 : vector<8x128xf32>
    %749 = vector.broadcast %176 : f32 to vector<8x128xf32>
    %750 = arith.maximumf %748, %749 : vector<8x128xf32>
    %751 = vector.broadcast %240 : f32 to vector<8x128xf32>
    %752 = arith.mulf %750, %751 : vector<8x128xf32>
    %753 = arith.addf %743, %752 : vector<8x128xf32>
    %754 = vector.broadcast %49 : f32 to vector<8x128xf32>
    %755 = arith.mulf %260, %754 : vector<8x128xf32>
    %756 = vector.broadcast %113 : f32 to vector<8x128xf32>
    %757 = arith.mulf %262, %756 : vector<8x128xf32>
    %758 = arith.addf %755, %757 : vector<8x128xf32>
    %759 = vector.broadcast %177 : f32 to vector<8x128xf32>
    %760 = arith.maximumf %758, %759 : vector<8x128xf32>
    %761 = vector.broadcast %241 : f32 to vector<8x128xf32>
    %762 = arith.mulf %760, %761 : vector<8x128xf32>
    %763 = arith.addf %753, %762 : vector<8x128xf32>
    %764 = vector.broadcast %50 : f32 to vector<8x128xf32>
    %765 = arith.mulf %260, %764 : vector<8x128xf32>
    %766 = vector.broadcast %114 : f32 to vector<8x128xf32>
    %767 = arith.mulf %262, %766 : vector<8x128xf32>
    %768 = arith.addf %765, %767 : vector<8x128xf32>
    %769 = vector.broadcast %178 : f32 to vector<8x128xf32>
    %770 = arith.maximumf %768, %769 : vector<8x128xf32>
    %771 = vector.broadcast %242 : f32 to vector<8x128xf32>
    %772 = arith.mulf %770, %771 : vector<8x128xf32>
    %773 = arith.addf %763, %772 : vector<8x128xf32>
    %774 = vector.broadcast %51 : f32 to vector<8x128xf32>
    %775 = arith.mulf %260, %774 : vector<8x128xf32>
    %776 = vector.broadcast %115 : f32 to vector<8x128xf32>
    %777 = arith.mulf %262, %776 : vector<8x128xf32>
    %778 = arith.addf %775, %777 : vector<8x128xf32>
    %779 = vector.broadcast %179 : f32 to vector<8x128xf32>
    %780 = arith.maximumf %778, %779 : vector<8x128xf32>
    %781 = vector.broadcast %243 : f32 to vector<8x128xf32>
    %782 = arith.mulf %780, %781 : vector<8x128xf32>
    %783 = arith.addf %773, %782 : vector<8x128xf32>
    %784 = vector.broadcast %52 : f32 to vector<8x128xf32>
    %785 = arith.mulf %260, %784 : vector<8x128xf32>
    %786 = vector.broadcast %116 : f32 to vector<8x128xf32>
    %787 = arith.mulf %262, %786 : vector<8x128xf32>
    %788 = arith.addf %785, %787 : vector<8x128xf32>
    %789 = vector.broadcast %180 : f32 to vector<8x128xf32>
    %790 = arith.maximumf %788, %789 : vector<8x128xf32>
    %791 = vector.broadcast %244 : f32 to vector<8x128xf32>
    %792 = arith.mulf %790, %791 : vector<8x128xf32>
    %793 = arith.addf %783, %792 : vector<8x128xf32>
    %794 = vector.broadcast %53 : f32 to vector<8x128xf32>
    %795 = arith.mulf %260, %794 : vector<8x128xf32>
    %796 = vector.broadcast %117 : f32 to vector<8x128xf32>
    %797 = arith.mulf %262, %796 : vector<8x128xf32>
    %798 = arith.addf %795, %797 : vector<8x128xf32>
    %799 = vector.broadcast %181 : f32 to vector<8x128xf32>
    %800 = arith.maximumf %798, %799 : vector<8x128xf32>
    %801 = vector.broadcast %245 : f32 to vector<8x128xf32>
    %802 = arith.mulf %800, %801 : vector<8x128xf32>
    %803 = arith.addf %793, %802 : vector<8x128xf32>
    %804 = vector.broadcast %54 : f32 to vector<8x128xf32>
    %805 = arith.mulf %260, %804 : vector<8x128xf32>
    %806 = vector.broadcast %118 : f32 to vector<8x128xf32>
    %807 = arith.mulf %262, %806 : vector<8x128xf32>
    %808 = arith.addf %805, %807 : vector<8x128xf32>
    %809 = vector.broadcast %182 : f32 to vector<8x128xf32>
    %810 = arith.maximumf %808, %809 : vector<8x128xf32>
    %811 = vector.broadcast %246 : f32 to vector<8x128xf32>
    %812 = arith.mulf %810, %811 : vector<8x128xf32>
    %813 = arith.addf %803, %812 : vector<8x128xf32>
    %814 = vector.broadcast %55 : f32 to vector<8x128xf32>
    %815 = arith.mulf %260, %814 : vector<8x128xf32>
    %816 = vector.broadcast %119 : f32 to vector<8x128xf32>
    %817 = arith.mulf %262, %816 : vector<8x128xf32>
    %818 = arith.addf %815, %817 : vector<8x128xf32>
    %819 = vector.broadcast %183 : f32 to vector<8x128xf32>
    %820 = arith.maximumf %818, %819 : vector<8x128xf32>
    %821 = vector.broadcast %247 : f32 to vector<8x128xf32>
    %822 = arith.mulf %820, %821 : vector<8x128xf32>
    %823 = arith.addf %813, %822 : vector<8x128xf32>
    %824 = vector.broadcast %56 : f32 to vector<8x128xf32>
    %825 = arith.mulf %260, %824 : vector<8x128xf32>
    %826 = vector.broadcast %120 : f32 to vector<8x128xf32>
    %827 = arith.mulf %262, %826 : vector<8x128xf32>
    %828 = arith.addf %825, %827 : vector<8x128xf32>
    %829 = vector.broadcast %184 : f32 to vector<8x128xf32>
    %830 = arith.maximumf %828, %829 : vector<8x128xf32>
    %831 = vector.broadcast %248 : f32 to vector<8x128xf32>
    %832 = arith.mulf %830, %831 : vector<8x128xf32>
    %833 = arith.addf %823, %832 : vector<8x128xf32>
    %834 = vector.broadcast %57 : f32 to vector<8x128xf32>
    %835 = arith.mulf %260, %834 : vector<8x128xf32>
    %836 = vector.broadcast %121 : f32 to vector<8x128xf32>
    %837 = arith.mulf %262, %836 : vector<8x128xf32>
    %838 = arith.addf %835, %837 : vector<8x128xf32>
    %839 = vector.broadcast %185 : f32 to vector<8x128xf32>
    %840 = arith.maximumf %838, %839 : vector<8x128xf32>
    %841 = vector.broadcast %249 : f32 to vector<8x128xf32>
    %842 = arith.mulf %840, %841 : vector<8x128xf32>
    %843 = arith.addf %833, %842 : vector<8x128xf32>
    %844 = vector.broadcast %58 : f32 to vector<8x128xf32>
    %845 = arith.mulf %260, %844 : vector<8x128xf32>
    %846 = vector.broadcast %122 : f32 to vector<8x128xf32>
    %847 = arith.mulf %262, %846 : vector<8x128xf32>
    %848 = arith.addf %845, %847 : vector<8x128xf32>
    %849 = vector.broadcast %186 : f32 to vector<8x128xf32>
    %850 = arith.maximumf %848, %849 : vector<8x128xf32>
    %851 = vector.broadcast %250 : f32 to vector<8x128xf32>
    %852 = arith.mulf %850, %851 : vector<8x128xf32>
    %853 = arith.addf %843, %852 : vector<8x128xf32>
    %854 = vector.broadcast %59 : f32 to vector<8x128xf32>
    %855 = arith.mulf %260, %854 : vector<8x128xf32>
    %856 = vector.broadcast %123 : f32 to vector<8x128xf32>
    %857 = arith.mulf %262, %856 : vector<8x128xf32>
    %858 = arith.addf %855, %857 : vector<8x128xf32>
    %859 = vector.broadcast %187 : f32 to vector<8x128xf32>
    %860 = arith.maximumf %858, %859 : vector<8x128xf32>
    %861 = vector.broadcast %251 : f32 to vector<8x128xf32>
    %862 = arith.mulf %860, %861 : vector<8x128xf32>
    %863 = arith.addf %853, %862 : vector<8x128xf32>
    %864 = vector.broadcast %60 : f32 to vector<8x128xf32>
    %865 = arith.mulf %260, %864 : vector<8x128xf32>
    %866 = vector.broadcast %124 : f32 to vector<8x128xf32>
    %867 = arith.mulf %262, %866 : vector<8x128xf32>
    %868 = arith.addf %865, %867 : vector<8x128xf32>
    %869 = vector.broadcast %188 : f32 to vector<8x128xf32>
    %870 = arith.maximumf %868, %869 : vector<8x128xf32>
    %871 = vector.broadcast %252 : f32 to vector<8x128xf32>
    %872 = arith.mulf %870, %871 : vector<8x128xf32>
    %873 = arith.addf %863, %872 : vector<8x128xf32>
    %874 = vector.broadcast %61 : f32 to vector<8x128xf32>
    %875 = arith.mulf %260, %874 : vector<8x128xf32>
    %876 = vector.broadcast %125 : f32 to vector<8x128xf32>
    %877 = arith.mulf %262, %876 : vector<8x128xf32>
    %878 = arith.addf %875, %877 : vector<8x128xf32>
    %879 = vector.broadcast %189 : f32 to vector<8x128xf32>
    %880 = arith.maximumf %878, %879 : vector<8x128xf32>
    %881 = vector.broadcast %253 : f32 to vector<8x128xf32>
    %882 = arith.mulf %880, %881 : vector<8x128xf32>
    %883 = arith.addf %873, %882 : vector<8x128xf32>
    %884 = vector.broadcast %62 : f32 to vector<8x128xf32>
    %885 = arith.mulf %260, %884 : vector<8x128xf32>
    %886 = vector.broadcast %126 : f32 to vector<8x128xf32>
    %887 = arith.mulf %262, %886 : vector<8x128xf32>
    %888 = arith.addf %885, %887 : vector<8x128xf32>
    %889 = vector.broadcast %190 : f32 to vector<8x128xf32>
    %890 = arith.maximumf %888, %889 : vector<8x128xf32>
    %891 = vector.broadcast %254 : f32 to vector<8x128xf32>
    %892 = arith.mulf %890, %891 : vector<8x128xf32>
    %893 = arith.addf %883, %892 : vector<8x128xf32>
    %894 = vector.broadcast %63 : f32 to vector<8x128xf32>
    %895 = arith.mulf %260, %894 : vector<8x128xf32>
    %896 = vector.broadcast %127 : f32 to vector<8x128xf32>
    %897 = arith.mulf %262, %896 : vector<8x128xf32>
    %898 = arith.addf %895, %897 : vector<8x128xf32>
    %899 = vector.broadcast %191 : f32 to vector<8x128xf32>
    %900 = arith.maximumf %898, %899 : vector<8x128xf32>
    %901 = vector.broadcast %255 : f32 to vector<8x128xf32>
    %902 = arith.mulf %900, %901 : vector<8x128xf32>
    %903 = arith.addf %893, %902 : vector<8x128xf32>
    %904 = arith.index_cast %258 : i32 to index
    %c0_323 = arith.constant 0 : index
    %905 = vector.load %arg7[%904, %c0_323] : memref<8x128xf32, #tpu.memory_space<vmem>>, vector<8x128xf32>
    tpu.vector_store %arg7[%904, %c0_323], %903 {strides = array<i32>} : memref<8x128xf32, #tpu.memory_space<vmem>>, vector<8x128xf32>,
    %c1_i32 = arith.constant 1 : i32
    return
  }
  func.func @transform_0(%arg0: i32) -> (i32, i32) {
    %c0_i32 = arith.constant 0 : i32
    %c0_i32_0 = arith.constant 0 : i32
    return %arg0, %c0_i32 : i32, i32
  }
  func.func @transform_1(%arg0: i32) -> (i32, i32) {
    %c0_i32 = arith.constant 0 : i32
    %c0_i32_0 = arith.constant 0 : i32
    return %arg0, %c0_i32 : i32, i32
  }
  func.func @transform_2(%arg0: i32) -> (i32, i32) {
    %c0_i32 = arith.constant 0 : i32
    %c0_i32_0 = arith.constant 0 : i32
    %c0_i32_1 = arith.constant 0 : i32
    return %c0_i32, %c0_i32_0 : i32, i32
  }
  func.func @transform_3(%arg0: i32) -> i32 {
    %c0_i32 = arith.constant 0 : i32
    %c0_i32_0 = arith.constant 0 : i32
    return %c0_i32 : i32
  }
  func.func @transform_4(%arg0: i32) -> i32 {
    %c0_i32 = arith.constant 0 : i32
    %c0_i32_0 = arith.constant 0 : i32
    return %c0_i32 : i32
  }
  func.func @transform_5(%arg0: i32) -> i32 {
    %c0_i32 = arith.constant 0 : i32
    %c0_i32_0 = arith.constant 0 : i32
    return %c0_i32 : i32
  }
  func.func @transform_6(%arg0: i32) -> (i32, i32) {
    %c0_i32 = arith.constant 0 : i32
    %c0_i32_0 = arith.constant 0 : i32
    return %arg0, %c0_i32 : i32, i32
  }
}

</mosaic_0001>

<bundles_post_ra>
// kernel: tpu_custom_call.1
= control target key start
LH: loop header
LB: loop body
LE: loop exit
PB: predicated region body
PF: predicated region fallthrough
CT: control target
= control target key end

     0   :  { %s3199_s0 = inlined_call_operand.hbm [shape: f32[16,128], index: 0, kind: input, shape index: {}]   ;;  %s3200_s1 = inlined_call_operand.hbm [shape: f32[16,128], index: 1, kind: input, shape index: {}]   ;;  %s3201_s2 = inlined_call_operand.vmem [shape: f32[2,64], index: 2, kind: input, shape index: {}]   ;;  %s3202_s3 = inlined_call_operand.vmem [shape: f32[64], index: 3, kind: input, shape index: {}]   ;;  %s3203_s4 = inlined_call_operand.vmem [shape: f32[64], index: 4, kind: input, shape index: {}]   ;;  %s3204_s5 = inlined_call_operand.<no memory space> [shape: f32[1], index: 5, kind: input, shape index: {}]   ;;  %s3205_s6 = inlined_call_operand.hbm [shape: f32[16,128], index: 6, kind: output, shape index: {}]  }
   0x1   :  { %3218 = sst [smem:[#allocation108_spill]] %s3199_s0 }
   0x2   :  { %3219 = sst [smem:[#allocation109_spill]] %s3200_s1 }
   0x3   :  { %3220 = sst [smem:[#allocation110_spill]] %s3201_s2 }
   0x4   :  { %3221 = sst [smem:[#allocation111_spill]] %s3202_s3 }
   0x5   :  { %3222 = sst [smem:[#allocation112_spill]] %s3203_s4 }
   0x6   :  { %3223 = sst [smem:[#allocation113_spill]] %s3205_s6 }
   0x7   :  { %11 = sst [smem:[#allocation2]] %s3204_s5 }
   0x8   :  { %12 = vsyncpa [#allocation4], 0 }
   0x9   :  { %14 = vsyncpa [#allocation4 + $0x1], 0 }
   0xa   :  { %15 = vsyncpa [#allocation8], 0 }
   0xb   :  { %17 = vsyncpa [#allocation8 + $0x1], 0 }
   0xc   :  { %18 = vsyncpa [#allocation6], 0 }
   0xd   :  { %19 = vsyncpa [#allocation11], 0 }
   0xe   :  { %20 = vsyncpa [#allocation5], 0 }
   0xf   :  { %22 = vsyncpa [#allocation5 + $0x1], 0  ;;  %s1973_s23 = smov 0   ;;  %s1975_s24 = smov 0  }
  0x10   :  { %s1977_s25 = smov 0   ;;  %s1979_s26 = smov 0  }
  0x11 LB: > { %3224 = sst [smem:[#allocation19_spill]] %s1918_s23  ;;  %s1994_s5 = sadd.s32 4294967295, %s1930_s26   ;;  %s1930_s26 = sphi %s1979_s26, %s3414_s26   ;;  %s1926_s25 = sphi %s1977_s25, %s3417_s25   ;;  %s1922_s24 = sphi %s1975_s24, %s3416_s24   ;;  %s1918_s23 = sphi %s1973_s23, %s3415_s23  }
  0x12   : > { %3225 = sst [smem:[#allocation20_spill]] %s1922_s24  ;;  %s1389_s27 = sadd.s32 4294967294, %s1930_s26  }
  0x13   : > { %3226 = sst [smem:[#allocation21_spill]] %s1926_s25  ;;  %p48_p0 = scmp.ne.s32.totalorder %s1922_s24, %s1918_s23 }
  0x14   : > { %3227 = sst [smem:[#allocation22_spill]] %s1930_s26  ;;  %p49_p1 = scmp.eq.s32.totalorder %s1994_s5, 0 }
  0x15   : > { %3228 = sst [smem:[#allocation23_spill]] %s1994_s5  ;;  %p182_p2 = scmp.eq.s32.totalorder %s1994_s5, 1 }
  0x16   : > { %p188_p3 = scmp.eq.s32.totalorder %s1389_s27, 1  ;;  %p2003_p4 = por %p49_p1, %p48_p0 }
  0x17   : > { %p1390_p5 = scmp.ge.s32.totalorder %s1930_s26, 1  ;;  %p195_p7 = scmp.lt.s32.totalorder %s1930_s26, 3 }
  0x18   : > { %p2008_p6 = por %p188_p3, %p48_p0  ;;  %s3232_s3 = sld [smem:[#allocation111_spill]] }
  0x19   : > { %p2016_p8 = pnand %p1390_p5, %p195_p7  ;;  %s3234_s2 = sld [smem:[#allocation110_spill]] }
  0x1a   : > { %s3230_s29 = scalar_select %p2008_p6, 1, 0 }
  0x1b   : > { %p1681_p10 = pneg %p2016_p8  ;;  %s3235_s4 = sld [smem:[#allocation112_spill]] }
  0x1c   : > { %3231 = sst [smem:[#allocation24_spill]] %s3230_s29  ;;  %s1932_s16 = smov [#allocation10]  }
  0x1d   : > { %p1682_p11 = pnand %p1681_p10, %p49_p1  ;;  %s1933_s17 = smov [#allocation9]  }
  0x1e   : > { %s217_s8 = sshll.u32 %s3232_s3, 4  ;;  %s1934_s18 = smov [#allocation12]   ;;  %s218_s8 = int_to_ptr.vmem [resolvable:$true] %s217_s8 }
  0x1f   : > { %s207_s12 = sshll.u32 %s3234_s2, 4  ;;  %s2032_s19 = sadd.s32 1, %s1930_s26   ;;  %s208_s12 = int_to_ptr.vmem [resolvable:$true] %s207_s12 }
  0x20   : > { %1687 = dma.vmem_to_smem (!%p1682_p11), %s218_s8, 16, %s1932_s16, [#allocation11]  }
  0x21   : > { %s227_s15 = sshll.u32 %s3235_s4, 4  ;;  %3236 = sst [smem:[#allocation25_spill]] %s2032_s19  ;;  %s228_s15 = int_to_ptr.vmem [resolvable:$true] %s227_s15 }
  0x22   : > { %1684 = dma.vmem_to_smem (!%p1682_p11), %s208_s12, 32, %s1933_s17, [#allocation6]  }
  0x23   : > { %1690 = dma.vmem_to_smem (!%p1682_p11), %s228_s15, 16, %s1934_s18, [#allocation11]  }
  0x24   : > { %s32_s20 = ssub.s32 %s1930_s26, %s2032_s19  ;;  %s35_s21 = sadd.s32 1, %s1926_s25 }
  0x25   : > { %p33_p12 = scmp.eq.s32.totalorder %s32_s20, 0  ;;  %p42_p13 = scmp.ne.s32.totalorder %s1926_s25, %s1922_s24 }
  0x26   : > { %p43_p0 = scmp.eq.s32.totalorder %s1930_s26, 0  ;;  %p1705_p3 = scmp.lt.s32.totalorder %s1930_s26, 2 }
  0x27   : > { %s2042_s22 = scalar_select %p33_p12, %s1926_s25, %s35_s21  }
  0x28   : > { %p44_p5 = por %p43_p0, %p42_p13  ;;  %p2046_p7 = por %p182_p2, %p42_p13 }
  0x29   : > { %3237 = sst [smem:[#allocation26_spill]] %s2042_s22  ;;  %s2051_s30 = sand.u32 1, %s1926_s25  }
  0x2a   : > { %s3238_s27 = scalar_select %p2046_p7, 1, 0 }
  0x2b   : > { %s1396_s7 = sshll.u32 %s1930_s26, 3  ;;  %s1395_s8 = sshll.u32 %s2051_s30, 3 }
  0x2c   : > { %3239 = sst [smem:[#allocation27_spill]] %s3238_s27  ;;  %s245_s14 = scalar_lea.vmem [#allocation3], %s1395_s8 }
  0x2d   : > { %s3240_s0 = sld [smem:[#allocation108_spill]]  ;;  %s253_s15 = sshll.u32 %s245_s14, 4  ;;  %s254_s15 = int_to_ptr.vmem [resolvable:$true] %s253_s15 }
  0x2e   : > { %p2060_p2 = pnand %p1705_p3, %p44_p5  ;;  %s3242_s1 = sld [smem:[#allocation109_spill]] }
  0x2f   : > { %s242_s2 = scalar_lea.sflag [#allocation4], %s2051_s30 }
  0x30   : > { %p1796_p11 = pneg %p2060_p2 }
  0x33   : > { %s249_s12 = scalar_lea.hbm %s3240_s0, %s1396_s7  ;;  %s1799_s3 = scalar_lea.hbm %s3240_s0, 16 }
  0x34   : > { %s251_s13 = sshll.u32 %s249_s12, 4  ;;  %s268_s20 = scalar_lea.hbm %s3242_s1, %s1396_s7  ;;  %s252_s13 = int_to_ptr.hbm [resolvable:$true] %s251_s13 }
  0x35   : > { %s270_s21 = sshll.u32 %s268_s20, 4  ;;  %s1792_s10 = sshra.s32 %s252_s13, 4  ;;  %s1793_s10 = int_to_ptr.hbm [resolvable:$true] %s1792_s10  ;;  %s271_s21 = int_to_ptr.hbm [resolvable:$true] %s270_s21 }
  0x36   : > { %s1794_s11 = scalar_lea.hbm %s1793_s10, 8  ;;  %p1800_p0 = scmp.lt.s32.totalorder %s1793_s10, %s3240_s0 }
  0x37   : > { %p1795_p10 = scmp.ne.s32.totalorder %s1793_s10, %s1794_s11  ;;  %p1801_p3 = scmp.lt.s32.totalorder %s1799_s3, %s1794_s11 }
  0x39   : > { %p1797_p12 = pnand %p1796_p11, %p1795_p10  ;;  %p1802_p5 = por %p1801_p3, %p1800_p0 }
  0x3b   : > { %p1798_p13 = pneg %p1797_p12 }
  0x3d   : > { %p1803_p9 = pnand %p1802_p5, %p1798_p13 }
  0x3f   : > { %1806 = shalt.err (!%p1803_p9)
}
  0x40   : > { %1694 = dma.hbm_to_vmem [thread:$0]  (!%p2060_p2), %s252_s13, 128, %s254_s15, %s242_s2  }
  0x41   : > { %s264_s7 = scalar_lea.vmem [#allocation7], %s1395_s8  ;;  %s261_s4 = scalar_lea.sflag [#allocation8], %s2051_s30 }
  0x42   : > { %s272_s20 = sshll.u32 %s264_s7, 4  ;;  %s1822_s12 = sshra.s32 %s271_s21, 4  ;;  %s273_s20 = int_to_ptr.vmem [resolvable:$true] %s272_s20  ;;  %s1823_s12 = int_to_ptr.hbm [resolvable:$true] %s1822_s12 }
  0x43   : > { %s1824_s14 = scalar_lea.hbm %s1823_s12, 8  ;;  %s1829_s11 = scalar_lea.hbm %s3242_s1, 16 }
  0x44   : > { %p1825_p10 = scmp.ne.s32.totalorder %s1823_s12, %s1824_s14  ;;  %p1830_p9 = scmp.lt.s32.totalorder %s1823_s12, %s3242_s1 }
  0x45   : > { %p1831_p13 = scmp.lt.s32.totalorder %s1829_s11, %s1824_s14 }
  0x46   : > { %p1827_p12 = pnand %p1825_p10, %p1796_p11 }
  0x47   : > { %p1832_p3 = por %p1831_p13, %p1830_p9 }
  0x48   : > { %p1828_p0 = pneg %p1827_p12 }
  0x4a   : > { %p1833_p5 = pnand %p1832_p3, %p1828_p0 }
  0x4c   : > { %1836 = shalt.err (!%p1833_p5)
}
  0x4d   : > { %1697 = dma.hbm_to_vmem [thread:$0]  (!%p2060_p2), %s271_s21, 128, %s273_s20, %s261_s4  }
  0x4e   : > { %281 = sbr.rel (%p2016_p8) target bundleno = 532 (0x214), region = 44 }
  0x53   : > { %s2096_s2 = sand.u32 1, %s1922_s24  }
  0x54   : > { %3243 = sst [smem:[#allocation28_spill]] %s2096_s2  ;;  %s2099_s30 = sshll.u32 %s2096_s2, 3 }
  0x55   : > { %s284_s8 = scalar_lea.sflag [#allocation4], %s2096_s2 }
  0x56   : > { %1897 = dma.done.wait (%p2003_p4), %s284_s8, 128  }
  0x57   : > { %1899 = vsyncadd (%p2003_p4), %s284_s8, 4294967168  ;;  %s294_s4 = scalar_lea.sflag [#allocation8], %s2096_s2 }
  0x58   : > { %1901 = dma.done.wait (%p2003_p4), %s294_s4, 128  }
  0x59   : > { %1903 = vsyncadd (%p2003_p4), %s294_s4, 4294967168 }
  0x5a   : > { %1905 = dma.done.wait (%p49_p1), [#allocation6], 32  }
  0x5b   : > { %1907 = vsyncadd (%p49_p1), [#allocation6], 4294967264 }
  0x5c   : > { %1909 = dma.done.wait (%p49_p1), [#allocation11], 32  }
  0x5d   : > { %1911 = vsyncadd (%p49_p1), [#allocation11], 4294967264 }
  0x5e   : > { %318 = sfence }
  0x5f   : > { %s2121_s15 = sld [smem:[#allocation9]] }
  0x60   : > { %s2123_s16 = sld [smem:[#allocation9 + $0x1]] }
  0x61   : > { %s2125_s21 = sld [smem:[#allocation9 + $0x2]] }
  0x62   : > { %s2127_s28 = sld [smem:[#allocation9 + $0x3]] }
  0x63   : > { %s2129_s7 = sld [smem:[#allocation9 + $0x4]] }
  0x64   : > { %s2131_s20 = sld [smem:[#allocation9 + $0x5]] }
  0x65   : > { %s2133_s12 = sld [smem:[#allocation9 + $0x6]]  ;;  %v607_v2 = vstv %s2121_s15 }
  0x66   : > { %s2135_s14 = sld [smem:[#allocation9 + $0x7]]  ;;  %v618_v7 = vstv %s2123_s16 }
  0x67   : > { %s2137_s3 = sld [smem:[#allocation9 + $0x8]]  ;;  %v628_v12 = vstv %s2125_s21 }
  0x68   : > { %s2139_s10 = sld [smem:[#allocation9 + $0x9]]  ;;  %v638_v20 = vstv %s2127_s28 }
  0x69   : > { %s2141_s11 = sld [smem:[#allocation9 + $0xa]]  ;;  %v648_v28 = vstv %s2129_s7 }
  0x6a   : > { %s2143_s17 = sld [smem:[#allocation9 + $0xb]]  ;;  %v658_v38 = vstv %s2131_s20 }
  0x6b   : > { %s2145_s18 = sld [smem:[#allocation9 + $0xc]]  ;;  %v668_v46 = vstv %s2133_s12 }
  0x6c   : > { %s2147_s8 = sld [smem:[#allocation9 + $0xd]]  ;;  %v678_v55 = vstv %s2135_s14 }
  0x6d   : > { %s2149_s4 = sld [smem:[#allocation9 + $0xe]]  ;;  %v688_v63 = vstv %s2137_s3 }
  0x6e   : > { %s2151_s9 = sld [smem:[#allocation9 + $0xf]] }
  0x6f   : > { %3244 = sst [smem:[#allocation29_spill]] %s2141_s11 }
  0x70   : > { %3245 = sst [smem:[#allocation30_spill]] %s2143_s17 }
  0x71   : > { %3246 = sst [smem:[#allocation31_spill]] %s2145_s18 }
  0x72   : > { %3247 = sst [smem:[#allocation32_spill]] %s2147_s8 }
  0x73   : > { %3248 = sst [smem:[#allocation33_spill]] %s2149_s4 }
  0x74   : > { %3249 = sst [smem:[#allocation34_spill]] %s2151_s9 }
  0x75   : > { %s2153_s13 = sld [smem:[#allocation9 + $0x10]] }
  0x76   : > { %s2155_s0 = sld [smem:[#allocation9 + $0x11]] }
  0x77   : > { %s2157_s1 = sld [smem:[#allocation9 + $0x12]] }
  0x78   : > { %s2159_s22 = sld [smem:[#allocation9 + $0x13]] }
  0x79   : > { %s2161_s25 = sld [smem:[#allocation9 + $0x14]] }
  0x7a   : > { %s2163_s24 = sld [smem:[#allocation9 + $0x15]] }
  0x7b   : > { %3250 = sst [smem:[#allocation35_spill]] %s2153_s13 }
  0x7c   : > { %3251 = sst [smem:[#allocation36_spill]] %s2155_s0 }
  0x7d   : > { %3252 = sst [smem:[#allocation37_spill]] %s2157_s1 }
  0x7e   : > { %3253 = sst [smem:[#allocation38_spill]] %s2159_s22 }
  0x7f   : > { %3254 = sst [smem:[#allocation39_spill]] %s2161_s25 }
  0x80   : > { %3255 = sst [smem:[#allocation40_spill]] %s2163_s24 }
  0x81   : > { %s2165_s19 = sld [smem:[#allocation9 + $0x16]] }
  0x82   : > { %s2167_s26 = sld [smem:[#allocation9 + $0x17]] }
  0x83   : > { %s2169_s29 = sld [smem:[#allocation9 + $0x18]] }
  0x84   : > { %s2171_s23 = sld [smem:[#allocation9 + $0x19]] }
  0x85   : > { %s2173_s27 = sld [smem:[#allocation9 + $0x1a]] }
  0x86   : > { %s2175_s6 = sld [smem:[#allocation9 + $0x1b]] }
  0x87   : > { %3256 = sst [smem:[#allocation41_spill]] %s2165_s19 }
  0x88   : > { %3257 = sst [smem:[#allocation42_spill]] %s2167_s26 }
  0x89   : > { %3258 = sst [smem:[#allocation43_spill]] %s2169_s29 }
  0x8a   : > { %3259 = sst [smem:[#allocation44_spill]] %s2171_s23 }
  0x8b   : > { %3260 = sst [smem:[#allocation45_spill]] %s2173_s27 }
  0x8c   : > { %3261 = sst [smem:[#allocation46_spill]] %s2175_s6 }
  0x8d   : > { %s2177_s2 = sld [smem:[#allocation9 + $0x1c]] }
  0x8e   : > { %s2179_s5 = sld [smem:[#allocation9 + $0x1d]] }
  0x8f   : > { %s2181_s22 = sld [smem:[#allocation9 + $0x1e]] }
  0x90   : > { %s2183_s25 = sld [smem:[#allocation9 + $0x1f]] }
  0x91   : > { %s2185_s24 = sld [smem:[#allocation9 + $0x20]] }
  0x92   : > { %s2187_s19 = sld [smem:[#allocation9 + $0x21]] }
  0x93   : > { %3262 = sst [smem:[#allocation47_spill]] %s2177_s2 }
  0x94   : > { %3263 = sst [smem:[#allocation48_spill]] %s2179_s5 }
  0x95   : > { %3264 = sst [smem:[#allocation49_spill]] %s2181_s22 }
  0x96   : > { %3265 = sst [smem:[#allocation50_spill]] %s2183_s25 }
  0x97   : > { %3266 = sst [smem:[#allocation51_spill]] %s2185_s24 }
  0x98   : > { %3267 = sst [smem:[#allocation52_spill]] %s2187_s19 }
  0x99   : > { %s2189_s26 = sld [smem:[#allocation9 + $0x22]] }
  0x9a   : > { %s2191_s29 = sld [smem:[#allocation9 + $0x23]] }
  0x9b   : > { %s2193_s23 = sld [smem:[#allocation9 + $0x24]] }
  0x9c   : > { %s2195_s27 = sld [smem:[#allocation9 + $0x25]] }
  0x9d   : > { %s2197_s6 = sld [smem:[#allocation9 + $0x26]] }
  0x9e   : > { %s2199_s2 = sld [smem:[#allocation9 + $0x27]] }
  0x9f   : > { %3268 = sst [smem:[#allocation53_spill]] %s2189_s26 }
  0xa0   : > { %3269 = sst [smem:[#allocation54_spill]] %s2191_s29 }
  0xa1   : > { %3270 = sst [smem:[#allocation55_spill]] %s2193_s23 }
  0xa2   : > { %3271 = sst [smem:[#allocation56_spill]] %s2195_s27 }
  0xa3   : > { %3272 = sst [smem:[#allocation57_spill]] %s2197_s6 }
  0xa4   : > { %3273 = sst [smem:[#allocation58_spill]] %s2199_s2 }
  0xa5   : > { %s2201_s5 = sld [smem:[#allocation9 + $0x28]] }
  0xa6   : > { %s2203_s22 = sld [smem:[#allocation9 + $0x29]] }
  0xa7   : > { %s2205_s25 = sld [smem:[#allocation9 + $0x2a]] }
  0xa8   : > { %s2207_s24 = sld [smem:[#allocation9 + $0x2b]] }
  0xa9   : > { %s2209_s19 = sld [smem:[#allocation9 + $0x2c]] }
  0xaa   : > { %s2211_s26 = sld [smem:[#allocation9 + $0x2d]] }
  0xab   : > { %3274 = sst [smem:[#allocation59_spill]] %s2201_s5 }
  0xac   : > { %3275 = sst [smem:[#allocation60_spill]] %s2203_s22 }
  0xad   : > { %3276 = sst [smem:[#allocation61_spill]] %s2205_s25 }
  0xae   : > { %3277 = sst [smem:[#allocation62_spill]] %s2207_s24 }
  0xaf   : > { %3278 = sst [smem:[#allocation63_spill]] %s2209_s19 }
  0xb0   : > { %3279 = sst [smem:[#allocation64_spill]] %s2211_s26 }
  0xb1   : > { %s2213_s29 = sld [smem:[#allocation9 + $0x2e]] }
  0xb2   : > { %s2215_s23 = sld [smem:[#allocation9 + $0x2f]] }
  0xb3   : > { %s2217_s27 = sld [smem:[#allocation9 + $0x30]] }
  0xb4   : > { %s2219_s6 = sld [smem:[#allocation9 + $0x31]] }
  0xb5   : > { %s2221_s2 = sld [smem:[#allocation9 + $0x32]] }
  0xb6   : > { %s2223_s5 = sld [smem:[#allocation9 + $0x33]] }
  0xb7   : > { %3280 = sst [smem:[#allocation65_spill]] %s2213_s29 }
  0xb8   : > { %3281 = sst [smem:[#allocation66_spill]] %s2215_s23 }
  0xb9   : > { %3282 = sst [smem:[#allocation67_spill]] %s2217_s27 }
  0xba   : > { %3283 = sst [smem:[#allocation68_spill]] %s2219_s6 }
  0xbb   : > { %3284 = sst [smem:[#allocation69_spill]] %s2221_s2 }
  0xbc   : > { %3285 = sst [smem:[#allocation70_spill]] %s2223_s5 }
  0xbd   : > { %s2225_s22 = sld [smem:[#allocation9 + $0x34]] }
  0xbe   : > { %s2227_s25 = sld [smem:[#allocation9 + $0x35]] }
  0xbf   : > { %s2229_s24 = sld [smem:[#allocation9 + $0x36]] }
  0xc0   : > { %s2231_s19 = sld [smem:[#allocation9 + $0x37]] }
  0xc1   : > { %s2233_s26 = sld [smem:[#allocation9 + $0x38]] }
  0xc2   : > { %s2235_s29 = sld [smem:[#allocation9 + $0x39]] }
  0xc3   : > { %3286 = sst [smem:[#allocation71_spill]] %s2225_s22 }
  0xc4   : > { %3287 = sst [smem:[#allocation72_spill]] %s2227_s25 }
  0xc5   : > { %3288 = sst [smem:[#allocation73_spill]] %s2229_s24 }
  0xc6   : > { %3289 = sst [smem:[#allocation74_spill]] %s2231_s19 }
  0xc7   : > { %3290 = sst [smem:[#allocation75_spill]] %s2233_s26 }
  0xc8   : > { %3291 = sst [smem:[#allocation76_spill]] %s2235_s29 }
  0xc9   : > { %s2237_s23 = sld [smem:[#allocation9 + $0x3a]] }
  0xca   : > { %s2239_s27 = sld [smem:[#allocation9 + $0x3b]] }
  0xcb   : > { %s2241_s6 = sld [smem:[#allocation9 + $0x3c]] }
  0xcc   : > { %s2243_s2 = sld [smem:[#allocation9 + $0x3d]] }
  0xcd   : > { %s2245_s5 = sld [smem:[#allocation9 + $0x3e]] }
  0xce   : > { %s2247_s22 = sld [smem:[#allocation9 + $0x3f]] }
  0xcf   : > { %3292 = sst [smem:[#allocation77_spill]] %s2237_s23 }
  0xd0   : > { %3293 = sst [smem:[#allocation78_spill]] %s2239_s27 }
  0xd1   : > { %3294 = sst [smem:[#allocation79_spill]] %s2241_s6 }
  0xd2   : > { %3295 = sst [smem:[#allocation80_spill]] %s2243_s2 }
  0xd3   : > { %3296 = sst [smem:[#allocation81_spill]] %s2245_s5 }
  0xd4   : > { %3297 = sst [smem:[#allocation82_spill]] %s2247_s22 }
  0xd5   : > { %s2249_s25 = sld [smem:[#allocation9 + $0x80]] }
  0xd6   : > { %s2251_s24 = sld [smem:[#allocation9 + $0x81]] }
  0xd7   : > { %s2253_s19 = sld [smem:[#allocation9 + $0x82]] }
  0xd8   : > { %s2255_s26 = sld [smem:[#allocation9 + $0x83]] }
  0xd9   : > { %s2257_s29 = sld [smem:[#allocation9 + $0x84]] }
  0xda   : > { %s2259_s23 = sld [smem:[#allocation9 + $0x85]] }
  0xdb   : > { %s2261_s27 = sld [smem:[#allocation9 + $0x86]]  ;;  %v609_v3 = vstv %s2249_s25 }
  0xdc   : > { %s2263_s6 = sld [smem:[#allocation9 + $0x87]]  ;;  %v620_v8 = vstv %s2251_s24 }
  0xdd   : > { %s2265_s2 = sld [smem:[#allocation9 + $0x88]]  ;;  %v630_v13 = vstv %s2253_s19 }
  0xde   : > { %s2267_s5 = sld [smem:[#allocation9 + $0x89]]  ;;  %v640_v21 = vstv %s2255_s26 }
  0xdf   : > { %s2269_s22 = sld [smem:[#allocation9 + $0x8a]]  ;;  %v650_v31 = vstv %s2257_s29 }
  0xe0   : > { %s2271_s1 = sld [smem:[#allocation9 + $0x8b]]  ;;  %v660_v39 = vstv %s2259_s23 }
  0xe1   : > { %s2273_s0 = sld [smem:[#allocation9 + $0x8c]]  ;;  %v670_v47 = vstv %s2261_s27 }
  0xe2   : > { %s2275_s13 = sld [smem:[#allocation9 + $0x8d]]  ;;  %v680_v62 = vstv %s2263_s6 }
  0xe3   : > { %s2277_s9 = sld [smem:[#allocation9 + $0x8e]] }
  0xe4   : > { %3298 = sst [smem:[#allocation83_spill]] %s2267_s5 }
  0xe5   : > { %3299 = sst [smem:[#allocation84_spill]] %s2269_s22 }
  0xe6   : > { %3300 = sst [smem:[#allocation85_spill]] %s2271_s1 }
  0xe7   : > { %3301 = sst [smem:[#allocation86_spill]] %s2273_s0 }
  0xe8   : > { %3302 = sst [smem:[#allocation87_spill]] %s2275_s13 }
  0xe9   : > { %3303 = sst [smem:[#allocation88_spill]] %s2277_s9 }
  0xea   : > { %s2279_s4 = sld [smem:[#allocation9 + $0x8f]] }
  0xeb   : > { %s2281_s8 = sld [smem:[#allocation9 + $0x90]] }
  0xec   : > { %s2283_s18 = sld [smem:[#allocation9 + $0x91]] }
  0xed   : > { %s2285_s17 = sld [smem:[#allocation9 + $0x92]] }
  0xee   : > { %s2287_s11 = sld [smem:[#allocation9 + $0x93]] }
  0xef   : > { %s2289_s5 = sld [smem:[#allocation9 + $0x94]] }
  0xf0   : > { %s2291_s22 = sld [smem:[#allocation9 + $0x95]] }
  0xf1   : > { %3304 = sst [smem:[#allocation89_spill]] %s2281_s8 }
  0xf2   : > { %3305 = sst [smem:[#allocation90_spill]] %s2283_s18 }
  0xf3   : > { %3306 = sst [smem:[#allocation91_spill]] %s2285_s17 }
  0xf4   : > { %3307 = sst [smem:[#allocation92_spill]] %s2287_s11 }
  0xf5   : > { %3308 = sst [smem:[#allocation93_spill]] %s2289_s5 }
  0xf6   : > { %3309 = sst [smem:[#allocation94_spill]] %s2291_s22 }
  0xf7   : > { %s2293_s1 = sld [smem:[#allocation9 + $0x96]] }
  0xf8   : > { %s2295_s0 = sld [smem:[#allocation9 + $0x97]] }
  0xf9   : > { %s2297_s13 = sld [smem:[#allocation9 + $0x98]] }
  0xfa   : > { %s2299_s9 = sld [smem:[#allocation9 + $0x99]] }
  0xfb   : > { %s2301_s8 = sld [smem:[#allocation9 + $0x9a]] }
  0xfc   : > { %s2303_s18 = sld [smem:[#allocation9 + $0x9b]] }
  0xfd   : > { %3310 = sst [smem:[#allocation95_spill]] %s2293_s1 }
  0xfe   : > { %3311 = sst [smem:[#allocation96_spill]] %s2295_s0 }
  0xff   : > { %3312 = sst [smem:[#allocation97_spill]] %s2297_s13 }
 0x100   : > { %3313 = sst [smem:[#allocation98_spill]] %s2299_s9 }
 0x101   : > { %3314 = sst [smem:[#allocation99_spill]] %s2301_s8 }
 0x102   : > { %3315 = sst [smem:[#allocation100_spill]] %s2303_s18 }
 0x103   : > { %s2305_s11 = sld [smem:[#allocation9 + $0x9c]] }
 0x104   : > { %s2307_s5 = sld [smem:[#allocation9 + $0x9d]] }
 0x105   : > { %s2309_s22 = sld [smem:[#allocation9 + $0x9e]] }
 0x106   : > { %s2311_s1 = sld [smem:[#allocation9 + $0x9f]] }
 0x107   : > { %s2313_s0 = sld [smem:[#allocation9 + $0xa0]] }
 0x108   : > { %s2315_s13 = sld [smem:[#allocation9 + $0xa1]] }
 0x109   : > { %3316 = sst [smem:[#allocation101_spill]] %s2305_s11 }
 0x10a   : > { %3317 = sst [smem:[#allocation102_spill]] %s2307_s5 }
 0x10b   : > { %3318 = sst [smem:[#allocation103_spill]] %s2309_s22 }
 0x10c   : > { %3319 = sst [smem:[#allocation104_spill]] %s2311_s1  ;;  %s3323_s1 = scalar_lea.vmem [#allocation3], %s2099_s30 }
 0x10d   : > { %3320 = sst [smem:[#allocation105_spill]] %s2313_s0  ;;  %v2331_v0 = vld [vmem:[%s3323_s1] sm:$0xff]  ;;  %s3324_s0 = scalar_lea.vmem [#allocation7], %s2099_s30 }
 0x10e   : > { %s476_s9 = sld [smem:[#allocation10]]  ;;  %v2335_v1 = vld [vmem:[%s3324_s0] sm:$0xff]  ;;  %v608_v4 = vmul.f32 %v607_v2, %v2331_v0  ;;  %v619_v10 = vmul.f32 %v618_v7, %v2331_v0  ;;  %v629_v16 = vmul.f32 %v628_v12, %v2331_v0  ;;  %v639_v24 = vmul.f32 %v638_v20, %v2331_v0 }
 0x10f   : > { %s2317_s8 = sld [smem:[#allocation9 + $0xa2]]  ;;  %v610_v5 = vmul.f32 %v609_v3, %v2335_v1  ;;  %v621_v11 = vmul.f32 %v620_v8, %v2335_v1  ;;  %v631_v17 = vmul.f32 %v630_v13, %v2335_v1  ;;  %v641_v27 = vmul.f32 %v640_v21, %v2335_v1 }
 0x110   : > { %s2319_s18 = sld [smem:[#allocation9 + $0xa3]]  ;;  %v649_v30 = vmul.f32 %v648_v28, %v2331_v0  ;;  %v651_v35 = vmul.f32 %v650_v31, %v2335_v1  ;;  %v659_v44 = vmul.f32 %v658_v38, %v2331_v0  ;;  %v661_v45 = vmul.f32 %v660_v39, %v2335_v1 }
 0x111   : > { %s2321_s17 = sld [smem:[#allocation10 + $0x1]]  ;;  %v611_v9 = vadd.f32 %v610_v5, %v608_v4  ;;  %v622_v15 = vadd.f32 %v621_v11, %v619_v10  ;;  %v632_v23 = vadd.f32 %v631_v17, %v629_v16  ;;  %v642_v33 = vadd.f32 %v641_v27, %v639_v24 }
 0x112   : > { %s2323_s11 = sld [smem:[#allocation12]]  ;;  %v652_v42 = vadd.f32 %v651_v35, %v649_v30  ;;  %v662_v52 = vadd.f32 %v661_v45, %v659_v44  ;;  %v669_v53 = vmul.f32 %v668_v46, %v2331_v0  ;;  %v671_v54 = vmul.f32 %v670_v47, %v2335_v1 }
 0x113   : > { %s2325_s5 = sld [smem:[#allocation10 + $0x2]]  ;;  %v679_v59 = vmul.f32 %v678_v55, %v2331_v0  ;;  %v681_v4 = vmul.f32 %v680_v62, %v2335_v1  ;;  %v689_v5 = vmul.f32 %v688_v63, %v2331_v0  ;;  %v690_v8 = vstv %s2265_s2 }
 0x114   : > { %s2327_s22 = sld [smem:[#allocation12 + $0x1]]  ;;  %v612_v6 = vstv %s476_s9  ;;  %v672_v61 = vadd.f32 %v671_v54, %v669_v53  ;;  %v691_v13 = vmul.f32 %v690_v8, %v2335_v1 }
 0x115   : > { %3321 = sst [smem:[#allocation106_spill]] %s2317_s8  ;;  %v613_v14 = vmax.f32 %v611_v9, %v612_v6  ;;  %v698_v9 = vstv %s2139_s10  ;;  %v682_v11 = vadd.f32 %v681_v4, %v679_v59 }
 0x116   : > { %3322 = sst [smem:[#allocation107_spill]] %s2319_s18 }
 0x117   : > { %s2339_s8 = sld [smem:[#allocation10 + $0x3]]  ;;  %v623_v19 = vstv %s2321_s17 }
 0x118   : > { %s2343_s18 = sld [smem:[#allocation10 + $0x4]]  ;;  %v614_v18 = vstv %s2323_s11  ;;  %v624_v22 = vmax.f32 %v622_v15, %v623_v19  ;;  %v699_v15 = vmul.f32 %v698_v9, %v2331_v0  ;;  %v692_v19 = vadd.f32 %v691_v13, %v689_v5 }
 0x119   : > { %s2347_s1 = sld [smem:[#allocation12 + $0x2]]  ;;  %v633_v26 = vstv %s2325_s5  ;;  %v2376_v29 = vmul.f32 %v614_v18, %v613_v14  ;;  %v760_v13 = vstv %s2279_s4 }
 0x11a   : > { %s2351_s0 = sld [smem:[#allocation12 + $0x3]]  ;;  %v625_v25 = vstv %s2327_s22  ;;  %v634_v32 = vmax.f32 %v632_v23, %v633_v26 }
 0x11b   : > { %s2355_s25 = sld [smem:[#allocation10 + $0x5]]  ;;  %v2386_v36 = vmul.f32 %v625_v25, %v624_v22 }
 0x11c   : > { %s2359_s24 = sld [smem:[#allocation12 + $0x4]] }
 0x11d   : > { %s2365_s9 = sld [smem:[#allocation10 + $0x6]]  ;;  %v643_v34 = vstv %s2339_s8 }
 0x11e   : > { %s2368_s19 = sld [smem:[#allocation12 + $0x5]]  ;;  %v644_v40 = vmax.f32 %v642_v33, %v643_v34  ;;  %v653_v43 = vstv %s2343_s18 }
 0x11f   : > { %s2374_s15 = sld [smem:[#allocation9 + $0xa4]]  ;;  %v635_v37 = vstv %s2347_s1  ;;  %v654_v49 = vmax.f32 %v652_v42, %v653_v43 }
 0x120   : > { %s2380_s26 = sld [smem:[#allocation12 + $0x6]]  ;;  %v645_v41 = vstv %s2351_s0  ;;  %v2403_v48 = vmul.f32 %v635_v37, %v634_v32 }
 0x121   : > { %s2384_s5 = sld [smem:[#allocation10 + $0x7]]  ;;  %v663_v51 = vstv %s2355_s25  ;;  %v2414_v56 = vmul.f32 %v645_v41, %v644_v40 }
 0x122   : > { %s2391_s22 = sld [smem:[#allocation12 + $0x7]]  ;;  %v655_v50 = vstv %s2359_s24  ;;  %v664_v60 = vmax.f32 %v662_v52, %v663_v51 }
 0x123   : > { %s2395_s29 = sld [smem:[#allocation10 + $0x8]]  ;;  %v673_v58 = vstv %s2365_s9  ;;  %v2425_v2 = vmul.f32 %v655_v50, %v654_v49 }
 0x124   : > { %s2401_s16 = sld [smem:[#allocation12 + $0x8]]  ;;  %v665_v57 = vstv %s2368_s19  ;;  %v674_v10 = vmax.f32 %v672_v61, %v673_v58 }
 0x125   : > { %s2407_s23 = sld [smem:[#allocation10 + $0x9]]  ;;  %v2432_v6 = vmul.f32 %v665_v57, %v664_v60 }
 0x126   : > { %s2412_s21 = sld [smem:[#allocation9 + $0xa5]]  ;;  %v675_v3 = vstv %s2380_s26 }
 0x127   : > { %s2419_s27 = sld [smem:[#allocation12 + $0x9]]  ;;  %v683_v7 = vstv %s2384_s5  ;;  %v2459_v26 = vmul.f32 %v675_v3, %v674_v10 }
 0x128   : > { %s2423_s28 = sld [smem:[#allocation10 + $0xa]]  ;;  %v685_v12 = vstv %s2391_s22  ;;  %v684_v18 = vmax.f32 %v682_v11, %v683_v7 }
 0x129   : > { %s3325_s7 = sld [smem:[#allocation83_spill]]  ;;  %v693_v14 = vstv %s2395_s29 }
 0x12a   : > { %s3326_s20 = sld [smem:[#allocation29_spill]]  ;;  %v695_v20 = vstv %s2401_s16  ;;  %v2461_v27 = vmul.f32 %v685_v12, %v684_v18  ;;  %v694_v28 = vmax.f32 %v692_v19, %v693_v14  ;;  %v761_v19 = vmul.f32 %v760_v13, %v2335_v1 }
 0x12b   : > { %s2430_s12 = sld [smem:[#allocation10 + $0xb]]  ;;  %v703_v22 = vstv %s2407_s23 }
 0x12c   : > { %s2437_s6 = sld [smem:[#allocation12 + $0xa]]  ;;  %v2471_v35 = vmul.f32 %v695_v20, %v694_v28 }
 0x12d   : > { %s3327_s14 = sld [smem:[#allocation84_spill]]  ;;  %v705_v31 = vstv %s2419_s27 }
 0x12e   : > { %s3328_s3 = sld [smem:[#allocation30_spill]]  ;;  %v713_v38 = vstv %s2423_s28 }
 0x12f   : > { %s2441_s11 = sld [smem:[#allocation12 + $0xb]]  ;;  %v700_v16 = vstv %s3325_s7 }
 0x130   : > { %v708_v17 = vstv %s3326_s20  ;;  %s2447_s17 = sld [smem:[#allocation10 + $0xc]]  ;;  %v701_v21 = vmul.f32 %v700_v16, %v2335_v1 }
 0x131   : > { %s3329_s2 = sld [smem:[#allocation85_spill]]  ;;  %v709_v23 = vmul.f32 %v708_v17, %v2331_v0  ;;  %v723_v41 = vstv %s2430_s12 }
 0x132   : > { %s2451_s10 = sld [smem:[#allocation12 + $0xc]]  ;;  %v702_v30 = vadd.f32 %v701_v21, %v699_v15  ;;  %v715_v45 = vstv %s2437_s6 }
 0x133   : > { %v710_v24 = vstv %s3327_s14  ;;  %s2457_s18 = sld [smem:[#allocation10 + $0xd]] }
 0x134   : > { %v718_v25 = vstv %s3328_s3  ;;  %s3330_s8 = sld [smem:[#allocation31_spill]]  ;;  %v711_v32 = vmul.f32 %v710_v24, %v2335_v1  ;;  %v704_v37 = vmax.f32 %v702_v30, %v703_v22 }
 0x135   : > { %s3331_s1 = sld [smem:[#allocation86_spill]]  ;;  %v719_v33 = vmul.f32 %v718_v25, %v2331_v0  ;;  %v725_v50 = vstv %s2441_s11 }
 0x136   : > { %s2463_s0 = sld [smem:[#allocation10 + $0xe]]  ;;  %v712_v40 = vadd.f32 %v711_v32, %v709_v23  ;;  %v2482_v44 = vmul.f32 %v705_v31, %v704_v37  ;;  %v733_v54 = vstv %s2447_s17 }
 0x137   : > { %v720_v34 = vstv %s3329_s2  ;;  %s2469_s25 = sld [smem:[#allocation12 + $0xd]] }
 0x138   : > { %s3332_s24 = sld [smem:[#allocation32_spill]]  ;;  %v721_v39 = vmul.f32 %v720_v34, %v2335_v1  ;;  %v714_v49 = vmax.f32 %v712_v40, %v713_v38  ;;  %v735_v60 = vstv %s2451_s10 }
 0x139   : > { %s2475_s9 = sld [smem:[#allocation12 + $0xe]]  ;;  %v743_v63 = vstv %s2457_s18 }
 0x13a   : > { %v728_v42 = vstv %s3330_s8  ;;  %s3333_s19 = sld [smem:[#allocation87_spill]]  ;;  %v722_v46 = vadd.f32 %v721_v39, %v719_v33  ;;  %v2498_v58 = vmul.f32 %v715_v45, %v714_v49 }
 0x13b   : > { %v730_v43 = vstv %s3331_s1  ;;  %s2480_s26 = sld [smem:[#allocation10 + $0xf]]  ;;  %v729_v47 = vmul.f32 %v728_v42, %v2331_v0 }
 0x13c   : > { %s2486_s5 = sld [smem:[#allocation12 + $0xf]]  ;;  %v731_v51 = vmul.f32 %v730_v43, %v2335_v1  ;;  %v724_v53 = vmax.f32 %v722_v46, %v723_v41  ;;  %v753_v11 = vstv %s2463_s0 }
 0x13d   : > { %s3334_s22 = sld [smem:[#allocation33_spill]]  ;;  %v745_v10 = vstv %s2469_s25 }
 0x13e   : > { %s3335_s29 = sld [smem:[#allocation88_spill]]  ;;  %v738_v52 = vstv %s3332_s24  ;;  %v732_v59 = vadd.f32 %v731_v51, %v729_v47  ;;  %v2504_v62 = vmul.f32 %v725_v50, %v724_v53 }
 0x13f   : > { %s2491_s16 = sld [smem:[#allocation10 + $0x10]]  ;;  %v739_v55 = vmul.f32 %v738_v52, %v2331_v0  ;;  %v755_v16 = vstv %s2475_s9 }
 0x140   : > { %v740_v57 = vstv %s3333_s19  ;;  %s2496_s23 = sld [smem:[#allocation12 + $0x10]]  ;;  %v734_v5 = vmax.f32 %v732_v59, %v733_v54 }
 0x141   : > { %s3336_s27 = sld [smem:[#allocation34_spill]]  ;;  %v741_v61 = vmul.f32 %v740_v57, %v2335_v1  ;;  %v763_v20 = vstv %s2480_s26 }
 0x142   : > { %s2502_s28 = sld [smem:[#allocation10 + $0x11]]  ;;  %v2525_v18 = vmul.f32 %v735_v60, %v734_v5  ;;  %v765_v23 = vstv %s2486_s5 }
 0x143   : > { %v748_v3 = vstv %s3334_s22  ;;  %s2509_s7 = sld [smem:[#allocation12 + $0x11]]  ;;  %v742_v7 = vadd.f32 %v741_v61, %v739_v55 }
 0x144   : > { %v750_v4 = vstv %s3335_s29  ;;  %v749_v8 = vmul.f32 %v748_v3, %v2331_v0  ;;  %s3337_s20 = sld [smem:[#allocation35_spill]] }
 0x145   : > { %v751_v9 = vmul.f32 %v750_v4, %v2335_v1  ;;  %s2513_s12 = sld [smem:[#allocation2]]  ;;  %v744_v14 = vmax.f32 %v742_v7, %v743_v63  ;;  %v773_v32 = vstv %s2491_s16 }
 0x146   : > { %s3338_s6 = sld [smem:[#allocation89_spill]]  ;;  %v775_v34 = vstv %s2496_s23 }
 0x147   : > { %v758_v12 = vstv %s3336_s27  ;;  %s2519_s14 = sld [smem:[#allocation9 + $0xa6]]  ;;  %v752_v15 = vadd.f32 %v751_v9, %v749_v8  ;;  %v2537_v28 = vmul.f32 %v745_v10, %v744_v14 }
 0x148   : > { %v759_v17 = vmul.f32 %v758_v12, %v2331_v0  ;;  %s2523_s3 = sld [smem:[#allocation10 + $0x12]]  ;;  %v783_v46 = vstv %s2502_s28 }
 0x149   : > { %s3339_s11 = sld [smem:[#allocation36_spill]]  ;;  %v754_v22 = vmax.f32 %v752_v15, %v753_v11  ;;  %v785_v50 = vstv %s2509_s7 }
 0x14a   : > { %s3340_s17 = sld [smem:[#allocation90_spill]]  ;;  %v768_v21 = vstv %s3337_s20  ;;  %v762_v30 = vadd.f32 %v761_v19, %v759_v17 }
 0x14b   : > { %s2530_s4 = sld [smem:[#allocation10 + $0x13]]  ;;  %v769_v24 = vmul.f32 %v768_v21, %v2331_v0  ;;  %v2543_v33 = vmul.f32 %v755_v16, %v754_v22  ;;  %v616_v39 = vstv %s2513_s12 }
 0x14c   : > { %v770_v25 = vstv %s3338_s6  ;;  %s2535_s2 = sld [smem:[#allocation12 + $0x12]]  ;;  %v764_v40 = vmax.f32 %v762_v30, %v763_v20  ;;  %v617_v43 = vadd.f32 %v616_v39, %v2376_v29 }
 0x14d   : > { %v771_v31 = vmul.f32 %v770_v25, %v2335_v1  ;;  %s3341_s10 = sld [smem:[#allocation37_spill]] }
 0x14e   : > { %s2541_s18 = sld [smem:[#allocation12 + $0x13]]  ;;  %v627_v53 = vadd.f32 %v2386_v36, %v617_v43  ;;  %v2566_v29 = vmul.f32 %v765_v23, %v764_v40  ;;  %v793_v59 = vstv %s2523_s3 }
 0x14f   : > { %v778_v37 = vstv %s3339_s11  ;;  %s3342_s8 = sld [smem:[#allocation91_spill]]  ;;  %v772_v41 = vadd.f32 %v771_v31, %v769_v24 }
 0x150   : > { %v780_v38 = vstv %s3340_s17  ;;  %s2548_s1 = sld [smem:[#allocation10 + $0x14]]  ;;  %v779_v42 = vmul.f32 %v778_v37, %v2331_v0  ;;  %v637_v63 = vadd.f32 %v2403_v48, %v627_v53 }
 0x151   : > { %s2552_s0 = sld [smem:[#allocation12 + $0x14]]  ;;  %v781_v45 = vmul.f32 %v780_v38, %v2335_v1  ;;  %v774_v49 = vmax.f32 %v772_v41, %v773_v32  ;;  %v803_v8 = vstv %s2530_s4 }
 0x152   : > { %s3343_s25 = sld [smem:[#allocation38_spill]]  ;;  %v795_v5 = vstv %s2535_s2  ;;  %v647_v10 = vadd.f32 %v2414_v56, %v637_v63 }
 0x153   : > { %s3344_s24 = sld [smem:[#allocation92_spill]]  ;;  %v788_v47 = vstv %s3341_s10  ;;  %v782_v54 = vadd.f32 %v781_v45, %v779_v42  ;;  %v2571_v57 = vmul.f32 %v775_v34, %v774_v49 }
 0x154   : > { %s2558_s9 = sld [smem:[#allocation9 + $0xa7]]  ;;  %v789_v51 = vmul.f32 %v788_v47, %v2331_v0  ;;  %v805_v11 = vstv %s2541_s18  ;;  %v657_v17 = vadd.f32 %v2425_v2, %v647_v10 }
 0x155   : > { %v790_v52 = vstv %s3342_s8  ;;  %s2563_s19 = sld [smem:[#allocation10 + $0x15]]  ;;  %v784_v36 = vmax.f32 %v782_v54, %v783_v46 }
 0x156   : > { %s3345_s26 = sld [smem:[#allocation39_spill]]  ;;  %v791_v55 = vmul.f32 %v790_v52, %v2335_v1  ;;  %v813_v16 = vstv %s2548_s1  ;;  %v667_v25 = vadd.f32 %v2432_v6, %v657_v17 }
 0x157   : > { %s2569_s5 = sld [smem:[#allocation12 + $0x15]]  ;;  %v2593_v13 = vmul.f32 %v785_v50, %v784_v36  ;;  %v815_v19 = vstv %s2552_s0 }
 0x158   : > { %v798_v60 = vstv %s3343_s25  ;;  %s2576_s22 = sld [smem:[#allocation9 + $0xa8]]  ;;  %v792_v3 = vadd.f32 %v791_v55, %v789_v51  ;;  %v677_v39 = vadd.f32 %v2459_v26, %v667_v25 }
 0x159   : > { %v800_v61 = vstv %s3344_s24  ;;  %s3346_s29 = sld [smem:[#allocation93_spill]]  ;;  %v799_v4 = vmul.f32 %v798_v60, %v2331_v0 }
 0x15a   : > { %s2580_s16 = sld [smem:[#allocation10 + $0x16]]  ;;  %v801_v7 = vmul.f32 %v800_v61, %v2335_v1  ;;  %v794_v48 = vmax.f32 %v792_v3, %v793_v59  ;;  %v687_v47 = vadd.f32 %v2461_v27, %v677_v39 }
 0x15b   : > { %s3347_s23 = sld [smem:[#allocation40_spill]]  ;;  %v823_v31 = vstv %s2563_s19 }
 0x15c   : > { %v808_v9 = vstv %s3345_s26  ;;  %s2586_s27 = sld [smem:[#allocation12 + $0x16]]  ;;  %v802_v14 = vadd.f32 %v801_v7, %v799_v4  ;;  %v2605_v21 = vmul.f32 %v795_v5, %v794_v48  ;;  %v697_v55 = vadd.f32 %v2471_v35, %v687_v47 }
 0x15d   : > { %s3348_s28 = sld [smem:[#allocation94_spill]]  ;;  %v809_v12 = vmul.f32 %v808_v9, %v2331_v0  ;;  %v825_v34 = vstv %s2569_s5 }
 0x15e   : > { %s2591_s7 = sld [smem:[#allocation10 + $0x17]]  ;;  %v804_v22 = vmax.f32 %v802_v14, %v803_v8  ;;  %v707_v4 = vadd.f32 %v2482_v44, %v697_v55 }
 0x15f   : > { %v810_v15 = vstv %s3346_s29  ;;  %s2597_s20 = sld [smem:[#allocation12 + $0x17]] }
 0x160   : > { %v811_v56 = vmul.f32 %v810_v15, %v2335_v1  ;;  %s3349_s12 = sld [smem:[#allocation41_spill]]  ;;  %v2616_v32 = vmul.f32 %v805_v11, %v804_v22  ;;  %v833_v43 = vstv %s2580_s16  ;;  %v717_v11 = vadd.f32 %v2498_v58, %v707_v4 }
 0x161   : > { %s3350_s6 = sld [smem:[#allocation95_spill]]  ;;  %v818_v20 = vstv %s3347_s23 }
 0x162   : > { %s2603_s3 = sld [smem:[#allocation9 + $0xa9]]  ;;  %v819_v23 = vmul.f32 %v818_v20, %v2331_v0  ;;  %v812_v2 = vadd.f32 %v811_v56, %v809_v12  ;;  %v835_v49 = vstv %s2586_s27 }
 0x163   : > { %v820_v24 = vstv %s3348_s28  ;;  %s2609_s11 = sld [smem:[#allocation10 + $0x18]] }
 0x164   : > { %s3351_s17 = sld [smem:[#allocation42_spill]]  ;;  %v821_v30 = vmul.f32 %v820_v24, %v2335_v1  ;;  %v814_v6 = vmax.f32 %v812_v2, %v813_v16  ;;  %v843_v54 = vstv %s2591_s7 }
 0x165   : > { %s3352_s4 = sld [smem:[#allocation96_spill]]  ;;  %v845_v59 = vstv %s2597_s20 }
 0x166   : > { %s2614_s2 = sld [smem:[#allocation12 + $0x18]]  ;;  %v828_v37 = vstv %s3349_s12  ;;  %v822_v40 = vadd.f32 %v821_v30, %v819_v23  ;;  %v2638_v51 = vmul.f32 %v815_v19, %v814_v6  ;;  %v727_v19 = vadd.f32 %v2504_v62, %v717_v11 }
 0x167   : > { %v830_v38 = vstv %s3350_s6  ;;  %s2621_s10 = sld [smem:[#allocation10 + $0x19]]  ;;  %v829_v41 = vmul.f32 %v828_v37, %v2331_v0 }
 0x168   : > { %s2625_s18 = sld [smem:[#allocation12 + $0x19]]  ;;  %v831_v42 = vmul.f32 %v830_v38, %v2335_v1  ;;  %v824_v26 = vmax.f32 %v822_v40, %v823_v31  ;;  %v737_v62 = vadd.f32 %v2525_v18, %v727_v19 }
 0x169   : > { %s3353_s8 = sld [smem:[#allocation43_spill]]  ;;  %v853_v35 = vstv %s2609_s11 }
 0x16a   : > { %v838_v45 = vstv %s3351_s17  ;;  %s3354_s1 = sld [smem:[#allocation97_spill]]  ;;  %v832_v52 = vadd.f32 %v831_v42, %v829_v41  ;;  %v2655_v5 = vmul.f32 %v825_v34, %v824_v26  ;;  %v747_v40 = vadd.f32 %v2537_v28, %v737_v62 }
 0x16b   : > { %v840_v46 = vstv %s3352_s4  ;;  %s2631_s0 = sld [smem:[#allocation9 + $0xaa]]  ;;  %v839_v50 = vmul.f32 %v838_v45, %v2331_v0 }
 0x16c   : > { %s2636_s25 = sld [smem:[#allocation10 + $0x1a]]  ;;  %v841_v53 = vmul.f32 %v840_v46, %v2335_v1  ;;  %v834_v61 = vmax.f32 %v832_v52, %v833_v43  ;;  %v855_v10 = vstv %s2614_s2  ;;  %v757_v26 = vadd.f32 %v2543_v33, %v747_v40 }
 0x16d   : > { %s3355_s24 = sld [smem:[#allocation44_spill]]  ;;  %v863_v14 = vstv %s2621_s10 }
 0x16e   : > { %s2642_s19 = sld [smem:[#allocation12 + $0x1a]]  ;;  %v842_v63 = vadd.f32 %v841_v53, %v839_v50  ;;  %v2666_v12 = vmul.f32 %v835_v49, %v834_v61  ;;  %v865_v17 = vstv %s2625_s18 }
 0x16f   : > { %v848_v27 = vstv %s3353_s8  ;;  %s2648_s26 = sld [smem:[#allocation9 + $0xab]] }
 0x170   : > { %v850_v60 = vstv %s3354_s1  ;;  %s3356_s5 = sld [smem:[#allocation98_spill]]  ;;  %v849_v36 = vmul.f32 %v848_v27, %v2331_v0  ;;  %v844_v8 = vmax.f32 %v842_v63, %v843_v54 }
 0x171   : > { %v851_v3 = vmul.f32 %v850_v60, %v2335_v1  ;;  %s2652_s29 = sld [smem:[#allocation10 + $0x1b]] }
 0x172   : > { %s3357_s16 = sld [smem:[#allocation45_spill]]  ;;  %v2678_v58 = vmul.f32 %v845_v59, %v844_v8  ;;  %v873_v2 = vstv %s2636_s25  ;;  %v767_v59 = vadd.f32 %v2566_v29, %v757_v26 }
 0x173   : > { %v858_v7 = vstv %s3355_s24  ;;  %s2659_s23 = sld [smem:[#allocation12 + $0x1b]]  ;;  %v852_v9 = vadd.f32 %v851_v3, %v849_v36 }
 0x174   : > { %s3358_s27 = sld [smem:[#allocation99_spill]]  ;;  %v859_v48 = vmul.f32 %v858_v7, %v2331_v0  ;;  %v875_v30 = vstv %s2642_s19  ;;  %v777_v29 = vadd.f32 %v2571_v57, %v767_v59 }
 0x175   : > { %s2663_s28 = sld [smem:[#allocation10 + $0x1c]]  ;;  %v854_v15 = vmax.f32 %v852_v9, %v853_v35 }
 0x176   : > { %v860_v44 = vstv %s3356_s5  ;;  %s2670_s7 = sld [smem:[#allocation12 + $0x1c]]  ;;  %v787_v11 = vadd.f32 %v2593_v13, %v777_v29 }
 0x177   : > { %v861_v16 = vmul.f32 %v860_v44, %v2335_v1  ;;  %s3359_s20 = sld [smem:[#allocation46_spill]]  ;;  %v2684_v23 = vmul.f32 %v855_v10, %v854_v15  ;;  %v883_v41 = vstv %s2652_s29 }
 0x178   : > { %s3360_s12 = sld [smem:[#allocation100_spill]]  ;;  %v868_v56 = vstv %s3357_s16  ;;  %v797_v19 = vadd.f32 %v2605_v21, %v787_v11 }
 0x179   : > { %s2675_s6 = sld [smem:[#allocation9 + $0xac]]  ;;  %v869_v20 = vmul.f32 %v868_v56, %v2331_v0  ;;  %v862_v24 = vadd.f32 %v861_v16, %v859_v48  ;;  %v885_v46 = vstv %s2659_s23 }
 0x17a   : > { %v870_v22 = vstv %s3358_s27  ;;  %s2682_s11 = sld [smem:[#allocation10 + $0x1d]] }
 0x17b   : > { %s3361_s17 = sld [smem:[#allocation47_spill]]  ;;  %v871_v25 = vmul.f32 %v870_v22, %v2335_v1  ;;  %v864_v37 = vmax.f32 %v862_v24, %v863_v14  ;;  %v893_v50 = vstv %s2663_s28 }
 0x17c   : > { %s3362_s4 = sld [smem:[#allocation101_spill]]  ;;  %v895_v53 = vstv %s2670_s7 }
 0x17d   : > { %s2688_s2 = sld [smem:[#allocation10 + $0x1e]]  ;;  %v878_v31 = vstv %s3359_s20  ;;  %v872_v38 = vadd.f32 %v871_v25, %v869_v20  ;;  %v2711_v49 = vmul.f32 %v865_v17, %v864_v37 }
 0x17e   : > { %v880_v34 = vstv %s3360_s12  ;;  %s2694_s10 = sld [smem:[#allocation12 + $0x1d]]  ;;  %v879_v39 = vmul.f32 %v878_v31, %v2331_v0 }
 0x17f   : > { %v881_v6 = vmul.f32 %v880_v34, %v2335_v1  ;;  %s2698_s18 = sld [smem:[#allocation12 + $0x1e]]  ;;  %v874_v43 = vmax.f32 %v872_v38, %v873_v2 }
 0x180   : > { %s3363_s8 = sld [smem:[#allocation48_spill]]  ;;  %v903_v36 = vstv %s2682_s11 }
 0x181   : > { %v888_v18 = vstv %s3361_s17  ;;  %s3364_s1 = sld [smem:[#allocation102_spill]]  ;;  %v882_v45 = vadd.f32 %v881_v6, %v879_v39  ;;  %v2727_v61 = vmul.f32 %v875_v30, %v874_v43  ;;  %v807_v30 = vadd.f32 %v2616_v32, %v797_v19 }
 0x182   : > { %v890_v42 = vstv %s3362_s4  ;;  %s2704_s25 = sld [smem:[#allocation10 + $0x1f]]  ;;  %v889_v47 = vmul.f32 %v888_v18, %v2331_v0  ;;  %v940_v6 = vstv %s2315_s13 }
 0x183   : > { %s2708_s24 = sld [smem:[#allocation12 + $0x1f]]  ;;  %v891_v28 = vmul.f32 %v890_v42, %v2335_v1  ;;  %v884_v52 = vmax.f32 %v882_v45, %v883_v41  ;;  %v913_v10 = vstv %s2688_s2  ;;  %v817_v40 = vadd.f32 %v2638_v51, %v807_v30 }
 0x184   : > { %s3365_s19 = sld [smem:[#allocation49_spill]]  ;;  %v905_v8 = vstv %s2694_s10  ;;  %v941_v45 = vmul.f32 %v940_v6, %v2335_v1 }
 0x185   : > { %s2715_s5 = sld [smem:[#allocation10 + $0x20]]  ;;  %v892_v33 = vadd.f32 %v891_v28, %v889_v47  ;;  %v2729_v63 = vmul.f32 %v885_v46, %v884_v52  ;;  %v915_v14 = vstv %s2698_s18  ;;  %v827_v47 = vadd.f32 %v2655_v5, %v817_v40 }
 0x186   : > { %v898_v54 = vstv %s3363_s8  ;;  %s2720_s29 = sld [smem:[#allocation9 + $0xad]] }
 0x187   : > { %v900_v55 = vstv %s3364_s1  ;;  %s3366_s16 = sld [smem:[#allocation103_spill]]  ;;  %v899_v27 = vmul.f32 %v898_v54, %v2331_v0  ;;  %v894_v4 = vmax.f32 %v892_v33, %v893_v50 }
 0x188   : > { %s3367_s23 = sld [smem:[#allocation50_spill]]  ;;  %v901_v60 = vmul.f32 %v900_v55, %v2335_v1  ;;  %v923_v56 = vstv %s2704_s25  ;;  %v837_v55 = vadd.f32 %v2666_v12, %v827_v47 }
 0x189   : > { %s2725_s27 = sld [smem:[#allocation12 + $0x20]]  ;;  %v2750_v15 = vmul.f32 %v895_v53, %v894_v4  ;;  %v925_v22 = vstv %s2708_s24 }
 0x18a   : > { %v908_v3 = vstv %s3365_s19  ;;  %s2733_s28 = sld [smem:[#allocation10 + $0x21]]  ;;  %v902_v35 = vadd.f32 %v901_v60, %v899_v27  ;;  %v847_v29 = vadd.f32 %v2678_v58, %v837_v55 }
 0x18b   : > { %s3368_s7 = sld [smem:[#allocation104_spill]]  ;;  %v909_v7 = vmul.f32 %v908_v3, %v2331_v0  ;;  %v933_v62 = vstv %s2715_s5 }
 0x18c   : > { %s2737_s20 = sld [smem:[#allocation9 + $0xae]]  ;;  %v904_v44 = vmax.f32 %v902_v35, %v903_v36 }
 0x18d   : > { %v910_v9 = vstv %s3366_s16  ;;  %s2743_s12 = sld [smem:[#allocation12 + $0x21]] }
 0x18e   : > { %v918_v48 = vstv %s3367_s23  ;;  %s3369_s11 = sld [smem:[#allocation51_spill]]  ;;  %v911_v57 = vmul.f32 %v910_v9, %v2335_v1  ;;  %v2762_v24 = vmul.f32 %v905_v8, %v904_v44 }
 0x18f   : > { %s3370_s17 = sld [smem:[#allocation105_spill]]  ;;  %v919_v16 = vmul.f32 %v918_v48, %v2331_v0  ;;  %v935_v38 = vstv %s2725_s27  ;;  %v857_v48 = vadd.f32 %v2684_v23, %v847_v29 }
 0x190   : > { %s2748_s4 = sld [smem:[#allocation9 + $0xaf]]  ;;  %v912_v13 = vadd.f32 %v911_v57, %v909_v7  ;;  %v943_v18 = vstv %s2733_s28 }
 0x191   : > { %v920_v17 = vstv %s3368_s7  ;;  %s2755_s2 = sld [smem:[#allocation10 + $0x22]]  ;;  %v867_v23 = vadd.f32 %v2711_v49, %v857_v48 }
 0x192   : > { %s3371_s10 = sld [smem:[#allocation52_spill]]  ;;  %v921_v20 = vmul.f32 %v920_v17, %v2335_v1  ;;  %v914_v21 = vmax.f32 %v912_v13, %v913_v10  ;;  %v970_v10 = vstv %s2374_s15 }
 0x193   : > { %s2760_s18 = sld [smem:[#allocation12 + $0x22]]  ;;  %v945_v51 = vstv %s2743_s12  ;;  %v971_v44 = vmul.f32 %v970_v10, %v2335_v1 }
 0x194   : > { %v928_v25 = vstv %s3369_s11  ;;  %s2767_s8 = sld [smem:[#allocation10 + $0x23]]  ;;  %v922_v31 = vadd.f32 %v921_v20, %v919_v16  ;;  %v2784_v42 = vmul.f32 %v915_v14, %v914_v21 }
 0x195   : > { %v930_v2 = vstv %s3370_s17  ;;  %s3372_s1 = sld [smem:[#allocation53_spill]]  ;;  %v929_v34 = vmul.f32 %v928_v25, %v2331_v0 }
 0x196   : > { %s2771_s25 = sld [smem:[#allocation12 + $0x23]]  ;;  %v931_v37 = vmul.f32 %v930_v2, %v2335_v1  ;;  %v924_v41 = vmax.f32 %v922_v31, %v923_v56 }
 0x197   : > { %s3373_s24 = sld [smem:[#allocation106_spill]]  ;;  %v953_v5 = vstv %s2755_s2 }
 0x198   : > { %v938_v39 = vstv %s3371_s10  ;;  %s2777_s19 = sld [smem:[#allocation9 + $0xb0]]  ;;  %v932_v43 = vadd.f32 %v931_v37, %v929_v34  ;;  %v2796_v50 = vmul.f32 %v925_v22, %v924_v41  ;;  %v980_v22 = vstv %s2412_s21 }
 0x199   : > { %v939_v32 = vmul.f32 %v938_v39, %v2331_v0  ;;  %s2782_s5 = sld [smem:[#allocation10 + $0x24]]  ;;  %v955_v36 = vstv %s2760_s18  ;;  %v981_v49 = vmul.f32 %v980_v22, %v2335_v1  ;;  %v990_v37 = vstv %s2519_s14 }
 0x19a   : > { %s3374_s16 = sld [smem:[#allocation54_spill]]  ;;  %v934_v52 = vmax.f32 %v932_v43, %v933_v62  ;;  %v963_v35 = vstv %s2767_s8  ;;  %v877_v62 = vadd.f32 %v2727_v61, %v867_v23  ;;  %v991_v6 = vmul.f32 %v990_v37, %v2335_v1 }
 0x19b   : > { %s3375_s23 = sld [smem:[#allocation107_spill]]  ;;  %v948_v46 = vstv %s3372_s1  ;;  %v942_v53 = vadd.f32 %v941_v45, %v939_v32 }
 0x19c   : > { %s2788_s13 = sld [smem:[#allocation10 + $0x25]]  ;;  %v949_v26 = vmul.f32 %v948_v46, %v2331_v0  ;;  %v2812_v4 = vmul.f32 %v935_v38, %v934_v52  ;;  %v965_v8 = vstv %s2771_s25  ;;  %v887_v39 = vadd.f32 %v2729_v63, %v877_v62 }
 0x19d   : > { %v950_v28 = vstv %s3373_s24  ;;  %s2794_s27 = sld [smem:[#allocation12 + $0x24]]  ;;  %v944_v27 = vmax.f32 %v942_v53, %v943_v18  ;;  %v1000_v18 = vstv %s2558_s9  ;;  %v1010_v52 = vstv %s2576_s22 }
 0x19e   : > { %v951_v54 = vmul.f32 %v950_v28, %v2335_v1  ;;  %s2799_s28 = sld [smem:[#allocation12 + $0x25]]  ;;  %v897_v45 = vadd.f32 %v2750_v15, %v887_v39 }
 0x19f   : > { %s3376_s7 = sld [smem:[#allocation55_spill]]  ;;  %v2828_v57 = vmul.f32 %v945_v51, %v944_v27  ;;  %v973_v16 = vstv %s2782_s5  ;;  %v1001_v51 = vmul.f32 %v1000_v18, %v2335_v1 }
 0x1a0   : > { %v958_v59 = vstv %s3374_s16  ;;  %s2805_s12 = sld [smem:[#allocation10 + $0x26]]  ;;  %v952_v60 = vadd.f32 %v951_v54, %v949_v26  ;;  %v907_v53 = vadd.f32 %v2762_v24, %v897_v45 }
 0x1a1   : > { %v960_v33 = vstv %s3375_s23  ;;  %v959_v3 = vmul.f32 %v958_v59, %v2331_v0  ;;  %s2809_s11 = sld [smem:[#allocation12 + $0x26]] }
 0x1a2   : > { %v961_v12 = vmul.f32 %v960_v33, %v2335_v1  ;;  %s3377_s17 = sld [smem:[#allocation56_spill]]  ;;  %v954_v7 = vmax.f32 %v952_v60, %v953_v5  ;;  %v983_v25 = vstv %s2788_s13  ;;  %v1011_v33 = vmul.f32 %v1010_v52, %v2335_v1 }
 0x1a3   : > { %s2816_s2 = sld [smem:[#allocation10 + $0x27]]  ;;  %v975_v20 = vstv %s2794_s27  ;;  %v917_v60 = vadd.f32 %v2784_v42, %v907_v53 }
 0x1a4   : > { %s2821_s10 = sld [smem:[#allocation9 + $0xb1]]  ;;  %v962_v58 = vadd.f32 %v961_v12, %v959_v3  ;;  %v2830_v14 = vmul.f32 %v955_v36, %v954_v7  ;;  %v985_v21 = vstv %s2799_s28  ;;  %v1020_v3 = vstv %s2603_s3 }
 0x1a5   : > { %v968_v9 = vstv %s3376_s7  ;;  %s3378_s18 = sld [smem:[#allocation57_spill]]  ;;  %v1021_v7 = vmul.f32 %v1020_v3, %v2335_v1  ;;  %v927_v42 = vadd.f32 %v2796_v50, %v917_v60 }
 0x1a6   : > { %v969_v11 = vmul.f32 %v968_v9, %v2331_v0  ;;  %s2826_s8 = sld [smem:[#allocation12 + $0x27]]  ;;  %v964_v56 = vmax.f32 %v962_v58, %v963_v35  ;;  %v993_v38 = vstv %s2805_s12 }
 0x1a7   : > { %s2834_s15 = sld [smem:[#allocation10 + $0x28]]  ;;  %v995_v40 = vstv %s2809_s11  ;;  %v937_v50 = vadd.f32 %v2812_v4, %v927_v42 }
 0x1a8   : > { %v978_v17 = vstv %s3377_s17  ;;  %v972_v19 = vadd.f32 %v971_v44, %v969_v11  ;;  %s2838_s1 = sld [smem:[#allocation9 + $0xb2]]  ;;  %v2851_v31 = vmul.f32 %v965_v8, %v964_v56 }
 0x1a9   : > { %v979_v13 = vmul.f32 %v978_v17, %v2331_v0  ;;  %s2844_s25 = sld [smem:[#allocation12 + $0x28]]  ;;  %v1003_v43 = vstv %s2816_s2  ;;  %s3384_s2 = scalar_lea.vmem [#allocation3], %s2099_s30  ;;  %v947_v4 = vadd.f32 %v2828_v57, %v937_v50 }
 0x1aa   : > { %s3379_s24 = sld [smem:[#allocation58_spill]]  ;;  %v974_v30 = vmax.f32 %v972_v19, %v973_v16  ;;  %v2911_v11 = vld [vmem:[%s3384_s2] sm:$0xff] }
 0x1ab   : > { %v988_v2 = vstv %s3378_s18  ;;  %s2849_s5 = sld [smem:[#allocation9 + $0xb3]]  ;;  %v982_v61 = vadd.f32 %v981_v49, %v979_v13  ;;  %v957_v57 = vadd.f32 %v2830_v14, %v947_v4 }
 0x1ac   : > { %v989_v34 = vmul.f32 %v988_v2, %v2331_v0  ;;  %s2856_s21 = sld [smem:[#allocation10 + $0x29]]  ;;  %v2863_v41 = vmul.f32 %v975_v20, %v974_v30  ;;  %v1005_v26 = vstv %s2826_s8  ;;  %s3385_s8 = scalar_lea.vmem [#allocation7], %s2099_s30  ;;  %v1040_v20 = vstv %s2648_s26 }
 0x1ad   : > { %s3380_s16 = sld [smem:[#allocation59_spill]]  ;;  %v984_v63 = vmax.f32 %v982_v61, %v983_v25  ;;  %v1013_v55 = vstv %s2834_s15  ;;  %v2921_v16 = vld [vmem:[%s3385_s8] sm:$0xff]  ;;  %v1050_v61 = vstv %s2675_s6 }
 0x1ae   : > { %s2861_s23 = sld [smem:[#allocation12 + $0x29]]  ;;  %v992_v46 = vadd.f32 %v991_v6, %v989_v34  ;;  %v1041_v2 = vmul.f32 %v2921_v16, %v1040_v20  ;;  %v1051_v14 = vmul.f32 %v2921_v16, %v1050_v61 }
 0x1af   : > { %s2868_s14 = sld [smem:[#allocation10 + $0x2a]]  ;;  %v2885_v5 = vmul.f32 %v985_v21, %v984_v63  ;;  %v1015_v24 = vstv %s2844_s25 }
 0x1b0   : > { %v998_v32 = vstv %s3379_s24  ;;  %s3381_s13 = sld [smem:[#allocation60_spill]]  ;;  %v994_v54 = vmax.f32 %v992_v46, %v993_v38  ;;  %v1060_v46 = vstv %s2720_s29 }
 0x1b1   : > { %v999_v47 = vmul.f32 %v998_v32, %v2331_v0  ;;  %s2872_s27 = sld [smem:[#allocation12 + $0x2a]]  ;;  %v967_v32 = vadd.f32 %v2851_v31, %v957_v57 }
 0x1b2   : > { %s2878_s9 = sld [smem:[#allocation9 + $0xb4]]  ;;  %v2897_v29 = vmul.f32 %v995_v40, %v994_v54  ;;  %v1023_v8 = vstv %s2856_s21  ;;  %v1070_v54 = vstv %s2737_s20 }
 0x1b3   : > { %v1008_v28 = vstv %s3380_s16  ;;  %s2883_s28 = sld [smem:[#allocation10 + $0x2b]]  ;;  %v1002_v59 = vadd.f32 %v1001_v51, %v999_v47  ;;  %v977_v51 = vadd.f32 %v2863_v41, %v967_v32 }
 0x1b4   : > { %v1009_v15 = vmul.f32 %v1008_v28, %v2331_v0  ;;  %s3382_s7 = sld [smem:[#allocation61_spill]]  ;;  %v1025_v58 = vstv %s2861_s23 }
 0x1b5   : > { %s2889_s22 = sld [smem:[#allocation10 + $0x2c]]  ;;  %v1004_v12 = vmax.f32 %v1002_v59, %v1003_v43  ;;  %v1033_v23 = vstv %s2868_s14 }
 0x1b6   : > { %v1018_v27 = vstv %s3381_s13  ;;  %s2895_s12 = sld [smem:[#allocation12 + $0x2b]]  ;;  %v1012_v35 = vadd.f32 %v1011_v33, %v1009_v15 }
 0x1b7   : > { %v1019_v36 = vmul.f32 %v1018_v27, %v2331_v0  ;;  %s2900_s11 = sld [smem:[#allocation12 + $0x2c]]  ;;  %v1030_v0 = vstv %s2631_s0  ;;  %v2917_v44 = vmul.f32 %v1005_v26, %v1004_v12  ;;  %v1035_v19 = vstv %s2872_s27 }
 0x1b8   : > { %s3383_s17 = sld [smem:[#allocation62_spill]]  ;;  %v1014_v10 = vmax.f32 %v1012_v35, %v1013_v55  ;;  %v1031_v17 = vmul.f32 %v2921_v16, %v1030_v0  ;;  %v1061_v26 = vmul.f32 %v2921_v16, %v1060_v46  ;;  %v987_v55 = vadd.f32 %v2885_v5, %v977_v51 }
 0x1b9   : > { %s2906_s3 = sld [smem:[#allocation10 + $0x2d]]  ;;  %v1022_v48 = vadd.f32 %v1021_v7, %v1019_v36  ;;  %v1043_v49 = vstv %s2883_s28  ;;  %v1071_v27 = vmul.f32 %v2921_v16, %v1070_v54  ;;  %v1080_v36 = vstv %s2748_s4 }
 0x1ba   : > { %v1028_v9 = vstv %s3382_s7  ;;  %s2914_s18 = sld [smem:[#allocation12 + $0x2d]]  ;;  %v2937_v62 = vmul.f32 %v1015_v24, %v1014_v10  ;;  %v997_v3 = vadd.f32 %v2897_v29, %v987_v55  ;;  %v1130_v55 = vstv %s2878_s9 }
 0x1bb   : > { %v1029_v1 = vmul.f32 %v2911_v11, %v1028_v9  ;;  %s3386_s0 = sld [smem:[#allocation63_spill]]  ;;  %v1024_v56 = vmax.f32 %v1022_v48, %v1023_v8  ;;  %v1053_v6 = vstv %s2889_s22  ;;  %v1081_v8 = vmul.f32 %v2921_v16, %v1080_v36 }
 0x1bc   : > { %s2925_s15 = sld [smem:[#allocation10 + $0x2e]]  ;;  %v1045_v39 = vstv %s2895_s12  ;;  %v1007_v0 = vadd.f32 %v2917_v44, %v997_v3  ;;  %v1090_v48 = vstv %s2777_s19 }
 0x1bd   : > { %s2930_s25 = sld [smem:[#allocation9 + $0xb5]]  ;;  %v1032_v22 = vadd.f32 %v1031_v17, %v1029_v1  ;;  %v2939_v30 = vmul.f32 %v1025_v58, %v1024_v56  ;;  %v1055_v43 = vstv %s2900_s11  ;;  %v1091_v17 = vmul.f32 %v2921_v16, %v1090_v48 }
 0x1be   : > { %v1038_v13 = vstv %s3383_s17  ;;  %s3387_s24 = sld [smem:[#allocation64_spill]] }
 0x1bf   : > { %v1039_v25 = vmul.f32 %v2911_v11, %v1038_v13  ;;  %s2935_s21 = sld [smem:[#allocation12 + $0x2e]]  ;;  %v1034_v34 = vmax.f32 %v1032_v22, %v1033_v23  ;;  %v1063_v47 = vstv %s2906_s3  ;;  %v1017_v23 = vadd.f32 %v2937_v62, %v1007_v0 }
 0x1c0   : > { %s2943_s26 = sld [smem:[#allocation10 + $0x2f]]  ;;  %v1065_v28 = vstv %s2914_s18 }
 0x1c1   : > { %v1048_v21 = vstv %s3386_s0  ;;  %v1042_v37 = vadd.f32 %v1041_v2, %v1039_v25  ;;  %s2947_s16 = sld [smem:[#allocation9 + $0xb6]]  ;;  %v2960_v45 = vmul.f32 %v1035_v19, %v1034_v34  ;;  %v1100_v19 = vstv %s2821_s10 }
 0x1c2   : > { %v1049_v38 = vmul.f32 %v2911_v11, %v1048_v21  ;;  %s2953_s23 = sld [smem:[#allocation12 + $0x2f]]  ;;  %v1073_v15 = vstv %s2925_s15  ;;  %v1027_v25 = vadd.f32 %v2939_v30, %v1017_v23  ;;  %v1101_v62 = vmul.f32 %v2921_v16, %v1100_v19 }
 0x1c3   : > { %s3388_s14 = sld [smem:[#allocation65_spill]]  ;;  %v1044_v18 = vmax.f32 %v1042_v37, %v1043_v49  ;;  %v1110_v37 = vstv %s2838_s1  ;;  %v1140_v3 = vstv %s2930_s25 }
 0x1c4   : > { %v1058_v40 = vstv %s3387_s24  ;;  %s2958_s13 = sld [smem:[#allocation9 + $0xb7]]  ;;  %v1052_v31 = vadd.f32 %v1051_v14, %v1049_v38  ;;  %v1037_v38 = vadd.f32 %v2960_v45, %v1027_v25  ;;  %v1111_v61 = vmul.f32 %v2921_v16, %v1110_v37 }
 0x1c5   : > { %v1059_v63 = vmul.f32 %v2911_v11, %v1058_v40  ;;  %s2965_s6 = sld [smem:[#allocation10 + $0x30]]  ;;  %v2972_v52 = vmul.f32 %v1045_v39, %v1044_v18  ;;  %v1075_v60 = vstv %s2935_s21 }
 0x1c6   : > { %s3389_s27 = sld [smem:[#allocation66_spill]]  ;;  %v1054_v41 = vmax.f32 %v1052_v31, %v1053_v6  ;;  %v1083_v35 = vstv %s2943_s26 }
 0x1c7   : > { %s2970_s28 = sld [smem:[#allocation12 + $0x30]]  ;;  %v1062_v59 = vadd.f32 %v1061_v26, %v1059_v63  ;;  %v1047_v14 = vadd.f32 %v2972_v52, %v1037_v38 }
 0x1c8   : > { %s2977_s29 = sld [smem:[#allocation10 + $0x31]]  ;;  %v1056_v7 = vmul.f32 %v1055_v43, %v1054_v41  ;;  %v1085_v10 = vstv %s2953_s23 }
 0x1c9   : > { %v1068_v53 = vstv %s3388_s14  ;;  %s3390_s7 = sld [smem:[#allocation67_spill]]  ;;  %v1064_v12 = vmax.f32 %v1062_v59, %v1063_v47  ;;  %v1120_v47 = vstv %s2849_s5 }
 0x1ca   : > { %v1069_v33 = vmul.f32 %v2911_v11, %v1068_v53  ;;  %s2981_s22 = sld [smem:[#allocation12 + $0x31]]  ;;  %v1057_v26 = vadd.f32 %v1056_v7, %v1047_v14  ;;  %v1121_v52 = vmul.f32 %v2921_v16, %v1120_v47 }
 0x1cb   : > { %s2987_s20 = sld [smem:[#allocation9 + $0xb8]]  ;;  %v1066_v58 = vmul.f32 %v1065_v28, %v1064_v12  ;;  %v1093_v56 = vstv %s2965_s6 }
 0x1cc   : > { %v1078_v24 = vstv %s3389_s27  ;;  %s2992_s12 = sld [smem:[#allocation10 + $0x32]]  ;;  %v1072_v42 = vadd.f32 %v1071_v27, %v1069_v33  ;;  %v1131_v27 = vmul.f32 %v2921_v16, %v1130_v55 }
 0x1cd   : > { %v1079_v5 = vmul.f32 %v2911_v11, %v1078_v24  ;;  %s3391_s11 = sld [smem:[#allocation68_spill]]  ;;  %v1095_v4 = vstv %s2970_s28  ;;  %v1067_v59 = vadd.f32 %v1066_v58, %v1057_v26 }
 0x1ce   : > { %s2996_s17 = sld [smem:[#allocation10 + $0x33]]  ;;  %v1074_v1 = vmax.f32 %v1072_v42, %v1073_v15  ;;  %v1103_v49 = vstv %s2977_s29 }
 0x1cf   : > { %v1088_v9 = vstv %s3390_s7  ;;  %s3002_s4 = sld [smem:[#allocation12 + $0x32]]  ;;  %v1082_v50 = vadd.f32 %v1081_v8, %v1079_v5  ;;  %v1141_v8 = vmul.f32 %v2921_v16, %v1140_v3 }
 0x1d0   : > { %v1089_v29 = vmul.f32 %v2911_v11, %v1088_v9  ;;  %s3005_s3 = sld [smem:[#allocation12 + $0x33]]  ;;  %v1076_v2 = vmul.f32 %v1075_v60, %v1074_v1  ;;  %v1105_v57 = vstv %s2981_s22 }
 0x1d1   : > { %s3392_s2 = sld [smem:[#allocation69_spill]]  ;;  %v1084_v13 = vmax.f32 %v1082_v50, %v1083_v35 }
 0x1d2   : > { %s3011_s18 = sld [smem:[#allocation10 + $0x34]]  ;;  %v1092_v20 = vadd.f32 %v1091_v17, %v1089_v29  ;;  %v1113_v32 = vstv %s2992_s12  ;;  %v1077_v5 = vadd.f32 %v1076_v2, %v1067_v59 }
 0x1d3   : > { %v1098_v44 = vstv %s3391_s11  ;;  %s3015_s19 = sld [smem:[#allocation12 + $0x34]]  ;;  %v1086_v6 = vmul.f32 %v1085_v10, %v1084_v13  ;;  %v1150_v10 = vstv %s2947_s16 }
 0x1d4   : > { %v1099_v22 = vmul.f32 %v2911_v11, %v1098_v44  ;;  %s3393_s8 = sld [smem:[#allocation70_spill]]  ;;  %v1094_v21 = vmax.f32 %v1092_v20, %v1093_v56  ;;  %v1123_v51 = vstv %s2996_s17  ;;  %v1151_v23 = vmul.f32 %v2921_v16, %v1150_v10 }
 0x1d5   : > { %s3020_s0 = sld [smem:[#allocation10 + $0x35]]  ;;  %v1115_v46 = vstv %s3002_s4  ;;  %v1087_v29 = vadd.f32 %v1086_v6, %v1077_v5  ;;  %v1160_v20 = vstv %s2958_s13 }
 0x1d6   : > { %s3025_s10 = sld [smem:[#allocation9 + $0xb9]]  ;;  %v1102_v39 = vadd.f32 %v1101_v62, %v1099_v22  ;;  %v1096_v40 = vmul.f32 %v1095_v4, %v1094_v21  ;;  %v1125_v53 = vstv %s3005_s3  ;;  %v1161_v2 = vmul.f32 %v2921_v16, %v1160_v20 }
 0x1d7   : > { %v1108_v34 = vstv %s3392_s2  ;;  %s3394_s15 = sld [smem:[#allocation71_spill]] }
 0x1d8   : > { %v1109_v30 = vmul.f32 %v2911_v11, %v1108_v34  ;;  %s3030_s24 = sld [smem:[#allocation12 + $0x35]]  ;;  %v1104_v43 = vmax.f32 %v1102_v39, %v1103_v49  ;;  %v1133_v41 = vstv %s3011_s18  ;;  %v1097_v44 = vadd.f32 %v1096_v40, %v1087_v29 }
 0x1d9   : > { %s3034_s1 = sld [smem:[#allocation10 + $0x36]]  ;;  %v1135_v60 = vstv %s3015_s19 }
 0x1da   : > { %v1118_v18 = vstv %s3393_s8  ;;  %v1112_v45 = vadd.f32 %v1111_v61, %v1109_v30  ;;  %s3038_s21 = sld [smem:[#allocation9 + $0xba]]  ;;  %v1106_v54 = vmul.f32 %v1105_v57, %v1104_v43  ;;  %v1170_v57 = vstv %s2987_s20 }
 0x1db   : > { %v1119_v63 = vmul.f32 %v2911_v11, %v1118_v18  ;;  %s3044_s26 = sld [smem:[#allocation12 + $0x36]]  ;;  %v1143_v12 = vstv %s3020_s0  ;;  %v1171_v6 = vmul.f32 %v2921_v16, %v1170_v57 }
 0x1dc   : > { %s3395_s23 = sld [smem:[#allocation72_spill]]  ;;  %v1114_v28 = vmax.f32 %v1112_v45, %v1113_v32  ;;  %v1107_v62 = vadd.f32 %v1106_v54, %v1097_v44  ;;  %v1180_v43 = vstv %s3025_s10 }
 0x1dd   : > { %v1128_v31 = vstv %s3394_s15  ;;  %s3048_s14 = sld [smem:[#allocation9 + $0xbb]]  ;;  %v1122_v33 = vadd.f32 %v1121_v52, %v1119_v63  ;;  %v1181_v47 = vmul.f32 %v2921_v16, %v1180_v43 }
 0x1de   : > { %v1129_v15 = vmul.f32 %v2911_v11, %v1128_v31  ;;  %s3053_s5 = sld [smem:[#allocation10 + $0x37]]  ;;  %v1116_v24 = vmul.f32 %v1115_v46, %v1114_v28  ;;  %v1145_v9 = vstv %s3030_s24 }
 0x1df   : > { %s3396_s6 = sld [smem:[#allocation73_spill]]  ;;  %v1124_v35 = vmax.f32 %v1122_v33, %v1123_v51  ;;  %v1153_v1 = vstv %s3034_s1 }
 0x1e0   : > { %s3057_s27 = sld [smem:[#allocation12 + $0x37]]  ;;  %v1132_v7 = vadd.f32 %v1131_v27, %v1129_v15  ;;  %v1117_v30 = vadd.f32 %v1116_v24, %v1107_v62 }
 0x1e1   : > { %s3062_s28 = sld [smem:[#allocation10 + $0x38]]  ;;  %v1126_v50 = vmul.f32 %v1125_v53, %v1124_v35  ;;  %v1155_v19 = vstv %s3044_s26 }
 0x1e2   : > { %v1138_v36 = vstv %s3395_s23  ;;  %s3397_s9 = sld [smem:[#allocation74_spill]]  ;;  %v1134_v48 = vmax.f32 %v1132_v7, %v1133_v41  ;;  %v1190_v41 = vstv %s3038_s21 }
 0x1e3   : > { %v1139_v42 = vmul.f32 %v2911_v11, %v1138_v36  ;;  %s3065_s29 = sld [smem:[#allocation12 + $0x38]]  ;;  %v1127_v45 = vadd.f32 %v1126_v50, %v1117_v30  ;;  %v1191_v24 = vmul.f32 %v2921_v16, %v1190_v41  ;;  %v1200_v5 = vstv %s3048_s14 }
 0x1e4   : > { %s3071_s25 = sld [smem:[#allocation9 + $0xbc]]  ;;  %v1136_v4 = vmul.f32 %v1135_v60, %v1134_v48  ;;  %v1163_v49 = vstv %s3053_s5 }
 0x1e5   : > { %v1148_v0 = vstv %s3396_s6  ;;  %s3075_s7 = sld [smem:[#allocation10 + $0x39]]  ;;  %v1142_v17 = vadd.f32 %v1141_v8, %v1139_v42  ;;  %v1201_v8 = vmul.f32 %v2921_v16, %v1200_v5 }
 0x1e6   : > { %v1149_v58 = vmul.f32 %v2911_v11, %v1148_v0  ;;  %s3398_s22 = sld [smem:[#allocation75_spill]]  ;;  %v1165_v38 = vstv %s3057_s27  ;;  %v1137_v52 = vadd.f32 %v1136_v4, %v1127_v45 }
 0x1e7   : > { %s3079_s12 = sld [smem:[#allocation10 + $0x3a]]  ;;  %v1144_v22 = vmax.f32 %v1142_v17, %v1143_v12  ;;  %v1173_v40 = vstv %s3062_s28 }
 0x1e8   : > { %v1158_v56 = vstv %s3397_s9  ;;  %s3084_s16 = sld [smem:[#allocation12 + $0x39]]  ;;  %v1152_v25 = vadd.f32 %v1151_v23, %v1149_v58 }
 0x1e9   : > { %v1159_v13 = vmul.f32 %v2911_v11, %v1158_v56  ;;  %s3087_s11 = sld [smem:[#allocation12 + $0x3a]]  ;;  %v1146_v61 = vmul.f32 %v1145_v9, %v1144_v22  ;;  %v1175_v18 = vstv %s3065_s29 }
 0x1ea   : > { %s3399_s17 = sld [smem:[#allocation76_spill]]  ;;  %v1154_v34 = vmax.f32 %v1152_v25, %v1153_v1  ;;  %v1210_v29 = vstv %s3071_s25 }
 0x1eb   : > { %s3092_s4 = sld [smem:[#allocation10 + $0x3b]]  ;;  %v1162_v37 = vadd.f32 %v1161_v2, %v1159_v13  ;;  %v1183_v26 = vstv %s3075_s7  ;;  %v1147_v27 = vadd.f32 %v1146_v61, %v1137_v52  ;;  %v1211_v23 = vmul.f32 %v2921_v16, %v1210_v29 }
 0x1ec   : > { %v1168_v21 = vstv %s3398_s22  ;;  %s3096_s13 = sld [smem:[#allocation12 + $0x3b]]  ;;  %v1156_v51 = vmul.f32 %v1155_v19, %v1154_v34 }
 0x1ed   : > { %v1169_v39 = vmul.f32 %v2911_v11, %v1168_v21  ;;  %s3400_s3 = sld [smem:[#allocation77_spill]]  ;;  %v1164_v32 = vmax.f32 %v1162_v37, %v1163_v49  ;;  %v1193_v59 = vstv %s3079_s12 }
 0x1ee   : > { %s3100_s2 = sld [smem:[#allocation10 + $0x3c]]  ;;  %v1185_v55 = vstv %s3084_s16  ;;  %v1157_v7 = vadd.f32 %v1156_v51, %v1147_v27  ;;  %s347_s16 = scalar_lea.vmem [#allocation13], %s2099_s30 }
 0x1ef   : > { %s3105_s20 = sld [smem:[#allocation9 + $0xbd]]  ;;  %v1172_v63 = vadd.f32 %v1171_v6, %v1169_v39  ;;  %v1166_v31 = vmul.f32 %v1165_v38, %v1164_v32  ;;  %v1195_v36 = vstv %s3087_s11  ;;  %s1262_s11 = sshll.u32 %s347_s16, 4  ;;  %s1263_s11 = int_to_ptr.vmem [resolvable:$true] %s1262_s11 }
 0x1f0   : > { %v1178_v14 = vstv %s3399_s17  ;;  %s3401_s18 = sld [smem:[#allocation78_spill]] }
 0x1f1   : > { %v1179_v46 = vmul.f32 %v2911_v11, %v1178_v14  ;;  %s3109_s19 = sld [smem:[#allocation12 + $0x3c]]  ;;  %v1174_v53 = vmax.f32 %v1172_v63, %v1173_v40  ;;  %v1203_v35 = vstv %s3092_s4  ;;  %v1167_v58 = vadd.f32 %v1166_v31, %v1157_v7 }
 0x1f2   : > { %s3113_s8 = sld [smem:[#allocation9 + $0xbe]]  ;;  %v1205_v9 = vstv %s3096_s13 }
 0x1f3   : > { %v1188_v28 = vstv %s3400_s3  ;;  %v1182_v54 = vadd.f32 %v1181_v47, %v1179_v46  ;;  %s3116_s0 = sld [smem:[#allocation10 + $0x3d]]  ;;  %v1176_v3 = vmul.f32 %v1175_v18, %v1174_v53 }
 0x1f4   : > { %v1189_v15 = vmul.f32 %v2911_v11, %v1188_v28  ;;  %s3122_s10 = sld [smem:[#allocation9 + $0xbf]]  ;;  %v1213_v48 = vstv %s3100_s2 }
 0x1f5   : > { %s3402_s15 = sld [smem:[#allocation79_spill]]  ;;  %v1184_v60 = vmax.f32 %v1182_v54, %v1183_v26  ;;  %v1220_v19 = vstv %s3105_s20  ;;  %v1177_v13 = vadd.f32 %v1176_v3, %v1167_v58 }
 0x1f6   : > { %v1198_v33 = vstv %s3401_s18  ;;  %s3126_s24 = sld [smem:[#allocation12 + $0x3d]]  ;;  %v1192_v42 = vadd.f32 %v1191_v24, %v1189_v15  ;;  %v1221_v2 = vmul.f32 %v2921_v16, %v1220_v19 }
 0x1f7   : > { %v1199_v12 = vmul.f32 %v2911_v11, %v1198_v33  ;;  %s3131_s1 = sld [smem:[#allocation10 + $0x3e]]  ;;  %v1186_v0 = vmul.f32 %v1185_v55, %v1184_v60  ;;  %v1215_v56 = vstv %s3109_s19 }
 0x1f8   : > { %s3403_s21 = sld [smem:[#allocation80_spill]]  ;;  %v1194_v1 = vmax.f32 %v1192_v42, %v1193_v59  ;;  %v1230_v37 = vstv %s3113_s8 }
 0x1f9   : > { %s3138_s26 = sld [smem:[#allocation12 + $0x3e]]  ;;  %v1202_v50 = vadd.f32 %v1201_v8, %v1199_v12  ;;  %v1223_v62 = vstv %s3116_s0  ;;  %v1187_v21 = vadd.f32 %v1186_v0, %v1177_v13  ;;  %v1231_v61 = vmul.f32 %v2921_v16, %v1230_v37 }
 0x1fa   : > { %s3404_s23 = sld [smem:[#allocation81_spill]]  ;;  %v1196_v20 = vmul.f32 %v1195_v36, %v1194_v1  ;;  %v1240_v18 = vstv %s3122_s10 }
 0x1fb   : > { %v1208_v10 = vstv %s3402_s15  ;;  %s3141_s14 = sld [smem:[#allocation10 + $0x3f]]  ;;  %v1204_v4 = vmax.f32 %v1202_v50, %v1203_v35  ;;  %v1241_v51 = vmul.f32 %v2921_v16, %v1240_v18 }
 0x1fc   : > { %v1209_v17 = vmul.f32 %v2911_v11, %v1208_v10  ;;  %s3405_s5 = sld [smem:[#allocation82_spill]]  ;;  %v1225_v30 = vstv %s3126_s24  ;;  %v1197_v6 = vadd.f32 %v1196_v20, %v1187_v21 }
 0x1fd   : > { %s3148_s6 = sld [smem:[#allocation12 + $0x3f]]  ;;  %v1206_v57 = vmul.f32 %v1205_v9, %v1204_v4  ;;  %v1233_v40 = vstv %s3131_s1 }
 0x1fe   : > { %v1218_v44 = vstv %s3403_s21  ;;  %v1212_v25 = vadd.f32 %v1211_v23, %v1209_v17  ;;  %s3406_s27 = sld [smem:[#allocation23_spill]] }
 0x1ff   : > { %v1219_v22 = vmul.f32 %v2911_v11, %v1218_v44  ;;  %v1207_v46 = vadd.f32 %v1206_v57, %v1197_v6  ;;  %v1235_v47 = vstv %s3138_s26  ;;  %s3407_s9 = sld [smem:[#allocation28_spill]] }
 0x200   : > { %v1228_v49 = vstv %s3404_s23  ;;  %v1214_v38 = vmax.f32 %v1212_v25, %v1213_v48  ;;  %s3408_s7 = sld [smem:[#allocation113_spill]] }
 0x201   : > { %v1229_v34 = vmul.f32 %v2911_v11, %v1228_v49  ;;  %v1222_v39 = vadd.f32 %v1221_v2, %v1219_v22  ;;  %v1243_v28 = vstv %s3141_s14 }
 0x202   : > { %v1238_v32 = vstv %s3405_s5  ;;  %v1216_v14 = vmul.f32 %v1215_v56, %v1214_v38 }
 0x203   : > { %v1224_v43 = vmax.f32 %v1222_v39, %v1223_v62  ;;  %v1232_v45 = vadd.f32 %v1231_v61, %v1229_v34  ;;  %v1239_v63 = vmul.f32 %v2911_v11, %v1238_v32  ;;  %v1245_v15 = vstv %s3148_s6 }
 0x204   : > { %s1660_s28 = sshll.u32 %s3406_s27, 3  ;;  %v1217_v52 = vadd.f32 %v1216_v14, %v1207_v46 }
 0x205   : > { %v1226_v31 = vmul.f32 %v1225_v30, %v1224_v43  ;;  %v1234_v26 = vmax.f32 %v1232_v45, %v1233_v40  ;;  %v1242_v53 = vadd.f32 %v1241_v51, %v1239_v63  ;;  %s1250_s4 = scalar_lea.sflag [#allocation5], %s3407_s9 }
 0x206   : > { %s1260_s22 = scalar_lea.hbm %s3408_s7, %s1660_s28  ;;  %s1872_s30 = scalar_lea.hbm %s3408_s7, 16 }
 0x207   : > { %v1236_v54 = vmul.f32 %v1235_v47, %v1234_v26  ;;  %v1227_v55 = vadd.f32 %v1226_v31, %v1217_v52  ;;  %v1244_v11 = vmax.f32 %v1242_v53, %v1243_v28  ;;  %s1264_s17 = sshll.u32 %s1260_s22, 4  ;;  %s1265_s17 = int_to_ptr.hbm [resolvable:$true] %s1264_s17 }
 0x208   : > { %s1866_s13 = sshra.s32 %s1265_s17, 4  ;;  %s1867_s13 = int_to_ptr.hbm [resolvable:$true] %s1866_s13 }
 0x209   : > { %v1237_v41 = vadd.f32 %v1236_v54, %v1227_v55  ;;  %v1246_v16 = vmul.f32 %v1245_v15, %v1244_v11  ;;  %s1868_s3 = scalar_lea.hbm %s1867_s13, 8  ;;  %p1873_p2 = scmp.lt.s32.totalorder %s1867_s13, %s3408_s7 }
 0x20a   : > { %p1869_p1 = scmp.ne.s32.totalorder %s1867_s13, %s1868_s3  ;;  %p1874_p11 = scmp.lt.s32.totalorder %s1872_s30, %s1868_s3 }
 0x20b   : > { %v1247_v59 = vadd.f32 %v1246_v16, %v1237_v41 }
 0x20c   : > { %p1870_p4 = pnand %p1869_p1, %p2046_p7  ;;  %p1875_p10 = por %p1874_p11, %p1873_p2 }
 0x20d   : > { %1248 = vst [vmem:[%s347_s16] sm:$0xff] %v1247_v59 }
 0x20e   : > { %p1871_p8 = pneg %p1870_p4 }
 0x210   : > { %p1876_p12 = pnand %p1875_p10, %p1871_p8 }
 0x212   : > { %1879 = shalt.err (!%p1876_p12)
}
 0x213   : > { %1679 = dma.vmem_to_hbm [thread:$0]  (%p2046_p7), %s1263_s11, 128, %s1265_s17, %s1250_s4  }
 0x214 PF: > { %s3410_s8 = sld [smem:[#allocation19_spill]] }
 0x215   : > { %s3412_s10 = sld [smem:[#allocation22_spill]] }
 0x21a   : > { %s1276_s15 = sand.u32 1, %s3410_s8  }
 0x21b   : > { %p3413_p0 = scmp.ge.s32.totalorder %s3412_s10, 2  ;;  %s1277_s24 = scalar_lea.sflag [#allocation5], %s1276_s15 }
 0x21d   : > { %p1699_p9 = pnand %p3413_p0, %p2008_p6 }
 0x21f   : > { %p1700_p13 = pneg %p1699_p9 }
 0x221   : > { %1913 = dma.done.wait (%p1700_p13), %s1277_s24, 128  }
 0x222   : > { %1915 = vsyncadd (%p1700_p13), %s1277_s24, 4294967168  ;;  %s3414_s26 = sld [smem:[#allocation25_spill]] }
 0x223   : > { %s3415_s23 = sld [smem:[#allocation20_spill]] }
 0x224   : > { %s3416_s24 = sld [smem:[#allocation21_spill]] }
 0x225   : > { %s3417_s25 = sld [smem:[#allocation26_spill]] }
 0x228   : > { %p25_p3 = scmp.ge.s32.totalorder %s3414_s26, 4  }
 0x22a   :  { %27 = sbr.rel (!%p25_p3) target bundleno = 17 (0x11), region = 115 }
 0x22f   :  { %1283 = vsyncpa [#allocation4], 1 }
 0x230   :  { %1285 = vsyncpa [#allocation4 + $0x1], 1 }
 0x231   :  { %1286 = vsyncpa [#allocation8], 1 }
 0x232   :  { %1288 = vsyncpa [#allocation8 + $0x1], 1 }
 0x233   :  { %1289 = vsyncpa [#allocation5], 1 }
 0x234   :  { %1291 = vsyncpa [#allocation5 + $0x1], 1 }
 0x235   :  { %1292 = vsyncpa [#allocation6], 1 }
 0x236   :  { %1294 = vsyncpa [#allocation6 + $0x1], 1 }
 0x237   :  { %1295 = vsyncpa [#allocation11], 1 }

</bundles_post_ra>
